<compile_context>
chip_gen: v5e
topology: v5e:2x2
jax: 0.10.0
libtpu: 0.0.40
codegen_flags: <defaults>
</compile_context>

<pallas_src>
import jax
import jax.numpy as jnp
from jax import lax
from jax.experimental import pallas as pl
from jax.experimental.pallas import tpu as pltpu

EPS = 1e-5


# ----------------------------------------------------------------------------
# Fused DSCNN kernel
# ----------------------------------------------------------------------------
def _make_dscnn_kernel(cfgs, C):
    """cfgs: tuple of per-layer dicts of static ints
    (H, W, Cin, kt, kf, st, sf, pt, pf, Ho, Wo, has_pw)."""
    n_weight_refs = sum(6 if cfg["has_pw"] else 3 for cfg in cfgs)

    def kernel(*refs):
        x_ref = refs[0]
        w_refs = refs[1:1 + n_weight_refs]
        o_ref = refs[1 + n_weight_refs]
        pad_refs = refs[2 + n_weight_refs:]

        # first layer input: (H, W, 1); the size-1 minor dim broadcasts across
        # the C output channels inside the per-tap FMA below.
        act = x_ref[0].astype(jnp.float32)

        wi = 0
        for li, cfg in enumerate(cfgs):
            H, W, Ho, Wo = cfg["H"], cfg["W"], cfg["Ho"], cfg["Wo"]
            kt, kf = cfg["kt"], cfg["kf"]
            st, sf = cfg["st"], cfg["sf"]
            pt, pf = cfg["pt"], cfg["pf"]
            pad_ref = pad_refs[li]

            w_dw, s1, b1 = w_refs[wi], w_refs[wi + 1], w_refs[wi + 2]
            wi += 3
            if cfg["has_pw"]:
                w_pw, s2, b2 = w_refs[wi], w_refs[wi + 1], w_refs[wi + 2]
                wi += 3

            # zero-padded copy of the activation in a VMEM scratch buffer
            pad_ref[...] = jnp.zeros(pad_ref.shape, pad_ref.dtype)
            pad_ref[pl.ds(pt, H), pl.ds(pf, W), :] = act

            # (depthwise / single-input-channel) conv:
            # one fused multiply-add per tap, channels on the lane dim.
            acc = jnp.zeros((Ho, Wo, C), jnp.float32)
            for ky in range(kt):
                drow = pl.ds(ky, Ho) if st == 1 else pl.ds(ky, Ho, stride=st)
                for kx in range(kf):
                    dcol = pl.ds(kx, Wo) if sf == 1 else pl.ds(kx, Wo, stride=sf)
                    w_tap = w_dw[ky * kf + kx]                       # (C,)
                    acc = acc + pad_ref[drow, dcol, :] * w_tap[None, None, :]

            # folded conv-bias + BatchNorm + ReLU: one per-channel scale/bias FMA
            act = jnp.maximum(acc * s1[0][None, None, :] + b1[0][None, None, :], 0.0)

            if cfg["has_pw"]:
                # pointwise 1x1 conv == (H*W, C) @ (C, C) matmul on the MXU,
                # followed by its folded affine + ReLU.
                h2d = act.reshape(Ho * Wo, C)
                z = jnp.dot(h2d, w_pw[...], preferred_element_type=jnp.float32)
                z = jnp.maximum(z * s2[0][None, :] + b2[0][None, :], 0.0)
                act = z.reshape(Ho, Wo, C)

        # AvgPool2d over the full spatial extent + Flatten -> (1, 1, C)
        pooled = jnp.mean(act, axis=(0, 1))
        o_ref[...] = pooled.reshape(1, 1, C).astype(o_ref.dtype)

    return kernel


# ----------------------------------------------------------------------------
# Parameter folding / wrapper
# ----------------------------------------------------------------------------
def _fold_bn(conv_bias, gamma, beta, mean, var):
    """Fold conv bias + eval-mode BatchNorm into per-channel (scale, bias)."""
    s = gamma * lax.rsqrt(var + EPS)
    return s, beta + s * (conv_bias - mean)


def _dw_weight(w):
    """Torch (C, 1, kt, kf) depthwise/first-conv weight -> (kt*kf, C)."""
    C, _, kt, kf = w.shape
    return jnp.transpose(w[:, 0], (1, 2, 0)).reshape(kt * kf, C)


def _replicated_spec(arr):
    ndim = arr.ndim

    def index_map(n):
        return (0,) * ndim

    return pl.BlockSpec(arr.shape, index_map)


def dscnn_forward(x_nchw, params):
    """x_nchw: (N, 1, H, W) float32; params: list of per-layer dicts in torch
    layout (see init_params). Returns the pooled (N, C) embedding."""
    N, _, H0, W0 = x_nchw.shape
    C = params[0]["w"].shape[0]

    cfgs, flat_w = [], []
    h, w = H0, W0
    for li, p in enumerate(params):
        if li == 0:
            kt, kf = p["w"].shape[2:]
            st, sf = p["stride"]
            pt, pf = p["pad"]
            s, b = _fold_bn(p["b"], p["g"], p["beta"], p["mean"], p["var"])
            flat_w += [_dw_weight(p["w"]), s[None, :], b[None, :]]
            has_pw, cin = False, 1
        else:
            kt, kf = p["dw_w"].shape[2:]
            st, sf = p["stride"]
            pt, pf = 1, 1
            s1, b1 = _fold_bn(p["dw_b"], p["g1"], p["beta1"], p["mean1"], p["var1"])
            s2, b2 = _fold_bn(p["pw_b"], p["g2"], p["beta2"], p["mean2"], p["var2"])
            pw = jnp.transpose(p["pw_w"][:, :, 0, 0], (1, 0))        # (C_in, C_out)
            flat_w += [_dw_weight(p["dw_w"]), s1[None, :], b1[None, :],
                       pw, s2[None, :], b2[None, :]]
            has_pw, cin = True, C
        ho = (h + 2 * pt - kt) // st + 1
        wo = (w + 2 * pf - kf) // sf + 1
        cfgs.append(dict(H=h, W=w, Cin=cin, kt=kt, kf=kf, st=st, sf=sf,
                         pt=pt, pf=pf, Ho=ho, Wo=wo, has_pw=has_pw))
        h, w = ho, wo

    x_nhwc = jnp.transpose(x_nchw, (0, 2, 3, 1))                     # (N, H, W, 1)

    kernel = _make_dscnn_kernel(tuple(cfgs), C)
    in_specs = [pl.BlockSpec((1, H0, W0, 1), lambda n: (n, 0, 0, 0))]
    in_specs += [_replicated_spec(a) for a in flat_w]
    scratch = [pltpu.VMEM((c["H"] + 2 * c["pt"], c["W"] + 2 * c["pf"], c["Cin"]),
                          jnp.float32) for c in cfgs]

    out = pl.pallas_call(
        kernel,
        grid=(N,),
        in_specs=in_specs,
        out_specs=pl.BlockSpec((1, 1, C), lambda n: (n, 0, 0)),
        out_shape=jax.ShapeDtypeStruct((N, 1, C), jnp.float32),
        scratch_shapes=scratch,
        compiler_params=pltpu.CompilerParams(dimension_semantics=("parallel",)),
    )(x_nhwc, *flat_w)
    return out[:, 0, :]                                              # (N, C)


# ----------------------------------------------------------------------------
# Pure-JAX reference (mirrors the PyTorch module, eval-mode BatchNorm)
# ----------------------------------------------------------------------------
def _conv_ref(x, w, b, stride, padding, groups=1):
    out = lax.conv_general_dilated(
        x, w, window_strides=stride,
        padding=[(padding[0], padding[0]), (padding[1], padding[1])],
        dimension_numbers=("NCHW", "OIHW", "NCHW"),
        feature_group_count=groups,
        precision=lax.Precision.HIGHEST)
    return out + b[None, :, None, None]


def _bn_ref(x, g, beta, mean, var):
    s = g / jnp.sqrt(var + EPS)
    return (x - mean[None, :, None, None]) * s[None, :, None, None] + beta[None, :, None, None]


def reference_forward(x_nchw, params):
    p0 = params[0]
    h = jax.nn.relu(_bn_ref(_conv_ref(x_nchw, p0["w"], p0["b"], p0["stride"], p0["pad"]),
                            p0["g"], p0["beta"], p0["mean"], p0["var"]))
    for p in params[1:]:
        C = h.shape[1]
        h = jax.nn.relu(_bn_ref(_conv_ref(h, p["dw_w"], p["dw_b"], p["stride"], (1, 1), groups=C),
                                p["g1"], p["beta1"], p["mean1"], p["var1"]))
        h = jax.nn.relu(_bn_ref(_conv_ref(h, p["pw_w"], p["pw_b"], (1, 1), (0, 0)),
                                p["g2"], p["beta2"], p["mean2"], p["var2"]))
    return jnp.mean(h, axis=(2, 3))        # AvgPool2d(full spatial) + Flatten


# ----------------------------------------------------------------------------
# Deterministic parameter init (torch layouts) and self-test
# ----------------------------------------------------------------------------
def init_params(key, C, num_layers, kt, kf, strides):
    def bn_init(k):
        k1, k2, k3, k4 = jax.random.split(k, 4)
        return (jax.random.uniform(k1, (C,), jnp.float32, 0.5, 1.5),
                0.1 * jax.random.normal(k2, (C,), jnp.float32),
                0.1 * jax.random.normal(k3, (C,), jnp.float32),
                jax.random.uniform(k4, (C,), jnp.float32, 0.5, 1.5))

    params = []
    keys = jax.random.split(key, num_layers)
    for li in range(num_layers):
        if li == 0:
            kw, kb, kn = jax.random.split(keys[li], 3)
            g, be, m, v = bn_init(kn)
            params.append(dict(
                w=0.3 * jax.random.normal(kw, (C, 1, kt, kf), jnp.float32),
                b=0.1 * jax.random.normal(kb, (C,), jnp.float32),
                g=g, beta=be, mean=m, var=v,
                stride=strides[li], pad=(1, 1)))
        else:
            kd, kdb, kn1, kp, kpb, kn2 = jax.random.split(keys[li], 6)
            g1, be1, m1, v1 = bn_init(kn1)
            g2, be2, m2, v2 = bn_init(kn2)
            params.append(dict(
                dw_w=0.3 * jax.random.normal(kd, (C, 1, kt, kf), jnp.float32),
                dw_b=0.1 * jax.random.normal(kdb, (C,), jnp.float32),
                g1=g1, beta1=be1, mean1=m1, var1=v1,
                pw_w=0.3 * jax.random.normal(kp, (C, C, 1, 1), jnp.float32),
                pw_b=0.1 * jax.random.normal(kpb, (C,), jnp.float32),
                g2=g2, beta2=be2, mean2=m2, var2=v2,
                stride=strides[li]))
    return params


if __name__ == "__main__":
    key = jax.random.PRNGKey(0)
    kx, kp = jax.random.split(key)

    # DSCNN config equivalent to:
    #   model_size_info = [3, 4,3,3,2,1, 4,3,3,1,1, 4,3,3,1,1]
    #   t_dim = f_dim = 16, padding_0 = (1, 1), last_norm=True,
    #   return_feat_maps=False  ->  3 layers, 4 filters, first conv stride (2,1)
    N, C, T, Freq = 2, 4, 16, 16
    num_layers = 3
    strides = [(2, 1), (1, 1), (1, 1)]

    x = jax.random.normal(kx, (N, 1, T, Freq), jnp.float32)
    params = init_params(kp, C, num_layers, 3, 3, strides)

    out = dscnn_forward(x, params)
    jax.block_until_ready(out)

    ref = reference_forward(x, params)
    assert out.shape == (N, C)
    assert jnp.allclose(out, ref, atol=1e-4, rtol=1e-3), (out, ref)
    print("KERNEL_OK")
</pallas_src>

<mosaic_0001>
module attributes {stable_mosaic.version = 11 : i64} {
  func.func @kernel(%arg0: i32, %arg1: memref<1x16x16x1xf32, #tpu.memory_space<vmem>>, %arg2: memref<9x4xf32, #tpu.memory_space<vmem>>, %arg3: memref<1x4xf32, #tpu.memory_space<vmem>>, %arg4: memref<1x4xf32, #tpu.memory_space<vmem>>, %arg5: memref<9x4xf32, #tpu.memory_space<vmem>>, %arg6: memref<1x4xf32, #tpu.memory_space<vmem>>, %arg7: memref<1x4xf32, #tpu.memory_space<vmem>>, %arg8: memref<4x4xf32, #tpu.memory_space<vmem>>, %arg9: memref<1x4xf32, #tpu.memory_space<vmem>>, %arg10: memref<1x4xf32, #tpu.memory_space<vmem>>, %arg11: memref<9x4xf32, #tpu.memory_space<vmem>>, %arg12: memref<1x4xf32, #tpu.memory_space<vmem>>, %arg13: memref<1x4xf32, #tpu.memory_space<vmem>>, %arg14: memref<4x4xf32, #tpu.memory_space<vmem>>, %arg15: memref<1x4xf32, #tpu.memory_space<vmem>>, %arg16: memref<1x4xf32, #tpu.memory_space<vmem>>, %arg17: memref<1x1x4xf32, #tpu.memory_space<vmem>>, %arg18: memref<18x18x1xf32, #tpu.memory_space<vmem>>, %arg19: memref<10x18x4xf32, #tpu.memory_space<vmem>>, %arg20: memref<10x18x4xf32, #tpu.memory_space<vmem>>) attributes {dimension_semantics = [#tpu.dimension_semantics<parallel>], iteration_bounds = array<i64: 2>, scalar_prefetch = 0 : i64, scratch_operands = 3 : i64, tpu.core_type = #tpu.core_type<tc>, window_params = [{transform_indices = @transform_0, window_bounds = array<i64: 1, 16, 16, 1>}, {pipeline_mode = #tpu.pipeline_mode<synchronous>, transform_indices = @transform_1, window_bounds = array<i64: 9, 4>}, {pipeline_mode = #tpu.pipeline_mode<synchronous>, transform_indices = @transform_2, window_bounds = array<i64: 1, 4>}, {pipeline_mode = #tpu.pipeline_mode<synchronous>, transform_indices = @transform_3, window_bounds = array<i64: 1, 4>}, {pipeline_mode = #tpu.pipeline_mode<synchronous>, transform_indices = @transform_4, window_bounds = array<i64: 9, 4>}, {pipeline_mode = #tpu.pipeline_mode<synchronous>, transform_indices = @transform_5, window_bounds = array<i64: 1, 4>}, {pipeline_mode = #tpu.pipeline_mode<synchronous>, transform_indices = @transform_6, window_bounds = array<i64: 1, 4>}, {pipeline_mode = #tpu.pipeline_mode<synchronous>, transform_indices = @transform_7, window_bounds = array<i64: 4, 4>}, {pipeline_mode = #tpu.pipeline_mode<synchronous>, transform_indices = @transform_8, window_bounds = array<i64: 1, 4>}, {pipeline_mode = #tpu.pipeline_mode<synchronous>, transform_indices = @transform_9, window_bounds = array<i64: 1, 4>}, {pipeline_mode = #tpu.pipeline_mode<synchronous>, transform_indices = @transform_10, window_bounds = array<i64: 9, 4>}, {pipeline_mode = #tpu.pipeline_mode<synchronous>, transform_indices = @transform_11, window_bounds = array<i64: 1, 4>}, {pipeline_mode = #tpu.pipeline_mode<synchronous>, transform_indices = @transform_12, window_bounds = array<i64: 1, 4>}, {pipeline_mode = #tpu.pipeline_mode<synchronous>, transform_indices = @transform_13, window_bounds = array<i64: 4, 4>}, {pipeline_mode = #tpu.pipeline_mode<synchronous>, transform_indices = @transform_14, window_bounds = array<i64: 1, 4>}, {pipeline_mode = #tpu.pipeline_mode<synchronous>, transform_indices = @transform_15, window_bounds = array<i64: 1, 4>}, {transform_indices = @transform_16, window_bounds = array<i64: 1, 1, 4>}]} {
    %c0 = arith.constant 0 : index
    %c0_0 = arith.constant 0 : index
    %c0_1 = arith.constant 0 : index
    %c0_2 = arith.constant 0 : index
    %0 = vector.load %arg1[%c0, %c0_0, %c0_1, %c0_2] : memref<1x16x16x1xf32, #tpu.memory_space<vmem>>, vector<1x16x16x1xf32>
    %1 = vector.shape_cast %0 : vector<1x16x16x1xf32> to vector<16x16x1xf32>
    %cst = arith.constant 0.000000e+00 : f32
    %2 = vector.broadcast %cst : f32 to vector<18x18x1xf32>
    %c0_3 = arith.constant 0 : index
    %c0_4 = arith.constant 0 : index
    %c0_5 = arith.constant 0 : index
    %3 = vector.load %arg18[%c0_3, %c0_4, %c0_5] : memref<18x18x1xf32, #tpu.memory_space<vmem>>, vector<18x18x1xf32>
    tpu.vector_store %arg18[%c0_3, %c0_4, %c0_5], %2 {strides = array<i32>} : memref<18x18x1xf32, #tpu.memory_space<vmem>>, vector<18x18x1xf32>,
    %c1 = arith.constant 1 : index
    %c1_6 = arith.constant 1 : index
    %c0_7 = arith.constant 0 : index
    %4 = vector.load %arg18[%c1, %c1_6, %c0_7] : memref<18x18x1xf32, #tpu.memory_space<vmem>>, vector<16x16x1xf32>
    tpu.vector_store %arg18[%c1, %c1_6, %c0_7], %1 {strides = array<i32>} : memref<18x18x1xf32, #tpu.memory_space<vmem>>, vector<16x16x1xf32>,
    %cst_8 = arith.constant 0.000000e+00 : f32
    %5 = vector.broadcast %cst_8 : f32 to vector<8x16x4xf32>
    %c0_9 = arith.constant 0 : index
    %c0_10 = arith.constant 0 : index
    %6 = vector.load %arg2[%c0_9, %c0_10] : memref<9x4xf32, #tpu.memory_space<vmem>>, vector<1x4xf32>
    %7 = vector.shape_cast %6 : vector<1x4xf32> to vector<4xf32>
    %c0_11 = arith.constant 0 : index
    %c0_12 = arith.constant 0 : index
    %c0_13 = arith.constant 0 : index
    %8 = tpu.strided_load %arg18[%c0_11, %c0_12, %c0_13] {strides = array<i32: 2, 1, 1>} : memref<18x18x1xf32, #tpu.memory_space<vmem>>, vector<8x16x1xf32>
    %9 = vector.shape_cast %7 : vector<4xf32> to vector<1x1x4xf32>
    %10 = vector.broadcast %8 : vector<8x16x1xf32> to vector<8x16x4xf32>
    %11 = vector.broadcast %9 : vector<1x1x4xf32> to vector<8x16x4xf32>
    %12 = arith.mulf %10, %11 : vector<8x16x4xf32>
    %13 = arith.addf %5, %12 : vector<8x16x4xf32>
    %c1_14 = arith.constant 1 : index
    %c0_15 = arith.constant 0 : index
    %14 = vector.load %arg2[%c1_14, %c0_15] : memref<9x4xf32, #tpu.memory_space<vmem>>, vector<1x4xf32>
    %15 = vector.shape_cast %14 : vector<1x4xf32> to vector<4xf32>
    %c0_16 = arith.constant 0 : index
    %c1_17 = arith.constant 1 : index
    %c0_18 = arith.constant 0 : index
    %16 = tpu.strided_load %arg18[%c0_16, %c1_17, %c0_18] {strides = array<i32: 2, 1, 1>} : memref<18x18x1xf32, #tpu.memory_space<vmem>>, vector<8x16x1xf32>
    %17 = vector.shape_cast %15 : vector<4xf32> to vector<1x1x4xf32>
    %18 = vector.broadcast %16 : vector<8x16x1xf32> to vector<8x16x4xf32>
    %19 = vector.broadcast %17 : vector<1x1x4xf32> to vector<8x16x4xf32>
    %20 = arith.mulf %18, %19 : vector<8x16x4xf32>
    %21 = arith.addf %13, %20 : vector<8x16x4xf32>
    %c2 = arith.constant 2 : index
    %c0_19 = arith.constant 0 : index
    %22 = vector.load %arg2[%c2, %c0_19] : memref<9x4xf32, #tpu.memory_space<vmem>>, vector<1x4xf32>
    %23 = vector.shape_cast %22 : vector<1x4xf32> to vector<4xf32>
    %c0_20 = arith.constant 0 : index
    %c2_21 = arith.constant 2 : index
    %c0_22 = arith.constant 0 : index
    %24 = tpu.strided_load %arg18[%c0_20, %c2_21, %c0_22] {strides = array<i32: 2, 1, 1>} : memref<18x18x1xf32, #tpu.memory_space<vmem>>, vector<8x16x1xf32>
    %25 = vector.shape_cast %23 : vector<4xf32> to vector<1x1x4xf32>
    %26 = vector.broadcast %24 : vector<8x16x1xf32> to vector<8x16x4xf32>
    %27 = vector.broadcast %25 : vector<1x1x4xf32> to vector<8x16x4xf32>
    %28 = arith.mulf %26, %27 : vector<8x16x4xf32>
    %29 = arith.addf %21, %28 : vector<8x16x4xf32>
    %c3 = arith.constant 3 : index
    %c0_23 = arith.constant 0 : index
    %30 = vector.load %arg2[%c3, %c0_23] : memref<9x4xf32, #tpu.memory_space<vmem>>, vector<1x4xf32>
    %31 = vector.shape_cast %30 : vector<1x4xf32> to vector<4xf32>
    %c1_24 = arith.constant 1 : index
    %c0_25 = arith.constant 0 : index
    %c0_26 = arith.constant 0 : index
    %32 = tpu.strided_load %arg18[%c1_24, %c0_25, %c0_26] {strides = array<i32: 2, 1, 1>} : memref<18x18x1xf32, #tpu.memory_space<vmem>>, vector<8x16x1xf32>
    %33 = vector.shape_cast %31 : vector<4xf32> to vector<1x1x4xf32>
    %34 = vector.broadcast %32 : vector<8x16x1xf32> to vector<8x16x4xf32>
    %35 = vector.broadcast %33 : vector<1x1x4xf32> to vector<8x16x4xf32>
    %36 = arith.mulf %34, %35 : vector<8x16x4xf32>
    %37 = arith.addf %29, %36 : vector<8x16x4xf32>
    %c4 = arith.constant 4 : index
    %c0_27 = arith.constant 0 : index
    %38 = vector.load %arg2[%c4, %c0_27] : memref<9x4xf32, #tpu.memory_space<vmem>>, vector<1x4xf32>
    %39 = vector.shape_cast %38 : vector<1x4xf32> to vector<4xf32>
    %c1_28 = arith.constant 1 : index
    %c1_29 = arith.constant 1 : index
    %c0_30 = arith.constant 0 : index
    %40 = tpu.strided_load %arg18[%c1_28, %c1_29, %c0_30] {strides = array<i32: 2, 1, 1>} : memref<18x18x1xf32, #tpu.memory_space<vmem>>, vector<8x16x1xf32>
    %41 = vector.shape_cast %39 : vector<4xf32> to vector<1x1x4xf32>
    %42 = vector.broadcast %40 : vector<8x16x1xf32> to vector<8x16x4xf32>
    %43 = vector.broadcast %41 : vector<1x1x4xf32> to vector<8x16x4xf32>
    %44 = arith.mulf %42, %43 : vector<8x16x4xf32>
    %45 = arith.addf %37, %44 : vector<8x16x4xf32>
    %c5 = arith.constant 5 : index
    %c0_31 = arith.constant 0 : index
    %46 = vector.load %arg2[%c5, %c0_31] : memref<9x4xf32, #tpu.memory_space<vmem>>, vector<1x4xf32>
    %47 = vector.shape_cast %46 : vector<1x4xf32> to vector<4xf32>
    %c1_32 = arith.constant 1 : index
    %c2_33 = arith.constant 2 : index
    %c0_34 = arith.constant 0 : index
    %48 = tpu.strided_load %arg18[%c1_32, %c2_33, %c0_34] {strides = array<i32: 2, 1, 1>} : memref<18x18x1xf32, #tpu.memory_space<vmem>>, vector<8x16x1xf32>
    %49 = vector.shape_cast %47 : vector<4xf32> to vector<1x1x4xf32>
    %50 = vector.broadcast %48 : vector<8x16x1xf32> to vector<8x16x4xf32>
    %51 = vector.broadcast %49 : vector<1x1x4xf32> to vector<8x16x4xf32>
    %52 = arith.mulf %50, %51 : vector<8x16x4xf32>
    %53 = arith.addf %45, %52 : vector<8x16x4xf32>
    %c6 = arith.constant 6 : index
    %c0_35 = arith.constant 0 : index
    %54 = vector.load %arg2[%c6, %c0_35] : memref<9x4xf32, #tpu.memory_space<vmem>>, vector<1x4xf32>
    %55 = vector.shape_cast %54 : vector<1x4xf32> to vector<4xf32>
    %c2_36 = arith.constant 2 : index
    %c0_37 = arith.constant 0 : index
    %c0_38 = arith.constant 0 : index
    %56 = tpu.strided_load %arg18[%c2_36, %c0_37, %c0_38] {strides = array<i32: 2, 1, 1>} : memref<18x18x1xf32, #tpu.memory_space<vmem>>, vector<8x16x1xf32>
    %57 = vector.shape_cast %55 : vector<4xf32> to vector<1x1x4xf32>
    %58 = vector.broadcast %56 : vector<8x16x1xf32> to vector<8x16x4xf32>
    %59 = vector.broadcast %57 : vector<1x1x4xf32> to vector<8x16x4xf32>
    %60 = arith.mulf %58, %59 : vector<8x16x4xf32>
    %61 = arith.addf %53, %60 : vector<8x16x4xf32>
    %c7 = arith.constant 7 : index
    %c0_39 = arith.constant 0 : index
    %62 = vector.load %arg2[%c7, %c0_39] : memref<9x4xf32, #tpu.memory_space<vmem>>, vector<1x4xf32>
    %63 = vector.shape_cast %62 : vector<1x4xf32> to vector<4xf32>
    %c2_40 = arith.constant 2 : index
    %c1_41 = arith.constant 1 : index
    %c0_42 = arith.constant 0 : index
    %64 = tpu.strided_load %arg18[%c2_40, %c1_41, %c0_42] {strides = array<i32: 2, 1, 1>} : memref<18x18x1xf32, #tpu.memory_space<vmem>>, vector<8x16x1xf32>
    %65 = vector.shape_cast %63 : vector<4xf32> to vector<1x1x4xf32>
    %66 = vector.broadcast %64 : vector<8x16x1xf32> to vector<8x16x4xf32>
    %67 = vector.broadcast %65 : vector<1x1x4xf32> to vector<8x16x4xf32>
    %68 = arith.mulf %66, %67 : vector<8x16x4xf32>
    %69 = arith.addf %61, %68 : vector<8x16x4xf32>
    %c8 = arith.constant 8 : index
    %c0_43 = arith.constant 0 : index
    %70 = vector.load %arg2[%c8, %c0_43] : memref<9x4xf32, #tpu.memory_space<vmem>>, vector<1x4xf32>
    %71 = vector.shape_cast %70 : vector<1x4xf32> to vector<4xf32>
    %c2_44 = arith.constant 2 : index
    %c2_45 = arith.constant 2 : index
    %c0_46 = arith.constant 0 : index
    %72 = tpu.strided_load %arg18[%c2_44, %c2_45, %c0_46] {strides = array<i32: 2, 1, 1>} : memref<18x18x1xf32, #tpu.memory_space<vmem>>, vector<8x16x1xf32>
    %73 = vector.shape_cast %71 : vector<4xf32> to vector<1x1x4xf32>
    %74 = vector.broadcast %72 : vector<8x16x1xf32> to vector<8x16x4xf32>
    %75 = vector.broadcast %73 : vector<1x1x4xf32> to vector<8x16x4xf32>
    %76 = arith.mulf %74, %75 : vector<8x16x4xf32>
    %77 = arith.addf %69, %76 : vector<8x16x4xf32>
    %c0_47 = arith.constant 0 : index
    %c0_48 = arith.constant 0 : index
    %78 = vector.load %arg3[%c0_47, %c0_48] : memref<1x4xf32, #tpu.memory_space<vmem>>, vector<1x4xf32>
    %79 = vector.shape_cast %78 : vector<1x4xf32> to vector<4xf32>
    %80 = vector.shape_cast %79 : vector<4xf32> to vector<1x1x4xf32>
    %81 = vector.broadcast %80 : vector<1x1x4xf32> to vector<8x16x4xf32>
    %82 = arith.mulf %77, %81 : vector<8x16x4xf32>
    %c0_49 = arith.constant 0 : index
    %c0_50 = arith.constant 0 : index
    %83 = vector.load %arg4[%c0_49, %c0_50] : memref<1x4xf32, #tpu.memory_space<vmem>>, vector<1x4xf32>
    %84 = vector.shape_cast %83 : vector<1x4xf32> to vector<4xf32>
    %85 = vector.shape_cast %84 : vector<4xf32> to vector<1x1x4xf32>
    %86 = vector.broadcast %85 : vector<1x1x4xf32> to vector<8x16x4xf32>
    %87 = arith.addf %82, %86 : vector<8x16x4xf32>
    %cst_51 = arith.constant 0.000000e+00 : f32
    %88 = vector.broadcast %cst_51 : f32 to vector<8x16x4xf32>
    %89 = arith.maximumf %87, %88 : vector<8x16x4xf32>
    %cst_52 = arith.constant 0.000000e+00 : f32
    %90 = vector.broadcast %cst_52 : f32 to vector<10x18x4xf32>
    %c0_53 = arith.constant 0 : index
    %c0_54 = arith.constant 0 : index
    %c0_55 = arith.constant 0 : index
    %91 = vector.load %arg19[%c0_53, %c0_54, %c0_55] : memref<10x18x4xf32, #tpu.memory_space<vmem>>, vector<10x18x4xf32>
    tpu.vector_store %arg19[%c0_53, %c0_54, %c0_55], %90 {strides = array<i32>} : memref<10x18x4xf32, #tpu.memory_space<vmem>>, vector<10x18x4xf32>,
    %c1_56 = arith.constant 1 : index
    %c1_57 = arith.constant 1 : index
    %c0_58 = arith.constant 0 : index
    %92 = vector.load %arg19[%c1_56, %c1_57, %c0_58] : memref<10x18x4xf32, #tpu.memory_space<vmem>>, vector<8x16x4xf32>
    tpu.vector_store %arg19[%c1_56, %c1_57, %c0_58], %89 {strides = array<i32>} : memref<10x18x4xf32, #tpu.memory_space<vmem>>, vector<8x16x4xf32>,
    %cst_59 = arith.constant 0.000000e+00 : f32
    %93 = vector.broadcast %cst_59 : f32 to vector<8x16x4xf32>
    %c0_60 = arith.constant 0 : index
    %c0_61 = arith.constant 0 : index
    %94 = vector.load %arg5[%c0_60, %c0_61] : memref<9x4xf32, #tpu.memory_space<vmem>>, vector<1x4xf32>
    %95 = vector.shape_cast %94 : vector<1x4xf32> to vector<4xf32>
    %c0_62 = arith.constant 0 : index
    %c0_63 = arith.constant 0 : index
    %c0_64 = arith.constant 0 : index
    %96 = vector.load %arg19[%c0_62, %c0_63, %c0_64] : memref<10x18x4xf32, #tpu.memory_space<vmem>>, vector<8x16x4xf32>
    %97 = vector.shape_cast %95 : vector<4xf32> to vector<1x1x4xf32>
    %98 = vector.broadcast %97 : vector<1x1x4xf32> to vector<8x16x4xf32>
    %99 = arith.mulf %96, %98 : vector<8x16x4xf32>
    %100 = arith.addf %93, %99 : vector<8x16x4xf32>
    %c1_65 = arith.constant 1 : index
    %c0_66 = arith.constant 0 : index
    %101 = vector.load %arg5[%c1_65, %c0_66] : memref<9x4xf32, #tpu.memory_space<vmem>>, vector<1x4xf32>
    %102 = vector.shape_cast %101 : vector<1x4xf32> to vector<4xf32>
    %c0_67 = arith.constant 0 : index
    %c1_68 = arith.constant 1 : index
    %c0_69 = arith.constant 0 : index
    %103 = vector.load %arg19[%c0_67, %c1_68, %c0_69] : memref<10x18x4xf32, #tpu.memory_space<vmem>>, vector<8x16x4xf32>
    %104 = vector.shape_cast %102 : vector<4xf32> to vector<1x1x4xf32>
    %105 = vector.broadcast %104 : vector<1x1x4xf32> to vector<8x16x4xf32>
    %106 = arith.mulf %103, %105 : vector<8x16x4xf32>
    %107 = arith.addf %100, %106 : vector<8x16x4xf32>
    %c2_70 = arith.constant 2 : index
    %c0_71 = arith.constant 0 : index
    %108 = vector.load %arg5[%c2_70, %c0_71] : memref<9x4xf32, #tpu.memory_space<vmem>>, vector<1x4xf32>
    %109 = vector.shape_cast %108 : vector<1x4xf32> to vector<4xf32>
    %c0_72 = arith.constant 0 : index
    %c2_73 = arith.constant 2 : index
    %c0_74 = arith.constant 0 : index
    %110 = vector.load %arg19[%c0_72, %c2_73, %c0_74] : memref<10x18x4xf32, #tpu.memory_space<vmem>>, vector<8x16x4xf32>
    %111 = vector.shape_cast %109 : vector<4xf32> to vector<1x1x4xf32>
    %112 = vector.broadcast %111 : vector<1x1x4xf32> to vector<8x16x4xf32>
    %113 = arith.mulf %110, %112 : vector<8x16x4xf32>
    %114 = arith.addf %107, %113 : vector<8x16x4xf32>
    %c3_75 = arith.constant 3 : index
    %c0_76 = arith.constant 0 : index
    %115 = vector.load %arg5[%c3_75, %c0_76] : memref<9x4xf32, #tpu.memory_space<vmem>>, vector<1x4xf32>
    %116 = vector.shape_cast %115 : vector<1x4xf32> to vector<4xf32>
    %c1_77 = arith.constant 1 : index
    %c0_78 = arith.constant 0 : index
    %c0_79 = arith.constant 0 : index
    %117 = vector.load %arg19[%c1_77, %c0_78, %c0_79] : memref<10x18x4xf32, #tpu.memory_space<vmem>>, vector<8x16x4xf32>
    %118 = vector.shape_cast %116 : vector<4xf32> to vector<1x1x4xf32>
    %119 = vector.broadcast %118 : vector<1x1x4xf32> to vector<8x16x4xf32>
    %120 = arith.mulf %117, %119 : vector<8x16x4xf32>
    %121 = arith.addf %114, %120 : vector<8x16x4xf32>
    %c4_80 = arith.constant 4 : index
    %c0_81 = arith.constant 0 : index
    %122 = vector.load %arg5[%c4_80, %c0_81] : memref<9x4xf32, #tpu.memory_space<vmem>>, vector<1x4xf32>
    %123 = vector.shape_cast %122 : vector<1x4xf32> to vector<4xf32>
    %c1_82 = arith.constant 1 : index
    %c1_83 = arith.constant 1 : index
    %c0_84 = arith.constant 0 : index
    %124 = vector.load %arg19[%c1_82, %c1_83, %c0_84] : memref<10x18x4xf32, #tpu.memory_space<vmem>>, vector<8x16x4xf32>
    %125 = vector.shape_cast %123 : vector<4xf32> to vector<1x1x4xf32>
    %126 = vector.broadcast %125 : vector<1x1x4xf32> to vector<8x16x4xf32>
    %127 = arith.mulf %124, %126 : vector<8x16x4xf32>
    %128 = arith.addf %121, %127 : vector<8x16x4xf32>
    %c5_85 = arith.constant 5 : index
    %c0_86 = arith.constant 0 : index
    %129 = vector.load %arg5[%c5_85, %c0_86] : memref<9x4xf32, #tpu.memory_space<vmem>>, vector<1x4xf32>
    %130 = vector.shape_cast %129 : vector<1x4xf32> to vector<4xf32>
    %c1_87 = arith.constant 1 : index
    %c2_88 = arith.constant 2 : index
    %c0_89 = arith.constant 0 : index
    %131 = vector.load %arg19[%c1_87, %c2_88, %c0_89] : memref<10x18x4xf32, #tpu.memory_space<vmem>>, vector<8x16x4xf32>
    %132 = vector.shape_cast %130 : vector<4xf32> to vector<1x1x4xf32>
    %133 = vector.broadcast %132 : vector<1x1x4xf32> to vector<8x16x4xf32>
    %134 = arith.mulf %131, %133 : vector<8x16x4xf32>
    %135 = arith.addf %128, %134 : vector<8x16x4xf32>
    %c6_90 = arith.constant 6 : index
    %c0_91 = arith.constant 0 : index
    %136 = vector.load %arg5[%c6_90, %c0_91] : memref<9x4xf32, #tpu.memory_space<vmem>>, vector<1x4xf32>
    %137 = vector.shape_cast %136 : vector<1x4xf32> to vector<4xf32>
    %c2_92 = arith.constant 2 : index
    %c0_93 = arith.constant 0 : index
    %c0_94 = arith.constant 0 : index
    %138 = vector.load %arg19[%c2_92, %c0_93, %c0_94] : memref<10x18x4xf32, #tpu.memory_space<vmem>>, vector<8x16x4xf32>
    %139 = vector.shape_cast %137 : vector<4xf32> to vector<1x1x4xf32>
    %140 = vector.broadcast %139 : vector<1x1x4xf32> to vector<8x16x4xf32>
    %141 = arith.mulf %138, %140 : vector<8x16x4xf32>
    %142 = arith.addf %135, %141 : vector<8x16x4xf32>
    %c7_95 = arith.constant 7 : index
    %c0_96 = arith.constant 0 : index
    %143 = vector.load %arg5[%c7_95, %c0_96] : memref<9x4xf32, #tpu.memory_space<vmem>>, vector<1x4xf32>
    %144 = vector.shape_cast %143 : vector<1x4xf32> to vector<4xf32>
    %c2_97 = arith.constant 2 : index
    %c1_98 = arith.constant 1 : index
    %c0_99 = arith.constant 0 : index
    %145 = vector.load %arg19[%c2_97, %c1_98, %c0_99] : memref<10x18x4xf32, #tpu.memory_space<vmem>>, vector<8x16x4xf32>
    %146 = vector.shape_cast %144 : vector<4xf32> to vector<1x1x4xf32>
    %147 = vector.broadcast %146 : vector<1x1x4xf32> to vector<8x16x4xf32>
    %148 = arith.mulf %145, %147 : vector<8x16x4xf32>
    %149 = arith.addf %142, %148 : vector<8x16x4xf32>
    %c8_100 = arith.constant 8 : index
    %c0_101 = arith.constant 0 : index
    %150 = vector.load %arg5[%c8_100, %c0_101] : memref<9x4xf32, #tpu.memory_space<vmem>>, vector<1x4xf32>
    %151 = vector.shape_cast %150 : vector<1x4xf32> to vector<4xf32>
    %c2_102 = arith.constant 2 : index
    %c2_103 = arith.constant 2 : index
    %c0_104 = arith.constant 0 : index
    %152 = vector.load %arg19[%c2_102, %c2_103, %c0_104] : memref<10x18x4xf32, #tpu.memory_space<vmem>>, vector<8x16x4xf32>
    %153 = vector.shape_cast %151 : vector<4xf32> to vector<1x1x4xf32>
    %154 = vector.broadcast %153 : vector<1x1x4xf32> to vector<8x16x4xf32>
    %155 = arith.mulf %152, %154 : vector<8x16x4xf32>
    %156 = arith.addf %149, %155 : vector<8x16x4xf32>
    %c0_105 = arith.constant 0 : index
    %c0_106 = arith.constant 0 : index
    %157 = vector.load %arg6[%c0_105, %c0_106] : memref<1x4xf32, #tpu.memory_space<vmem>>, vector<1x4xf32>
    %158 = vector.shape_cast %157 : vector<1x4xf32> to vector<4xf32>
    %159 = vector.shape_cast %158 : vector<4xf32> to vector<1x1x4xf32>
    %160 = vector.broadcast %159 : vector<1x1x4xf32> to vector<8x16x4xf32>
    %161 = arith.mulf %156, %160 : vector<8x16x4xf32>
    %c0_107 = arith.constant 0 : index
    %c0_108 = arith.constant 0 : index
    %162 = vector.load %arg7[%c0_107, %c0_108] : memref<1x4xf32, #tpu.memory_space<vmem>>, vector<1x4xf32>
    %163 = vector.shape_cast %162 : vector<1x4xf32> to vector<4xf32>
    %164 = vector.shape_cast %163 : vector<4xf32> to vector<1x1x4xf32>
    %165 = vector.broadcast %164 : vector<1x1x4xf32> to vector<8x16x4xf32>
    %166 = arith.addf %161, %165 : vector<8x16x4xf32>
    %cst_109 = arith.constant 0.000000e+00 : f32
    %167 = vector.broadcast %cst_109 : f32 to vector<8x16x4xf32>
    %168 = arith.maximumf %166, %167 : vector<8x16x4xf32>
    %169 = vector.shape_cast %168 : vector<8x16x4xf32> to vector<128x4xf32>
    %c0_110 = arith.constant 0 : index
    %c0_111 = arith.constant 0 : index
    %170 = vector.load %arg8[%c0_110, %c0_111] : memref<4x4xf32, #tpu.memory_space<vmem>>, vector<4x4xf32>
    %cst_112 = arith.constant dense<0.000000e+00> : vector<128x4xf32>
    %171 = tpu.matmul %169, %170, %cst_112 {dimension_numbers = #tpu.dot_dimension_numbers<[1], [0], [0], [1], [0, 0, 1, 1], [], []>} : vector<128x4xf32>, vector<4x4xf32>, vector<128x4xf32> -> vector<128x4xf32>
    %c0_113 = arith.constant 0 : index
    %c0_114 = arith.constant 0 : index
    %172 = vector.load %arg9[%c0_113, %c0_114] : memref<1x4xf32, #tpu.memory_space<vmem>>, vector<1x4xf32>
    %173 = vector.shape_cast %172 : vector<1x4xf32> to vector<4xf32>
    %174 = vector.shape_cast %173 : vector<4xf32> to vector<1x4xf32>
    %175 = vector.broadcast %174 : vector<1x4xf32> to vector<128x4xf32>
    %176 = arith.mulf %171, %175 : vector<128x4xf32>
    %c0_115 = arith.constant 0 : index
    %c0_116 = arith.constant 0 : index
    %177 = vector.load %arg10[%c0_115, %c0_116] : memref<1x4xf32, #tpu.memory_space<vmem>>, vector<1x4xf32>
    %178 = vector.shape_cast %177 : vector<1x4xf32> to vector<4xf32>
    %179 = vector.shape_cast %178 : vector<4xf32> to vector<1x4xf32>
    %180 = vector.broadcast %179 : vector<1x4xf32> to vector<128x4xf32>
    %181 = arith.addf %176, %180 : vector<128x4xf32>
    %cst_117 = arith.constant 0.000000e+00 : f32
    %182 = vector.broadcast %cst_117 : f32 to vector<128x4xf32>
    %183 = arith.maximumf %181, %182 : vector<128x4xf32>
    %184 = vector.shape_cast %183 : vector<128x4xf32> to vector<8x16x4xf32>
    %cst_118 = arith.constant 0.000000e+00 : f32
    %185 = vector.broadcast %cst_118 : f32 to vector<10x18x4xf32>
    %c0_119 = arith.constant 0 : index
    %c0_120 = arith.constant 0 : index
    %c0_121 = arith.constant 0 : index
    %186 = vector.load %arg20[%c0_119, %c0_120, %c0_121] : memref<10x18x4xf32, #tpu.memory_space<vmem>>, vector<10x18x4xf32>
    tpu.vector_store %arg20[%c0_119, %c0_120, %c0_121], %185 {strides = array<i32>} : memref<10x18x4xf32, #tpu.memory_space<vmem>>, vector<10x18x4xf32>,
    %c1_122 = arith.constant 1 : index
    %c1_123 = arith.constant 1 : index
    %c0_124 = arith.constant 0 : index
    %187 = vector.load %arg20[%c1_122, %c1_123, %c0_124] : memref<10x18x4xf32, #tpu.memory_space<vmem>>, vector<8x16x4xf32>
    tpu.vector_store %arg20[%c1_122, %c1_123, %c0_124], %184 {strides = array<i32>} : memref<10x18x4xf32, #tpu.memory_space<vmem>>, vector<8x16x4xf32>,
    %cst_125 = arith.constant 0.000000e+00 : f32
    %188 = vector.broadcast %cst_125 : f32 to vector<8x16x4xf32>
    %c0_126 = arith.constant 0 : index
    %c0_127 = arith.constant 0 : index
    %189 = vector.load %arg11[%c0_126, %c0_127] : memref<9x4xf32, #tpu.memory_space<vmem>>, vector<1x4xf32>
    %190 = vector.shape_cast %189 : vector<1x4xf32> to vector<4xf32>
    %c0_128 = arith.constant 0 : index
    %c0_129 = arith.constant 0 : index
    %c0_130 = arith.constant 0 : index
    %191 = vector.load %arg20[%c0_128, %c0_129, %c0_130] : memref<10x18x4xf32, #tpu.memory_space<vmem>>, vector<8x16x4xf32>
    %192 = vector.shape_cast %190 : vector<4xf32> to vector<1x1x4xf32>
    %193 = vector.broadcast %192 : vector<1x1x4xf32> to vector<8x16x4xf32>
    %194 = arith.mulf %191, %193 : vector<8x16x4xf32>
    %195 = arith.addf %188, %194 : vector<8x16x4xf32>
    %c1_131 = arith.constant 1 : index
    %c0_132 = arith.constant 0 : index
    %196 = vector.load %arg11[%c1_131, %c0_132] : memref<9x4xf32, #tpu.memory_space<vmem>>, vector<1x4xf32>
    %197 = vector.shape_cast %196 : vector<1x4xf32> to vector<4xf32>
    %c0_133 = arith.constant 0 : index
    %c1_134 = arith.constant 1 : index
    %c0_135 = arith.constant 0 : index
    %198 = vector.load %arg20[%c0_133, %c1_134, %c0_135] : memref<10x18x4xf32, #tpu.memory_space<vmem>>, vector<8x16x4xf32>
    %199 = vector.shape_cast %197 : vector<4xf32> to vector<1x1x4xf32>
    %200 = vector.broadcast %199 : vector<1x1x4xf32> to vector<8x16x4xf32>
    %201 = arith.mulf %198, %200 : vector<8x16x4xf32>
    %202 = arith.addf %195, %201 : vector<8x16x4xf32>
    %c2_136 = arith.constant 2 : index
    %c0_137 = arith.constant 0 : index
    %203 = vector.load %arg11[%c2_136, %c0_137] : memref<9x4xf32, #tpu.memory_space<vmem>>, vector<1x4xf32>
    %204 = vector.shape_cast %203 : vector<1x4xf32> to vector<4xf32>
    %c0_138 = arith.constant 0 : index
    %c2_139 = arith.constant 2 : index
    %c0_140 = arith.constant 0 : index
    %205 = vector.load %arg20[%c0_138, %c2_139, %c0_140] : memref<10x18x4xf32, #tpu.memory_space<vmem>>, vector<8x16x4xf32>
    %206 = vector.shape_cast %204 : vector<4xf32> to vector<1x1x4xf32>
    %207 = vector.broadcast %206 : vector<1x1x4xf32> to vector<8x16x4xf32>
    %208 = arith.mulf %205, %207 : vector<8x16x4xf32>
    %209 = arith.addf %202, %208 : vector<8x16x4xf32>
    %c3_141 = arith.constant 3 : index
    %c0_142 = arith.constant 0 : index
    %210 = vector.load %arg11[%c3_141, %c0_142] : memref<9x4xf32, #tpu.memory_space<vmem>>, vector<1x4xf32>
    %211 = vector.shape_cast %210 : vector<1x4xf32> to vector<4xf32>
    %c1_143 = arith.constant 1 : index
    %c0_144 = arith.constant 0 : index
    %c0_145 = arith.constant 0 : index
    %212 = vector.load %arg20[%c1_143, %c0_144, %c0_145] : memref<10x18x4xf32, #tpu.memory_space<vmem>>, vector<8x16x4xf32>
    %213 = vector.shape_cast %211 : vector<4xf32> to vector<1x1x4xf32>
    %214 = vector.broadcast %213 : vector<1x1x4xf32> to vector<8x16x4xf32>
    %215 = arith.mulf %212, %214 : vector<8x16x4xf32>
    %216 = arith.addf %209, %215 : vector<8x16x4xf32>
    %c4_146 = arith.constant 4 : index
    %c0_147 = arith.constant 0 : index
    %217 = vector.load %arg11[%c4_146, %c0_147] : memref<9x4xf32, #tpu.memory_space<vmem>>, vector<1x4xf32>
    %218 = vector.shape_cast %217 : vector<1x4xf32> to vector<4xf32>
    %c1_148 = arith.constant 1 : index
    %c1_149 = arith.constant 1 : index
    %c0_150 = arith.constant 0 : index
    %219 = vector.load %arg20[%c1_148, %c1_149, %c0_150] : memref<10x18x4xf32, #tpu.memory_space<vmem>>, vector<8x16x4xf32>
    %220 = vector.shape_cast %218 : vector<4xf32> to vector<1x1x4xf32>
    %221 = vector.broadcast %220 : vector<1x1x4xf32> to vector<8x16x4xf32>
    %222 = arith.mulf %219, %221 : vector<8x16x4xf32>
    %223 = arith.addf %216, %222 : vector<8x16x4xf32>
    %c5_151 = arith.constant 5 : index
    %c0_152 = arith.constant 0 : index
    %224 = vector.load %arg11[%c5_151, %c0_152] : memref<9x4xf32, #tpu.memory_space<vmem>>, vector<1x4xf32>
    %225 = vector.shape_cast %224 : vector<1x4xf32> to vector<4xf32>
    %c1_153 = arith.constant 1 : index
    %c2_154 = arith.constant 2 : index
    %c0_155 = arith.constant 0 : index
    %226 = vector.load %arg20[%c1_153, %c2_154, %c0_155] : memref<10x18x4xf32, #tpu.memory_space<vmem>>, vector<8x16x4xf32>
    %227 = vector.shape_cast %225 : vector<4xf32> to vector<1x1x4xf32>
    %228 = vector.broadcast %227 : vector<1x1x4xf32> to vector<8x16x4xf32>
    %229 = arith.mulf %226, %228 : vector<8x16x4xf32>
    %230 = arith.addf %223, %229 : vector<8x16x4xf32>
    %c6_156 = arith.constant 6 : index
    %c0_157 = arith.constant 0 : index
    %231 = vector.load %arg11[%c6_156, %c0_157] : memref<9x4xf32, #tpu.memory_space<vmem>>, vector<1x4xf32>
    %232 = vector.shape_cast %231 : vector<1x4xf32> to vector<4xf32>
    %c2_158 = arith.constant 2 : index
    %c0_159 = arith.constant 0 : index
    %c0_160 = arith.constant 0 : index
    %233 = vector.load %arg20[%c2_158, %c0_159, %c0_160] : memref<10x18x4xf32, #tpu.memory_space<vmem>>, vector<8x16x4xf32>
    %234 = vector.shape_cast %232 : vector<4xf32> to vector<1x1x4xf32>
    %235 = vector.broadcast %234 : vector<1x1x4xf32> to vector<8x16x4xf32>
    %236 = arith.mulf %233, %235 : vector<8x16x4xf32>
    %237 = arith.addf %230, %236 : vector<8x16x4xf32>
    %c7_161 = arith.constant 7 : index
    %c0_162 = arith.constant 0 : index
    %238 = vector.load %arg11[%c7_161, %c0_162] : memref<9x4xf32, #tpu.memory_space<vmem>>, vector<1x4xf32>
    %239 = vector.shape_cast %238 : vector<1x4xf32> to vector<4xf32>
    %c2_163 = arith.constant 2 : index
    %c1_164 = arith.constant 1 : index
    %c0_165 = arith.constant 0 : index
    %240 = vector.load %arg20[%c2_163, %c1_164, %c0_165] : memref<10x18x4xf32, #tpu.memory_space<vmem>>, vector<8x16x4xf32>
    %241 = vector.shape_cast %239 : vector<4xf32> to vector<1x1x4xf32>
    %242 = vector.broadcast %241 : vector<1x1x4xf32> to vector<8x16x4xf32>
    %243 = arith.mulf %240, %242 : vector<8x16x4xf32>
    %244 = arith.addf %237, %243 : vector<8x16x4xf32>
    %c8_166 = arith.constant 8 : index
    %c0_167 = arith.constant 0 : index
    %245 = vector.load %arg11[%c8_166, %c0_167] : memref<9x4xf32, #tpu.memory_space<vmem>>, vector<1x4xf32>
    %246 = vector.shape_cast %245 : vector<1x4xf32> to vector<4xf32>
    %c2_168 = arith.constant 2 : index
    %c2_169 = arith.constant 2 : index
    %c0_170 = arith.constant 0 : index
    %247 = vector.load %arg20[%c2_168, %c2_169, %c0_170] : memref<10x18x4xf32, #tpu.memory_space<vmem>>, vector<8x16x4xf32>
    %248 = vector.shape_cast %246 : vector<4xf32> to vector<1x1x4xf32>
    %249 = vector.broadcast %248 : vector<1x1x4xf32> to vector<8x16x4xf32>
    %250 = arith.mulf %247, %249 : vector<8x16x4xf32>
    %251 = arith.addf %244, %250 : vector<8x16x4xf32>
    %c0_171 = arith.constant 0 : index
    %c0_172 = arith.constant 0 : index
    %252 = vector.load %arg12[%c0_171, %c0_172] : memref<1x4xf32, #tpu.memory_space<vmem>>, vector<1x4xf32>
    %253 = vector.shape_cast %252 : vector<1x4xf32> to vector<4xf32>
    %254 = vector.shape_cast %253 : vector<4xf32> to vector<1x1x4xf32>
    %255 = vector.broadcast %254 : vector<1x1x4xf32> to vector<8x16x4xf32>
    %256 = arith.mulf %251, %255 : vector<8x16x4xf32>
    %c0_173 = arith.constant 0 : index
    %c0_174 = arith.constant 0 : index
    %257 = vector.load %arg13[%c0_173, %c0_174] : memref<1x4xf32, #tpu.memory_space<vmem>>, vector<1x4xf32>
    %258 = vector.shape_cast %257 : vector<1x4xf32> to vector<4xf32>
    %259 = vector.shape_cast %258 : vector<4xf32> to vector<1x1x4xf32>
    %260 = vector.broadcast %259 : vector<1x1x4xf32> to vector<8x16x4xf32>
    %261 = arith.addf %256, %260 : vector<8x16x4xf32>
    %cst_175 = arith.constant 0.000000e+00 : f32
    %262 = vector.broadcast %cst_175 : f32 to vector<8x16x4xf32>
    %263 = arith.maximumf %261, %262 : vector<8x16x4xf32>
    %264 = vector.shape_cast %263 : vector<8x16x4xf32> to vector<128x4xf32>
    %c0_176 = arith.constant 0 : index
    %c0_177 = arith.constant 0 : index
    %265 = vector.load %arg14[%c0_176, %c0_177] : memref<4x4xf32, #tpu.memory_space<vmem>>, vector<4x4xf32>
    %cst_178 = arith.constant dense<0.000000e+00> : vector<128x4xf32>
    %266 = tpu.matmul %264, %265, %cst_178 {dimension_numbers = #tpu.dot_dimension_numbers<[1], [0], [0], [1], [0, 0, 1, 1], [], []>} : vector<128x4xf32>, vector<4x4xf32>, vector<128x4xf32> -> vector<128x4xf32>
    %c0_179 = arith.constant 0 : index
    %c0_180 = arith.constant 0 : index
    %267 = vector.load %arg15[%c0_179, %c0_180] : memref<1x4xf32, #tpu.memory_space<vmem>>, vector<1x4xf32>
    %268 = vector.shape_cast %267 : vector<1x4xf32> to vector<4xf32>
    %269 = vector.shape_cast %268 : vector<4xf32> to vector<1x4xf32>
    %270 = vector.broadcast %269 : vector<1x4xf32> to vector<128x4xf32>
    %271 = arith.mulf %266, %270 : vector<128x4xf32>
    %c0_181 = arith.constant 0 : index
    %c0_182 = arith.constant 0 : index
    %272 = vector.load %arg16[%c0_181, %c0_182] : memref<1x4xf32, #tpu.memory_space<vmem>>, vector<1x4xf32>
    %273 = vector.shape_cast %272 : vector<1x4xf32> to vector<4xf32>
    %274 = vector.shape_cast %273 : vector<4xf32> to vector<1x4xf32>
    %275 = vector.broadcast %274 : vector<1x4xf32> to vector<128x4xf32>
    %276 = arith.addf %271, %275 : vector<128x4xf32>
    %cst_183 = arith.constant 0.000000e+00 : f32
    %277 = vector.broadcast %cst_183 : f32 to vector<128x4xf32>
    %278 = arith.maximumf %276, %277 : vector<128x4xf32>
    %279 = vector.shape_cast %278 : vector<128x4xf32> to vector<8x16x4xf32>
    %cst_184 = arith.constant dense<0.000000e+00> : vector<4xf32>
    %280 = vector.multi_reduction <add>, %279, %cst_184 [0, 1] : vector<8x16x4xf32> to vector<4xf32>
    %cst_185 = arith.constant 1.280000e+02 : f32
    %281 = vector.broadcast %cst_185 : f32 to vector<4xf32>
    %282 = arith.divf %280, %281 : vector<4xf32>
    %283 = vector.shape_cast %282 : vector<4xf32> to vector<1x1x4xf32>
    %c0_186 = arith.constant 0 : index
    %c0_187 = arith.constant 0 : index
    %c0_188 = arith.constant 0 : index
    %284 = vector.load %arg17[%c0_186, %c0_187, %c0_188] : memref<1x1x4xf32, #tpu.memory_space<vmem>>, vector<1x1x4xf32>
    tpu.vector_store %arg17[%c0_186, %c0_187, %c0_188], %283 {strides = array<i32>} : memref<1x1x4xf32, #tpu.memory_space<vmem>>, vector<1x1x4xf32>,
    return
  }
  func.func @transform_0(%arg0: i32) -> (i32, i32, i32, i32) {
    %c0_i32 = arith.constant 0 : i32
    %c0_i32_0 = arith.constant 0 : i32
    %c0_i32_1 = arith.constant 0 : i32
    %c0_i32_2 = arith.constant 0 : i32
    return %arg0, %c0_i32, %c0_i32_0, %c0_i32_1 : i32, i32, i32, i32
  }
  func.func @transform_1(%arg0: i32) -> (i32, i32) {
    %c0_i32 = arith.constant 0 : i32
    %c0_i32_0 = arith.constant 0 : i32
    %c0_i32_1 = arith.constant 0 : i32
    return %c0_i32, %c0_i32_0 : i32, i32
  }
  func.func @transform_2(%arg0: i32) -> (i32, i32) {
    %c0_i32 = arith.constant 0 : i32
    %c0_i32_0 = arith.constant 0 : i32
    %c0_i32_1 = arith.constant 0 : i32
    return %c0_i32, %c0_i32_0 : i32, i32
  }
  func.func @transform_3(%arg0: i32) -> (i32, i32) {
    %c0_i32 = arith.constant 0 : i32
    %c0_i32_0 = arith.constant 0 : i32
    %c0_i32_1 = arith.constant 0 : i32
    return %c0_i32, %c0_i32_0 : i32, i32
  }
  func.func @transform_4(%arg0: i32) -> (i32, i32) {
    %c0_i32 = arith.constant 0 : i32
    %c0_i32_0 = arith.constant 0 : i32
    %c0_i32_1 = arith.constant 0 : i32
    return %c0_i32, %c0_i32_0 : i32, i32
  }
  func.func @transform_5(%arg0: i32) -> (i32, i32) {
    %c0_i32 = arith.constant 0 : i32
    %c0_i32_0 = arith.constant 0 : i32
    %c0_i32_1 = arith.constant 0 : i32
    return %c0_i32, %c0_i32_0 : i32, i32
  }
  func.func @transform_6(%arg0: i32) -> (i32, i32) {
    %c0_i32 = arith.constant 0 : i32
    %c0_i32_0 = arith.constant 0 : i32
    %c0_i32_1 = arith.constant 0 : i32
    return %c0_i32, %c0_i32_0 : i32, i32
  }
  func.func @transform_7(%arg0: i32) -> (i32, i32) {
    %c0_i32 = arith.constant 0 : i32
    %c0_i32_0 = arith.constant 0 : i32
    %c0_i32_1 = arith.constant 0 : i32
    return %c0_i32, %c0_i32_0 : i32, i32
  }
  func.func @transform_8(%arg0: i32) -> (i32, i32) {
    %c0_i32 = arith.constant 0 : i32
    %c0_i32_0 = arith.constant 0 : i32
    %c0_i32_1 = arith.constant 0 : i32
    return %c0_i32, %c0_i32_0 : i32, i32
  }
  func.func @transform_9(%arg0: i32) -> (i32, i32) {
    %c0_i32 = arith.constant 0 : i32
    %c0_i32_0 = arith.constant 0 : i32
    %c0_i32_1 = arith.constant 0 : i32
    return %c0_i32, %c0_i32_0 : i32, i32
  }
  func.func @transform_10(%arg0: i32) -> (i32, i32) {
    %c0_i32 = arith.constant 0 : i32
    %c0_i32_0 = arith.constant 0 : i32
    %c0_i32_1 = arith.constant 0 : i32
    return %c0_i32, %c0_i32_0 : i32, i32
  }
  func.func @transform_11(%arg0: i32) -> (i32, i32) {
    %c0_i32 = arith.constant 0 : i32
    %c0_i32_0 = arith.constant 0 : i32
    %c0_i32_1 = arith.constant 0 : i32
    return %c0_i32, %c0_i32_0 : i32, i32
  }
  func.func @transform_12(%arg0: i32) -> (i32, i32) {
    %c0_i32 = arith.constant 0 : i32
    %c0_i32_0 = arith.constant 0 : i32
    %c0_i32_1 = arith.constant 0 : i32
    return %c0_i32, %c0_i32_0 : i32, i32
  }
  func.func @transform_13(%arg0: i32) -> (i32, i32) {
    %c0_i32 = arith.constant 0 : i32
    %c0_i32_0 = arith.constant 0 : i32
    %c0_i32_1 = arith.constant 0 : i32
    return %c0_i32, %c0_i32_0 : i32, i32
  }
  func.func @transform_14(%arg0: i32) -> (i32, i32) {
    %c0_i32 = arith.constant 0 : i32
    %c0_i32_0 = arith.constant 0 : i32
    %c0_i32_1 = arith.constant 0 : i32
    return %c0_i32, %c0_i32_0 : i32, i32
  }
  func.func @transform_15(%arg0: i32) -> (i32, i32) {
    %c0_i32 = arith.constant 0 : i32
    %c0_i32_0 = arith.constant 0 : i32
    %c0_i32_1 = arith.constant 0 : i32
    return %c0_i32, %c0_i32_0 : i32, i32
  }
  func.func @transform_16(%arg0: i32) -> (i32, i32, i32) {
    %c0_i32 = arith.constant 0 : i32
    %c0_i32_0 = arith.constant 0 : i32
    %c0_i32_1 = arith.constant 0 : i32
    return %arg0, %c0_i32, %c0_i32_0 : i32, i32, i32
  }
}

</mosaic_0001>

<bundles_post_ra>
// kernel: tpu_custom_call.1
= control target key start
LH: loop header
LB: loop body
LE: loop exit
PB: predicated region body
PF: predicated region fallthrough
CT: control target
= control target key end

     0   :  { %s5788_s0 = inlined_call_operand.vmem [shape: f32[2,16,16,1], index: 0, kind: input, shape index: {}]   ;;  %s5789_s1 = inlined_call_operand.vmem [shape: f32[9,4], index: 1, kind: input, shape index: {}]   ;;  %s5790_s2 = inlined_call_operand.vmem [shape: f32[1,4], index: 2, kind: input, shape index: {}]   ;;  %s5791_s3 = inlined_call_operand.vmem [shape: f32[1,4], index: 3, kind: input, shape index: {}]   ;;  %s5792_s4 = inlined_call_operand.vmem [shape: f32[9,4], index: 4, kind: input, shape index: {}]   ;;  %s5793_s5 = inlined_call_operand.vmem [shape: f32[1,4], index: 5, kind: input, shape index: {}]   ;;  %s5794_s6 = inlined_call_operand.vmem [shape: f32[1,4], index: 6, kind: input, shape index: {}]   ;;  %s5795_s7 = inlined_call_operand.vmem [shape: f32[4,4], index: 7, kind: input, shape index: {}]   ;;  %s5796_s8 = inlined_call_operand.vmem [shape: f32[1,4], index: 8, kind: input, shape index: {}]   ;;  %s5797_s9 = inlined_call_operand.vmem [shape: f32[1,4], index: 9, kind: input, shape index: {}]   ;;  %s5798_s10 = inlined_call_operand.vmem [shape: f32[9,4], index: 10, kind: input, shape index: {}]   ;;  %s5799_s11 = inlined_call_operand.vmem [shape: f32[1,4], index: 11, kind: input, shape index: {}]   ;;  %s5800_s12 = inlined_call_operand.vmem [shape: f32[1,4], index: 12, kind: input, shape index: {}]   ;;  %s5801_s13 = inlined_call_operand.vmem [shape: f32[4,4], index: 13, kind: input, shape index: {}]   ;;  %s5802_s14 = inlined_call_operand.vmem [shape: f32[1,4], index: 14, kind: input, shape index: {}]   ;;  %s5803_s15 = inlined_call_operand.vmem [shape: f32[1,4], index: 15, kind: input, shape index: {}]   ;;  %s5804_s16 = inlined_call_operand.hbm [shape: f32[2,1,4], index: 16, kind: output, shape index: {}]  }
   0x1   :  { %5807 = sst [smem:[#allocation15_spill]] %s5788_s0 }
   0x2   :  { %5808 = sst [smem:[#allocation16_spill]] %s5789_s1 }
   0x3   :  { %5809 = sst [smem:[#allocation17_spill]] %s5790_s2 }
   0x4   :  { %5810 = sst [smem:[#allocation18_spill]] %s5791_s3 }
   0x5   :  { %5811 = sst [smem:[#allocation19_spill]] %s5792_s4 }
   0x6   :  { %5812 = sst [smem:[#allocation20_spill]] %s5793_s5 }
   0x7   :  { %21 = vsyncpa [#allocation6], 0 }
   0x8   :  { %23 = vsyncpa [#allocation6 + $0x1], 0  ;;  %s3745_s21 = smov 0   ;;  %s3747_s22 = smov 0  }
   0x9   :  { %s3749_s23 = smov 0   ;;  %s3751_s24 = smov 0  }
   0xa LB: > { %s3766_s25 = sadd.s32 4294967295, %s3655_s24   ;;  %s3439_s26 = sadd.s32 4294967294, %s3655_s24   ;;  %s3655_s24 = sphi %s3751_s24, %s5839_s24   ;;  %s3651_s23 = sphi %s3749_s23, %s5838_s23   ;;  %s3647_s22 = sphi %s3747_s22, %s5837_s22   ;;  %s3643_s21 = sphi %s3745_s21, %s5836_s21  }
   0xb   : > { %s3770_s27 = sadd.s32 1, %s3655_s24   ;;  %s377_s28 = sadd.s32 1, %s3651_s23 }
   0xc   : > { %s374_s29 = ssub.s32 %s3655_s24, %s3770_s27  ;;  %p387_p0 = scmp.ne.s32.totalorder %s3651_s23, %s3647_s22 }
   0xd   : > { %p375_p1 = scmp.eq.s32.totalorder %s374_s29, 0  ;;  %p388_p2 = scmp.eq.s32.totalorder %s3766_s25, 1 }
   0xe   : > { %p393_p3 = scmp.ne.s32.totalorder %s3647_s22, %s3643_s21  ;;  %p394_p4 = scmp.eq.s32.totalorder %s3439_s26, 1 }
   0xf   : > { %s3781_s30 = scalar_select %p375_p1, %s3651_s23, %s377_s28  }
  0x10   : > { %p3783_p5 = por %p388_p2, %p387_p0  ;;  %p3787_p6 = por %p394_p4, %p393_p3 }
  0x11   : > { %p3442_p7 = scmp.ge.s32.totalorder %s3655_s24, 1  ;;  %p465_p8 = scmp.lt.s32.totalorder %s3655_s24, 3 }
  0x13   : > { %p466_p9 = pnand %p3442_p7, %p465_p8 }
  0x15   : > { %469 = sbr.rel (%p466_p9) target bundleno = 968 (0x3c8), region = 84 }
  0x1a   : > { %vm551_vm0 = vcmask 7168   ;;  %v3657_v0 = vmov 0   ;;  %v5805_v1 = vmov 0.0   ;;  %p514_p10 = scmp.lt.s32.totalorder %s3766_s25, 1  ;;  %s5815_s28 = sld [smem:[#allocation15_spill]]  ;;  %vm554_vm1 = vcmask 1024  }
  0x1b   : > { %3526 = vset.pattern.permute.xlu0 %v3657_v0  ;;  %552 = vst.msk [vmem:[#allocation2] sm:$0xff] %vm551_vm0, %v5805_v1  ;;  %3528 = vset.pattern.permute.xlu2 %v3657_v0  ;;  %s5816_s1 = sld [smem:[#allocation16_spill]]  ;;  %vm1867_vm2 = vcmask 31744   ;;  %vm1870_vm3 = vcmask 25600   ;;  %vm2472_vm4 = vcmask 1043456   ;;  %s512_s26 = sand.u32 1, %s3647_s22  }
  0x1c   : > { %553 = vst.msk [vmem:[#allocation2 + $0x8] sm:$0xff] %vm551_vm0, %v5805_v1  ;;  %3527 = vset.pattern.permute.xlu1 %v3657_v0  ;;  %s515_s18 = scalar_select %p514_p10, %s3766_s25, 1  ;;  %vm3369_vm6 = vcmask 24576  }
  0x1d   : > { %556 = vst.msk [vmem:[#allocation2 + $0x18] sm:$0xff] %vm551_vm0, %v5805_v1  ;;  %s5824_s2 = sld [smem:[#allocation17_spill]] }
  0x1e   : > { %557 = vst.msk [vmem:[#allocation2 + $0x20] sm:$0xff] %vm551_vm0, %v5805_v1  ;;  %s3481_s19 = sshll.u32 %s515_s18, 8  ;;  %s5825_s3 = sld [smem:[#allocation18_spill]] }
  0x1f   : > { %559 = vst.msk [vmem:[#allocation2 + $0x30] sm:$0xff] %vm551_vm0, %v5805_v1  ;;  %s5826_s4 = sld [smem:[#allocation19_spill]]  ;;  %s3613_s18 = scalar_lea.hbm %s5804_s16, 2 }
  0x20   : > { %560 = vst.msk [vmem:[#allocation2 + $0x38] sm:$0xff] %vm551_vm0, %v5805_v1  ;;  %s3860_s29 = scalar_lea.vmem %s5815_s28, %s3481_s19  ;;  %s5827_s5 = sld [smem:[#allocation20_spill]] }
  0x21   : > { %562 = vst.msk [vmem:[#allocation2 + $0x48] sm:$0xff] %vm551_vm0, %v5805_v1  ;;  %v525_v4 = vld [vmem:[%s3860_s29 + $0x30] sm:$0xff]  ;;  %v526_v6 = vld [vmem:[%s3860_s29 + $0x38] sm:$0xff]  ;;  %v519_v52 = vld [vmem:[%s3860_s29] sm:$0xff]  ;;  %s3380_s19 = scalar_lea.hbm %s5804_s16, %s3766_s25 }
  0x22   : > { %v641_v2 = vld [vmem:[#allocation2] sm:$0xff]  ;;  %563 = vst.msk [vmem:[#allocation2 + $0x50] sm:$0xff] %vm551_vm0, %v5805_v1  ;;  %v521_v5 = vld [vmem:[%s3860_s29 + $0x10] sm:$0xff]  ;;  %v522_v10 = vld [vmem:[%s3860_s29 + $0x18] sm:$0xff] }
  0x23   : > { %659 = vperm.xlu0 %3526, %v641_v2   ;;  %565 = vst.msk [vmem:[#allocation2 + $0x60] sm:$0xff] %vm551_vm0, %v5805_v1  ;;  %v642_v3 = vld [vmem:[#allocation2 + $0x8] sm:$0xff]  ;;  %v529_v11 = vld [vmem:[%s3860_s29 + $0x50] sm:$0xff]  ;;  %v530_v13 = vld [vmem:[%s3860_s29 + $0x58] sm:$0xff] }
  0x24   : > { %566 = vst.msk [vmem:[#allocation2 + $0x68] sm:$0xff] %vm551_vm0, %v5805_v1  ;;  %v533_v12 = vld [vmem:[%s3860_s29 + $0x70] sm:$0xff]  ;;  %v534_v14 = vld [vmem:[%s3860_s29 + $0x78] sm:$0xff]  ;;  %v771_v33 = vld [vmem:[#allocation2 + $0x1] sm:$0xff] }
  0x25   : > { %568 = vst.msk [vmem:[#allocation2 + $0x78] sm:$0xff] %vm551_vm0, %v5805_v1  ;;  %v537_v15 = vld [vmem:[%s3860_s29 + $0x90] sm:$0xff]  ;;  %v538_v16 = vld [vmem:[%s3860_s29 + $0x98] sm:$0xff]  ;;  %v901_v47 = vld [vmem:[#allocation2 + $0x2] sm:$0xff] }
  0x26   : > { %569 = vst.msk [vmem:[#allocation2 + $0x80] sm:$0xff] %vm551_vm0, %v5805_v1  ;;  %v541_v17 = vld [vmem:[%s3860_s29 + $0xb0] sm:$0xff]  ;;  %v542_v19 = vld [vmem:[%s3860_s29 + $0xb8] sm:$0xff]  ;;  %v523_v56 = vld [vmem:[%s3860_s29 + $0x20] sm:$0xff] }
  0x27   : > { %571 = vst.msk [vmem:[#allocation2 + $0x90] sm:$0xff] %vm551_vm0, %v5805_v1  ;;  %v545_v18 = vld [vmem:[%s3860_s29 + $0xd0] sm:$0xff]  ;;  %v546_v21 = vld [vmem:[%s3860_s29 + $0xd8] sm:$0xff]  ;;  %v520_v57 = vld [vmem:[%s3860_s29 + $0x8] sm:$0xff] }
  0x28   : > { %572 = vst.msk [vmem:[#allocation2 + $0x98] sm:$0xff] %vm551_vm0, %v5805_v1  ;;  %v524_v58 = vld [vmem:[%s3860_s29 + $0x28] sm:$0xff]  ;;  %v527_v63 = vld [vmem:[%s3860_s29 + $0x40] sm:$0xff] }
  0x29   : > { %574 = vst.msk [vmem:[#allocation2 + $0xa8] sm:$0xff] %vm551_vm0, %v5805_v1  ;;  %v528_v0 = vld [vmem:[%s3860_s29 + $0x48] sm:$0xff]  ;;  %v531_v2 = vld [vmem:[%s3860_s29 + $0x60] sm:$0xff] }
  0x2a   : > { %575 = vst.msk [vmem:[#allocation2 + $0xb0] sm:$0xff] %vm551_vm0, %v5805_v1 }
  0x2b   : > { %577 = vst.msk [vmem:[#allocation2 + $0xc0] sm:$0xff] %vm551_vm0, %v5805_v1  ;;  %664 = vperm.xlu0 %3526, %v642_v3  }
  0x2c   : > { %578 = vst.msk [vmem:[#allocation2 + $0xc8] sm:$0xff] %vm551_vm0, %v5805_v1 }
  0x2d   : > { %580 = vst.msk [vmem:[#allocation2 + $0xd8] sm:$0xff] %vm551_vm0, %v5805_v1 }
  0x2e   : > { %581 = vst.msk [vmem:[#allocation2 + $0xe0] sm:$0xff] %vm551_vm0, %v5805_v1 }
  0x2f   : > { %583 = vst.msk [vmem:[#allocation2 + $0xf0] sm:$0xff] %vm551_vm0, %v5805_v1 }
  0x30   : > { %584 = vst.msk [vmem:[#allocation2 + $0xf8] sm:$0xff] %vm551_vm0, %v5805_v1 }
  0x31   : > { %586 = vst.msk [vmem:[#allocation2 + $0x108] sm:$0xff] %vm551_vm0, %v5805_v1 }
  0x32   : > { %587 = vst.msk [vmem:[#allocation2 + $0x110] sm:$0xff] %vm551_vm0, %v5805_v1 }
  0x33   : > { %589 = vst.msk [vmem:[#allocation2 + $0x120] sm:$0xff] %vm551_vm0, %v5805_v1 }
  0x34   : > { %590 = vst.msk [vmem:[#allocation2 + $0x128] sm:$0xff] %vm551_vm0, %v5805_v1 }
  0x35   : > { %592 = vst.msk [vmem:[#allocation2 + $0x138] sm:$0xff] %vm551_vm0, %v5805_v1 }
  0x36   : > { %593 = vst.msk [vmem:[#allocation2 + $0x140] sm:$0xff] %vm551_vm0, %v5805_v1 }
  0x37   : > { %595 = vst.msk [vmem:[#allocation2 + $0x150] sm:$0xff] %vm551_vm0, %v5805_v1 }
  0x38   : > { %596 = vst.msk [vmem:[#allocation2 + $0x158] sm:$0xff] %vm551_vm0, %v5805_v1 }
  0x39   : > { %598 = vst.msk [vmem:[#allocation2 + $0x168] sm:$0xff] %vm551_vm0, %v5805_v1 }
  0x3a   : > { %599 = vst.msk [vmem:[#allocation2 + $0x170] sm:$0xff] %vm551_vm0, %v5805_v1 }
  0x3b   : > { %601 = vst.msk [vmem:[#allocation2 + $0x180] sm:$0xff] %vm551_vm0, %v5805_v1 }
  0x3c   : > { %602 = vst.msk [vmem:[#allocation2 + $0x188] sm:$0xff] %vm551_vm0, %v5805_v1 }
  0x3d   : > { %614 = vst.msk [vmem:[#allocation2 + $0x61] sm:$0xff] %vm551_vm0, %v525_v4 }
  0x3e   : > { %610 = vst.msk [vmem:[#allocation2 + $0x31] sm:$0xff] %vm551_vm0, %v521_v5 }
  0x3f   : > { %567 = vst.msk [vmem:[#allocation2 + $0x70] sm:$0x3] %vm554_vm1, %v5805_v1 }
  0x40   : > { %615 = vst.msk [vmem:[#allocation2 + $0x69] sm:$0xff] %vm551_vm0, %v526_v6 }
  0x41   : > { %555 = vst.msk [vmem:[#allocation2 + $0x10] sm:$0x3] %vm554_vm1, %v5805_v1 }
  0x42   : > { %558 = vst.msk [vmem:[#allocation2 + $0x28] sm:$0x3] %vm554_vm1, %v5805_v1 }
  0x43   : > { %561 = vst.msk [vmem:[#allocation2 + $0x40] sm:$0x3] %vm554_vm1, %v5805_v1 }
  0x44   : > { %v3880_v7 = vld [vmem:[#allocation2 + $0x60] sm:$0xff]  ;;  %564 = vst.msk [vmem:[#allocation2 + $0x58] sm:$0x3] %vm554_vm1, %v5805_v1 }
  0x45   : > { %679 = vperm.xlu2 %3528, %v3880_v7   ;;  %v3885_v8 = vld [vmem:[#allocation2 + $0x30] sm:$0xff]  ;;  %570 = vst.msk [vmem:[#allocation2 + $0x88] sm:$0x3] %vm554_vm1, %v5805_v1  ;;  %v3962_v35 = vld [vmem:[#allocation2 + $0x61] sm:$0xff] }
  0x46   : > { %669 = vperm.xlu1 %3527, %v3885_v8   ;;  %573 = vst.msk [vmem:[#allocation2 + $0xa0] sm:$0x3] %vm554_vm1, %v5805_v1  ;;  %v3960_v34 = vld [vmem:[#allocation2 + $0x31] sm:$0xff] }
  0x47   : > { %576 = vst.msk [vmem:[#allocation2 + $0xb8] sm:$0x3] %vm554_vm1, %v5805_v1  ;;  %v3898_v9 = vld [vmem:[#allocation2 + $0x68] sm:$0xff] }
  0x48   : > { %579 = vst.msk [vmem:[#allocation2 + $0xd0] sm:$0x3] %vm554_vm1, %v5805_v1  ;;  %v772_v32 = vld [vmem:[#allocation2 + $0x9] sm:$0xff] }
  0x49   : > { %582 = vst.msk [vmem:[#allocation2 + $0xe8] sm:$0x3] %vm554_vm1, %v5805_v1  ;;  %v3968_v37 = vld [vmem:[#allocation2 + $0x69] sm:$0xff] }
  0x4a   : > { %585 = vst.msk [vmem:[#allocation2 + $0x100] sm:$0x3] %vm554_vm1, %v5805_v1  ;;  %v902_v49 = vld [vmem:[#allocation2 + $0xa] sm:$0xff]  ;;  %v4002_v54 = vld [vmem:[#allocation2 + $0x62] sm:$0xff] }
  0x4b   : > { %588 = vst.msk [vmem:[#allocation2 + $0x118] sm:$0x3] %vm554_vm1, %v5805_v1  ;;  %v4017_v60 = vld [vmem:[#allocation2 + $0x6a] sm:$0xff] }
  0x4c   : > { %591 = vst.msk [vmem:[#allocation2 + $0x130] sm:$0x3] %vm554_vm1, %v5805_v1 }
  0x4d   : > { %684 = vperm.xlu2 %3528, %v3898_v9   ;;  %594 = vst.msk [vmem:[#allocation2 + $0x148] sm:$0x3] %vm554_vm1, %v5805_v1 }
  0x4e   : > { %597 = vst.msk [vmem:[#allocation2 + $0x160] sm:$0x3] %vm554_vm1, %v5805_v1 }
  0x4f   : > { %600 = vst.msk [vmem:[#allocation2 + $0x178] sm:$0x3] %vm554_vm1, %v5805_v1 }
  0x50   : > { %603 = vst.msk [vmem:[#allocation2 + $0x190] sm:$0x3] %vm554_vm1, %v5805_v1 }
  0x51   : > { %611 = vst.msk [vmem:[#allocation2 + $0x39] sm:$0xff] %vm551_vm0, %v522_v10 }
  0x52   : > { %618 = vst.msk [vmem:[#allocation2 + $0x91] sm:$0xff] %vm551_vm0, %v529_v11  ;;  %v535_v11 = vld [vmem:[%s3860_s29 + $0x80] sm:$0xff] }
  0x53   : > { %622 = vst.msk [vmem:[#allocation2 + $0xc1] sm:$0xff] %vm551_vm0, %v533_v12  ;;  %v532_v12 = vld [vmem:[%s3860_s29 + $0x68] sm:$0xff] }
  0x54   : > { %619 = vst.msk [vmem:[#allocation2 + $0x99] sm:$0xff] %vm551_vm0, %v530_v13  ;;  %v536_v13 = vld [vmem:[%s3860_s29 + $0x88] sm:$0xff] }
  0x55   : > { %623 = vst.msk [vmem:[#allocation2 + $0xc9] sm:$0xff] %vm551_vm0, %v534_v14 }
  0x56   : > { %626 = vst.msk [vmem:[#allocation2 + $0xf1] sm:$0xff] %vm551_vm0, %v537_v15 }
  0x57   : > { %627 = vst.msk [vmem:[#allocation2 + $0xf9] sm:$0xff] %vm551_vm0, %v538_v16 }
  0x58   : > { %v3934_v20 = vld [vmem:[#allocation2 + $0x38] sm:$0xff]  ;;  %630 = vst.msk [vmem:[#allocation2 + $0x121] sm:$0xff] %vm551_vm0, %v541_v17 }
  0x59   : > { %674 = vperm.xlu1 %3527, %v3934_v20   ;;  %v3939_v22 = vld [vmem:[#allocation2 + $0x90] sm:$0xff]  ;;  %634 = vst.msk [vmem:[#allocation2 + $0x151] sm:$0xff] %vm551_vm0, %v545_v18  ;;  %v3966_v36 = vld [vmem:[#allocation2 + $0x39] sm:$0xff] }
  0x5a   : > { %689 = vperm.xlu0 %3526, %v3939_v22   ;;  %v3943_v23 = vld [vmem:[#allocation2 + $0xc0] sm:$0xff]  ;;  %631 = vst.msk [vmem:[#allocation2 + $0x129] sm:$0xff] %vm551_vm0, %v542_v19  ;;  %v3975_v39 = vld [vmem:[#allocation2 + $0x91] sm:$0xff] }
  0x5b   : > { %699 = vperm.xlu2 %3528, %v3943_v23   ;;  %635 = vst.msk [vmem:[#allocation2 + $0x159] sm:$0xff] %vm551_vm0, %v546_v21  ;;  %v3948_v24 = vld [vmem:[#allocation2 + $0x98] sm:$0xff]  ;;  %v3977_v40 = vld [vmem:[#allocation2 + $0xc1] sm:$0xff] }
  0x5c   : > { %v3950_v25 = vld [vmem:[#allocation2 + $0xc8] sm:$0xff]  ;;  %v3970_v38 = vld [vmem:[#allocation2 + $0x99] sm:$0xff]  ;;  %608 = vst.msk [vmem:[#allocation2 + $0x19] sm:$0xff] %vm551_vm0, %v519_v52 }
  0x5d   : > { %v3957_v27 = vld [vmem:[#allocation2 + $0xf0] sm:$0xff]  ;;  %v3993_v50 = vld [vmem:[#allocation2 + $0x3a] sm:$0xff]  ;;  %612 = vst.msk [vmem:[#allocation2 + $0x49] sm:$0xff] %vm551_vm0, %v523_v56  ;;  %v4034_v4 = vld [vmem:[#allocation2 + $0xc2] sm:$0xff] }
  0x5e   : > { %v3952_v26 = vld [vmem:[#allocation2 + $0xf8] sm:$0xff]  ;;  %v3984_v42 = vld [vmem:[#allocation2 + $0xc9] sm:$0xff]  ;;  %609 = vst.msk [vmem:[#allocation2 + $0x21] sm:$0xff] %vm551_vm0, %v520_v57  ;;  %v539_v18 = vld [vmem:[%s3860_s29 + $0xa0] sm:$0xff] }
  0x5f   : > { %v653_v28 = vld [vmem:[#allocation2 + $0x120] sm:$0xff]  ;;  %v3979_v41 = vld [vmem:[#allocation2 + $0xf1] sm:$0xff]  ;;  %613 = vst.msk [vmem:[#allocation2 + $0x51] sm:$0xff] %vm551_vm0, %v524_v58 }
  0x60   : > { %v655_v29 = vld [vmem:[#allocation2 + $0x150] sm:$0xff]  ;;  %v3986_v43 = vld [vmem:[#allocation2 + $0xf9] sm:$0xff]  ;;  %v3990_v45 = vld [vmem:[#allocation2 + $0x121] sm:$0xff]  ;;  %616 = vst.msk [vmem:[#allocation2 + $0x79] sm:$0xff] %vm551_vm0, %v527_v63 }
  0x61   : > { %694 = vperm.xlu1 %3527, %v3948_v24   ;;  %v654_v30 = vld [vmem:[#allocation2 + $0x128] sm:$0xff]  ;;  %v785_v46 = vld [vmem:[#allocation2 + $0x151] sm:$0xff]  ;;  %v4019_v61 = vld [vmem:[#allocation2 + $0x9a] sm:$0xff]  ;;  %617 = vst.msk [vmem:[#allocation2 + $0x81] sm:$0xff] %vm551_vm0, %v528_v0 }
  0x62   : > { %704 = vperm.xlu0 %3526, %v3950_v25   ;;  %v656_v31 = vld [vmem:[#allocation2 + $0x158] sm:$0xff]  ;;  %v784_v44 = vld [vmem:[#allocation2 + $0x129] sm:$0xff]  ;;  %620 = vst.msk [vmem:[#allocation2 + $0xa9] sm:$0xff] %vm551_vm0, %v531_v2 }
  0x63   : > { %714 = vperm.xlu2 %3528, %v3952_v26   ;;  %v786_v48 = vld [vmem:[#allocation2 + $0x159] sm:$0xff]  ;;  %v4021_v62 = vld [vmem:[#allocation2 + $0xca] sm:$0xff]  ;;  %v4040_v10 = vld [vmem:[#allocation2 + $0x122] sm:$0xff]  ;;  %624 = vst.msk [vmem:[#allocation2 + $0xd9] sm:$0xff] %vm551_vm0, %v535_v11 }
  0x64   : > { %v4000_v53 = vld [vmem:[#allocation2 + $0x32] sm:$0xff]  ;;  %621 = vst.msk [vmem:[#allocation2 + $0xb1] sm:$0xff] %vm551_vm0, %v532_v12  ;;  %v4053_v15 = vld [vmem:[#allocation2 + $0xfa] sm:$0xff]  ;;  %v4055_v16 = vld [vmem:[#allocation2 + $0x12a] sm:$0xff] }
  0x65   : > { %v4004_v55 = vld [vmem:[#allocation2 + $0x92] sm:$0xff]  ;;  %625 = vst.msk [vmem:[#allocation2 + $0xe1] sm:$0xff] %vm551_vm0, %v536_v13  ;;  %v916_v17 = vld [vmem:[#allocation2 + $0x15a] sm:$0xff] }
  0x66   : > { %v4036_v5 = vld [vmem:[#allocation2 + $0xf2] sm:$0xff]  ;;  %628 = vst.msk [vmem:[#allocation2 + $0x109] sm:$0xff] %vm551_vm0, %v539_v18 }
  0x67   : > { %v1034_v56 = vld [vmem:[#allocation2 + $0x50] sm:$0xff]  ;;  %v1035_v12 = vld [vmem:[#allocation2 + $0x78] sm:$0xff] }
  0x68   : > { %v1036_v58 = vld [vmem:[#allocation2 + $0x80] sm:$0xff] }
  0x69   : > { %709 = vperm.xlu1 %3527, %v3957_v27  }
  0x6a   : > { %719 = vperm.xlu0 %3526, %v653_v28  }
  0x6b   : > { %729 = vperm.xlu2 %3528, %v655_v29   ;;  %v915_v29 = vld [vmem:[#allocation2 + $0x152] sm:$0xff] }
  0x71   : > { %724 = vperm.xlu1 %3527, %v654_v30   ;;  %v1031_v30 = vld [vmem:[#allocation2 + $0x18] sm:$0xff] }
  0x72   : > { %734 = vperm.xlu0 %3526, %v656_v31   ;;  %v1033_v31 = vld [vmem:[#allocation2 + $0x48] sm:$0xff] }
  0x73   : > { %794 = vperm.xlu2 %3528, %v772_v32   ;;  %v4068_v32 = vld [vmem:[%s5816_s1 + $0x1] ss:$0 sm:$0xff] }
  0x79   : > { %789 = vperm.xlu1 %3527, %v771_v33  }
  0x7a   : > { %799 = vperm.xlu0 %3526, %v3960_v34  }
  0x7b   : > { %809 = vperm.xlu2 %3528, %v3962_v35  }
  0x81   : > { %804 = vperm.xlu1 %3527, %v3966_v36  }
  0x82   : > { %814 = vperm.xlu0 %3526, %v3968_v37  }
  0x83   : > { %824 = vperm.xlu2 %3528, %v3970_v38  }
  0x89   : > { %819 = vperm.xlu1 %3527, %v3975_v39  }
  0x8a   : > { %829 = vperm.xlu0 %3526, %v3977_v40  }
  0x8b   : > { %839 = vperm.xlu2 %3528, %v3979_v41  }
  0x91   : > { %834 = vperm.xlu1 %3527, %v3984_v42  }
  0x92   : > { %844 = vperm.xlu0 %3526, %v3986_v43  }
  0x93   : > { %854 = vperm.xlu2 %3528, %v784_v44   ;;  %v4075_v44 = vld [vmem:[%s5816_s1] ss:$0 sm:$0xff] }
  0x95   : > { %v4038_v6 = vpop.permute.xlu0 %659 }
  0x99   : > { %849 = vperm.xlu1 %3527, %v3990_v45  }
  0x9a   : > { %859 = vperm.xlu0 %3526, %v785_v46  }
  0x9b   : > { %919 = vperm.xlu2 %3528, %v901_v47  }
  0x9d   : > { %v665_v21 = vpop.permute.xlu0 %664 }
  0x9f   : > { %v3995_v51 = vpop.permute.xlu2 %679 }
  0xa0   : > { %v742_v11 = vmul.f32 %v4075_v44, %v3995_v51  ;;  %v1040_v51 = vld [vmem:[#allocation2 + $0xe0] sm:$0xff] }
  0xa1   : > { %864 = vperm.xlu1 %3527, %v786_v48   ;;  %v739_v48 = vmul.f32 %v4075_v44, %v665_v21  ;;  %v1039_v21 = vld [vmem:[#allocation2 + $0xd8] sm:$0xff] }
  0xa2   : > { %924 = vperm.xlu0 %3526, %v902_v49   ;;  %v1032_v49 = vld [vmem:[#allocation2 + $0x20] sm:$0xff] }
  0xa3   : > { %934 = vperm.xlu2 %3528, %v3993_v50  }
  0xa7   : > { %v4014_v59 = vpop.permute.xlu2 %684 }
  0xa9   : > { %929 = vperm.xlu1 %3527, %v4000_v53  }
  0xaa   : > { %939 = vperm.xlu0 %3526, %v4002_v54  }
  0xab   : > { %949 = vperm.xlu2 %3528, %v4004_v55  }
  0xb1   : > { %944 = vperm.xlu1 %3527, %v4017_v60  }
  0xb2   : > { %954 = vperm.xlu0 %3526, %v4019_v61  }
  0xb3   : > { %964 = vperm.xlu2 %3528, %v4021_v62  }
  0xb5   : > { %v4032_v3 = vpop.permute.xlu2 %699 }
  0xb8   : > { %v4059_v19 = vpop.permute.xlu1 %669 }
  0xb9   : > { %959 = vperm.xlu1 %3527, %v4034_v4  }
  0xba   : > { %969 = vperm.xlu0 %3526, %v4036_v5  }
  0xbb   : > { %979 = vperm.xlu2 %3528, %v4040_v10  }
  0xbd   : > { %v4051_v14 = vpop.permute.xlu2 %714 }
  0xc1   : > { %974 = vperm.xlu1 %3527, %v4053_v15  }
  0xc2   : > { %984 = vperm.xlu0 %3526, %v4055_v16  }
  0xc3   : > { %994 = vperm.xlu2 %3528, %v916_v17   ;;  %v1037_v17 = vld [vmem:[#allocation2 + $0xa8] sm:$0xff] }
  0xc5   : > { %v4063_v28 = vpop.permute.xlu2 %729 }
  0xc9   : > { %989 = vperm.xlu1 %3527, %v915_v29  }
  0xca   : > { %1049 = vperm.xlu0 %3526, %v1031_v30  }
  0xcb   : > { %v4070_v33 = vpop.permute.xlu1 %674  ;;  %1059 = vperm.xlu2 %3528, %v1033_v31  }
  0xcc   : > { %v4077_v46 = vpop.permute.xlu0 %689 }
  0xcd   : > { %v795_v47 = vpop.permute.xlu2 %794 }
  0xce   : > { %v869_v52 = vmul.f32 %v4068_v32, %v795_v47 }
  0xd0   : > { %v4081_v57 = vadd.f32 %v869_v52, %v739_v48  ;;  %v1038_v48 = vld [vmem:[#allocation2 + $0xb0] sm:$0xff] }
  0xd1   : > { %1054 = vperm.xlu1 %3527, %v1032_v49  }
  0xd2   : > { %1064 = vperm.xlu0 %3526, %v1034_v56   ;;  %v1161_v56 = vld [vmem:[#allocation2 + $0x19] sm:$0xff] }
  0xd3   : > { %v695_v63 = vpop.permute.xlu1 %694  ;;  %1074 = vperm.xlu2 %3528, %v1036_v58  }
  0xd4   : > { %v4083_v0 = vpop.permute.xlu0 %704  ;;  %v745_v47 = vmul.f32 %v4075_v44, %v695_v63  ;;  %v1291_v63 = vld [vmem:[#allocation2 + $0x1a] sm:$0xff] }
  0xd5   : > { %v810_v2 = vpop.permute.xlu2 %809 }
  0xd6   : > { %v872_v13 = vmul.f32 %v4068_v32, %v810_v2 }
  0xd8   : > { %v4088_v18 = vadd.f32 %v872_v13, %v742_v11  ;;  %v1041_v13 = vld [vmem:[#allocation2 + $0x108] sm:$0xff] }
  0xd9   : > { %1069 = vperm.xlu1 %3527, %v1035_v12  }
  0xda   : > { %1079 = vperm.xlu0 %3526, %v1037_v17  }
  0xdb   : > { %v710_v29 = vpop.permute.xlu1 %709  ;;  %1089 = vperm.xlu2 %3528, %v1039_v21  }
  0xdc   : > { %v4090_v30 = vpop.permute.xlu0 %719  ;;  %v748_v12 = vmul.f32 %v4075_v44, %v710_v29  ;;  %v740_v29 = vmul.f32 %v4075_v44, %v4059_v19 }
  0xdd   : > { %v825_v31 = vpop.permute.xlu2 %824 }
  0xde   : > { %v875_v49 = vmul.f32 %v4068_v32, %v825_v31 }
  0xe0   : > { %v4094_v52 = vadd.f32 %v875_v49, %v745_v47  ;;  %v738_v47 = vmul.f32 %v4075_v44, %v4038_v6  ;;  %v4118_v6 = vld [vmem:[%s5816_s1 + $0x2] ss:$0 sm:$0xff] }
  0xe1   : > { %1084 = vperm.xlu1 %3527, %v1038_v48  }
  0xe2   : > { %1094 = vperm.xlu0 %3526, %v1040_v51  }
  0xe3   : > { %v725_v58 = vpop.permute.xlu1 %724  ;;  %1179 = vperm.xlu2 %3528, %v1161_v56  }
  0xe4   : > { %v4096_v2 = vpop.permute.xlu0 %734 }
  0xe5   : > { %v840_v11 = vpop.permute.xlu2 %839 }
  0xe6   : > { %v878_v17 = vmul.f32 %v4068_v32, %v840_v11  ;;  %v751_v11 = vmul.f32 %v4075_v44, %v725_v58  ;;  %v741_v58 = vmul.f32 %v4075_v44, %v4070_v33 }
  0xe8   : > { %v4100_v21 = vadd.f32 %v878_v17, %v748_v12 }
  0xe9   : > { %1099 = vperm.xlu1 %3527, %v1041_v13   ;;  %v1162_v13 = vld [vmem:[#allocation2 + $0x21] sm:$0xff] }
  0xea   : > { %1309 = vperm.xlu0 %3526, %v1291_v63  }
  0xeb   : > { %v790_v31 = vpop.permute.xlu1 %789  ;;  %1440 = vperm.xlu2 %3528, %v3885_v8   ;;  %v1163_v8 = vld [vmem:[#allocation2 + $0x49] sm:$0xff] }
  0xec   : > { %v868_v48 = vmul.f32 %v4068_v32, %v790_v31  ;;  %v800_v49 = vpop.permute.xlu0 %799 }
  0xed   : > { %v870_v51 = vmul.f32 %v4068_v32, %v800_v49  ;;  %v855_v56 = vpop.permute.xlu2 %854 }
  0xee   : > { %v884_v12 = vadd.f32 %v868_v48, %v738_v47  ;;  %v881_v17 = vmul.f32 %v4068_v32, %v855_v56  ;;  %v743_v48 = vmul.f32 %v4075_v44, %v4014_v59  ;;  %v1292_v56 = vld [vmem:[#allocation2 + $0x22] sm:$0xff]  ;;  %v744_v59 = vmul.f32 %v4075_v44, %v4077_v46 }
  0xef   : > { %v4111_v63 = vadd.f32 %v870_v51, %v740_v29 }
  0xf0   : > { %v4113_v1 = vadd.f32 %v881_v17, %v751_v11  ;;  %v1293_v17 = vld [vmem:[#allocation2 + $0x4a] sm:$0xff] }
  0xf1   : > { %1184 = vperm.xlu1 %3527, %v1162_v13  }
  0xf2   : > { %1189 = vperm.xlu0 %3526, %v1163_v8  }
  0xf3   : > { %v805_v19 = vpop.permute.xlu1 %804  ;;  %1570 = vperm.xlu2 %3528, %v3960_v34  }
  0xf4   : > { %v871_v31 = vmul.f32 %v4068_v32, %v805_v19  ;;  %v815_v47 = vpop.permute.xlu0 %814 }
  0xf5   : > { %v873_v49 = vmul.f32 %v4068_v32, %v815_v47  ;;  %v920_v29 = vpop.permute.xlu2 %919 }
  0xf6   : > { %v887_v51 = vadd.f32 %v871_v31, %v741_v58  ;;  %v998_v11 = vmul.f32 %v4118_v6, %v920_v29  ;;  %v746_v58 = vmul.f32 %v4075_v44, %v4032_v3  ;;  %v1164_v29 = vld [vmem:[#allocation2 + $0x51] sm:$0xff]  ;;  %v747_v3 = vmul.f32 %v4075_v44, %v4083_v0 }
  0xf7   : > { %v4128_v13 = vadd.f32 %v873_v49, %v743_v48 }
  0xf8   : > { %v4130_v34 = vadd.f32 %v998_v11, %v884_v12 }
  0xf9   : > { %1314 = vperm.xlu1 %3527, %v1292_v56  }
  0xfa   : > { %1319 = vperm.xlu0 %3526, %v1293_v17   ;;  %v749_v17 = vmul.f32 %v4075_v44, %v4051_v14  ;;  %v750_v14 = vmul.f32 %v4075_v44, %v4090_v30 }
  0xfb   : > { %v820_v33 = vpop.permute.xlu1 %819  ;;  %1700 = vperm.xlu2 %3528, %v4000_v53  }
  0xfc   : > { %v874_v8 = vmul.f32 %v4068_v32, %v820_v33  ;;  %v830_v19 = vpop.permute.xlu0 %829 }
  0xfd   : > { %v876_v31 = vmul.f32 %v4068_v32, %v830_v19  ;;  %v935_v47 = vpop.permute.xlu2 %934  ;;  %v1294_v19 = vld [vmem:[#allocation2 + $0x52] sm:$0xff] }
  0xfe   : > { %v890_v48 = vadd.f32 %v874_v8, %v744_v59  ;;  %v1001_v12 = vmul.f32 %v4118_v6, %v935_v47  ;;  %v752_v47 = vmul.f32 %v4075_v44, %v4063_v28  ;;  %v753_v28 = vmul.f32 %v4075_v44, %v4096_v2 }
  0xff   : > { %v4140_v49 = vadd.f32 %v876_v31, %v746_v58 }
 0x100   : > { %v4142_v56 = vadd.f32 %v1001_v12, %v887_v51 }
 0x101   : > { %1445 = vperm.xlu1 %3527, %v3934_v20  }
 0x102   : > { %1194 = vperm.xlu0 %3526, %v1164_v29  }
 0x103   : > { %v835_v53 = vpop.permute.xlu1 %834  ;;  %1575 = vperm.xlu2 %3528, %v3966_v36  }
 0x104   : > { %v877_v46 = vmul.f32 %v4068_v32, %v835_v53  ;;  %v845_v11 = vpop.permute.xlu0 %844 }
 0x105   : > { %v879_v33 = vmul.f32 %v4068_v32, %v845_v11  ;;  %v950_v59 = vpop.permute.xlu2 %949 }
 0x106   : > { %v893_v51 = vadd.f32 %v877_v46, %v747_v3  ;;  %v1004_v8 = vmul.f32 %v4118_v6, %v950_v59 }
 0x107   : > { %v4153_v20 = vadd.f32 %v879_v33, %v749_v17 }
 0x108   : > { %v4155_v58 = vadd.f32 %v1004_v8, %v890_v48 }
 0x109   : > { %1450 = vperm.xlu1 %3527, %v3880_v7  }
 0x10a   : > { %1324 = vperm.xlu0 %3526, %v1294_v19  }
 0x10b   : > { %v850_v36 = vpop.permute.xlu1 %849  ;;  %1705 = vperm.xlu2 %3528, %v3993_v50  }
 0x10c   : > { %v880_v0 = vmul.f32 %v4068_v32, %v850_v36  ;;  %v860_v31 = vpop.permute.xlu0 %859  ;;  %v1165_v36 = vld [vmem:[#allocation2 + $0x79] sm:$0xff] }
 0x10d   : > { %v882_v12 = vmul.f32 %v4068_v32, %v860_v31  ;;  %v965_v29 = vpop.permute.xlu2 %964  ;;  %v4197_v31 = vld [vmem:[%s5816_s1 + $0x3] ss:$0 sm:$0xff] }
 0x10e   : > { %v896_v48 = vadd.f32 %v880_v0, %v750_v14  ;;  %v1007_v53 = vmul.f32 %v4118_v6, %v965_v29  ;;  %v1166_v0 = vld [vmem:[#allocation2 + $0x81] sm:$0xff] }
 0x10f   : > { %v4166_v7 = vadd.f32 %v882_v12, %v752_v47 }
 0x110   : > { %v4168_v3 = vadd.f32 %v1007_v53, %v893_v51 }
 0x111   : > { %1580 = vperm.xlu1 %3527, %v3962_v35  }
 0x112   : > { %1455 = vperm.xlu0 %3526, %v3898_v9   ;;  %v1295_v9 = vld [vmem:[#allocation2 + $0x7a] sm:$0xff] }
 0x113   : > { %v865_v50 = vpop.permute.xlu1 %864  ;;  %1585 = vperm.xlu2 %3528, %v3968_v37  }
 0x114   : > { %v883_v30 = vmul.f32 %v4068_v32, %v865_v50  ;;  %v925_v46 = vpop.permute.xlu0 %924 }
 0x115   : > { %v999_v11 = vmul.f32 %v4118_v6, %v925_v46  ;;  %v980_v17 = vpop.permute.xlu2 %979 }
 0x116   : > { %v899_v33 = vadd.f32 %v883_v30, %v753_v28  ;;  %v1010_v59 = vmul.f32 %v4118_v6, %v980_v17 }
 0x117   : > { %v4179_v51 = vadd.f32 %v999_v11, %v4081_v57 }
 0x118   : > { %v4181_v35 = vadd.f32 %v1010_v59, %v896_v48 }
 0x119   : > { %1710 = vperm.xlu1 %3527, %v4002_v54  }
 0x11a   : > { %5817 = vst [vmem:[#allocation8_spill] sm:$0xff] %v4181_v35  ;;  %1715 = vperm.xlu0 %3526, %v4017_v60   ;;  %v1296_v60 = vld [vmem:[#allocation2 + $0x82] sm:$0xff] }
 0x11b   : > { %v930_v37 = vpop.permute.xlu1 %929  ;;  %1329 = vperm.xlu2 %3528, %v1295_v9  }
 0x11c   : > { %v1000_v32 = vmul.f32 %v4118_v6, %v930_v37  ;;  %v940_v44 = vpop.permute.xlu0 %939 }
 0x11d   : > { %v1002_v2 = vmul.f32 %v4118_v6, %v940_v44  ;;  %v995_v8 = vpop.permute.xlu2 %994 }
 0x11e   : > { %v1016_v19 = vadd.f32 %v1000_v32, %v4111_v63  ;;  %v1013_v57 = vmul.f32 %v4118_v6, %v995_v8  ;;  %v1169_v8 = vld [vmem:[#allocation2 + $0xd9] sm:$0xff] }
 0x11f   : > { %v4190_v14 = vadd.f32 %v1002_v2, %v4088_v18 }
 0x120   : > { %v4192_v54 = vadd.f32 %v1013_v57, %v899_v33 }
 0x121   : > { %1199 = vperm.xlu1 %3527, %v1165_v36  }
 0x122   : > { %5818 = vst [vmem:[#allocation9_spill] sm:$0xff] %v4192_v54  ;;  %1204 = vperm.xlu0 %3526, %v1166_v0   ;;  %v1297_v0 = vld [vmem:[#allocation2 + $0xaa] sm:$0xff] }
 0x123   : > { %v945_v47 = vpop.permute.xlu1 %944  ;;  %1334 = vperm.xlu2 %3528, %v1296_v60   ;;  %v1298_v60 = vld [vmem:[#allocation2 + $0xb2] sm:$0xff] }
 0x124   : > { %v1003_v63 = vmul.f32 %v4118_v6, %v945_v47  ;;  %v955_v12 = vpop.permute.xlu0 %954  ;;  %v1299_v47 = vld [vmem:[#allocation2 + $0xda] sm:$0xff] }
 0x125   : > { %v1005_v29 = vmul.f32 %v4118_v6, %v955_v12  ;;  %v1060_v18 = vpop.permute.xlu2 %1059  ;;  %v1170_v12 = vld [vmem:[#allocation2 + $0xe1] sm:$0xff] }
 0x126   : > { %v1019_v48 = vadd.f32 %v1003_v63, %v4128_v13  ;;  %v1130_v53 = vmul.f32 %v4197_v31, %v1060_v18 }
 0x127   : > { %v4204_v50 = vadd.f32 %v1005_v29, %v4094_v52 }
 0x128   : > { %v4206_v28 = vadd.f32 %v1130_v53, %v1016_v19 }
 0x129   : > { %1460 = vperm.xlu1 %3527, %v3939_v22  }
 0x12a   : > { %1590 = vperm.xlu0 %3526, %v3975_v39  }
 0x12b   : > { %v960_v30 = vpop.permute.xlu1 %959  ;;  %1720 = vperm.xlu2 %3528, %v4004_v55  }
 0x12c   : > { %v1006_v46 = vmul.f32 %v4118_v6, %v960_v30  ;;  %v970_v11 = vpop.permute.xlu0 %969 }
 0x12d   : > { %v1008_v17 = vmul.f32 %v4118_v6, %v970_v11  ;;  %v1075_v13 = vpop.permute.xlu2 %1074 }
 0x12e   : > { %v1022_v33 = vadd.f32 %v1006_v46, %v4140_v49  ;;  %v1133_v52 = vmul.f32 %v4197_v31, %v1075_v13 }
 0x12f   : > { %v4216_v59 = vadd.f32 %v1008_v17, %v4100_v21  ;;  %v1167_v21 = vld [vmem:[#allocation2 + $0xa9] sm:$0xff] }
 0x130   : > { %v4218_v9 = vadd.f32 %v1133_v52, %v1019_v48 }
 0x131   : > { %1465 = vperm.xlu1 %3527, %v3948_v24   ;;  %v1168_v24 = vld [vmem:[#allocation2 + $0xb1] sm:$0xff] }
 0x132   : > { %1595 = vperm.xlu0 %3526, %v3970_v38  }
 0x133   : > { %v975_v22 = vpop.permute.xlu1 %974  ;;  %1725 = vperm.xlu2 %3528, %v4019_v61  }
 0x134   : > { %v1009_v39 = vmul.f32 %v4118_v6, %v975_v22  ;;  %v985_v55 = vpop.permute.xlu0 %984  ;;  %v4338_v22 = vld [vmem:[%s5816_s1 + $0x6] ss:$0 sm:$0xff] }
 0x135   : > { %v1011_v37 = vmul.f32 %v4118_v6, %v985_v55  ;;  %v1090_v49 = vpop.permute.xlu2 %1089 }
 0x136   : > { %v4226_v32 = vadd.f32 %v1009_v39, %v4153_v20  ;;  %v1136_v44 = vmul.f32 %v4197_v31, %v1090_v49 }
 0x137   : > { %v4230_v2 = vadd.f32 %v1011_v37, %v4113_v1  ;;  %v5822_v1 = vmov 0.0  }
 0x138   : > { %5819 = vst [vmem:[#allocation10_spill] sm:$0xff] %v4226_v32  ;;  %v4232_v38 = vadd.f32 %v1136_v44, %v1022_v33  ;;  %v1171_v33 = vld [vmem:[#allocation2 + $0x109] sm:$0xff] }
 0x139   : > { %5820 = vst [vmem:[#allocation11_spill] sm:$0xff] %v4230_v2  ;;  %1209 = vperm.xlu1 %3527, %v1167_v21   ;;  %v1300_v44 = vld [vmem:[#allocation2 + $0xe2] sm:$0xff] }
 0x13a   : > { %1214 = vperm.xlu0 %3526, %v1168_v24   ;;  %1872 = vst.msk [vmem:[#allocation3 + $0x18] sm:$0xff] %vm1867_vm2, %v5822_v1 }
 0x13b   : > { %v990_v61 = vpop.permute.xlu1 %989  ;;  %1219 = vperm.xlu2 %3528, %v1169_v8   ;;  %1873 = vst.msk [vmem:[#allocation3 + $0x20] sm:$0xff] %vm1867_vm2, %v5822_v1  ;;  %v4366_v8 = vld [vmem:[%s5816_s1 + $0x8] ss:$0 sm:$0xff] }
 0x13c   : > { %v1012_v19 = vmul.f32 %v4118_v6, %v990_v61  ;;  %v1050_v36 = vpop.permute.xlu0 %1049  ;;  %1868 = vst.msk [vmem:[#allocation3] sm:$0xff] %vm1867_vm2, %v5822_v1 }
 0x13d   : > { %v1180_v57 = vpop.permute.xlu2 %1179  ;;  %1869 = vst.msk [vmem:[#allocation3 + $0x8] sm:$0xff] %vm1867_vm2, %v5822_v1  ;;  %v1128_v17 = vmul.f32 %v4197_v31, %v1050_v36 }
 0x13e   : > { %v4236_v20 = vadd.f32 %v1012_v19, %v4166_v7  ;;  %1875 = vst.msk [vmem:[#allocation3 + $0x30] sm:$0xff] %vm1867_vm2, %v5822_v1 }
 0x13f   : > { %1876 = vst.msk [vmem:[#allocation3 + $0x38] sm:$0xff] %vm1867_vm2, %v5822_v1 }
 0x140   : > { %5821 = vst [vmem:[#allocation12_spill] sm:$0xff] %v4236_v20 }
 0x141   : > { %1339 = vperm.xlu1 %3527, %v1297_v0   ;;  %1878 = vst.msk [vmem:[#allocation3 + $0x48] sm:$0xff] %vm1867_vm2, %v5822_v1 }
 0x142   : > { %1344 = vperm.xlu0 %3526, %v1298_v60   ;;  %1879 = vst.msk [vmem:[#allocation3 + $0x50] sm:$0xff] %vm1867_vm2, %v5822_v1 }
 0x143   : > { %v4246_v6 = vpop.permute.xlu1 %1054  ;;  %1349 = vperm.xlu2 %3528, %v1299_v47   ;;  %1881 = vst.msk [vmem:[#allocation3 + $0x60] sm:$0xff] %vm1867_vm2, %v5822_v1 }
 0x144   : > { %v4250_v7 = vpop.permute.xlu0 %1064  ;;  %1882 = vst.msk [vmem:[#allocation3 + $0x68] sm:$0xff] %vm1867_vm2, %v5822_v1 }
 0x145   : > { %v4254_v63 = vpop.permute.xlu2 %1440  ;;  %1884 = vst.msk [vmem:[#allocation3 + $0x78] sm:$0xff] %vm1867_vm2, %v5822_v1 }
 0x146   : > { %1885 = vst.msk [vmem:[#allocation3 + $0x80] sm:$0xff] %vm1867_vm2, %v5822_v1  ;;  %v1519_v24 = vmul.f32 %v4338_v22, %v4254_v63  ;;  %v540_v63 = vld [vmem:[%s3860_s29 + $0xa8] sm:$0xff] }
 0x147   : > { %1887 = vst.msk [vmem:[#allocation3 + $0x90] sm:$0xff] %vm1867_vm2, %v5822_v1 }
 0x148   : > { %1888 = vst.msk [vmem:[#allocation3 + $0x98] sm:$0xff] %vm1867_vm2, %v5822_v1 }
 0x149   : > { %1470 = vperm.xlu1 %3527, %v3943_v23   ;;  %1890 = vst.msk [vmem:[#allocation3 + $0xa8] sm:$0xff] %vm1867_vm2, %v5822_v1 }
 0x14a   : > { %1475 = vperm.xlu0 %3526, %v3950_v25   ;;  %1891 = vst.msk [vmem:[#allocation3 + $0xb0] sm:$0xff] %vm1867_vm2, %v5822_v1 }
 0x14b   : > { %v1070_v29 = vpop.permute.xlu1 %1069  ;;  %1224 = vperm.xlu2 %3528, %v1170_v12   ;;  %1893 = vst.msk [vmem:[#allocation3 + $0xc0] sm:$0xff] %vm1867_vm2, %v5822_v1 }
 0x14c   : > { %v1132_v18 = vmul.f32 %v4197_v31, %v1070_v29  ;;  %v1080_v48 = vpop.permute.xlu0 %1079  ;;  %1894 = vst.msk [vmem:[#allocation3 + $0xc8] sm:$0xff] %vm1867_vm2, %v5822_v1 }
 0x14d   : > { %v1134_v23 = vmul.f32 %v4197_v31, %v1080_v48  ;;  %v1571_v53 = vpop.permute.xlu2 %1570  ;;  %1896 = vst.msk [vmem:[#allocation3 + $0xd8] sm:$0xff] %vm1867_vm2, %v5822_v1 }
 0x14e   : > { %v4279_v25 = vadd.f32 %v1132_v18, %v4190_v14  ;;  %1897 = vst.msk [vmem:[#allocation3 + $0xe0] sm:$0xff] %vm1867_vm2, %v5822_v1 }
 0x14f   : > { %v4284_v30 = vadd.f32 %v1134_v23, %v4155_v58  ;;  %2597 = vst.msk [vmem:[#allocation4] sm:$0xff] %vm1867_vm2, %v5822_v1 }
 0x150   : > { %2598 = vst.msk [vmem:[#allocation4 + $0x8] sm:$0xff] %vm1867_vm2, %v5822_v1 }
 0x151   : > { %1600 = vperm.xlu1 %3527, %v3977_v40   ;;  %v4305_v40 = vld [vmem:[%s5816_s1 + $0x4] ss:$0 sm:$0xff]  ;;  %2600 = vst.msk [vmem:[#allocation4 + $0x18] sm:$0xff] %vm1867_vm2, %v5822_v1 }
 0x152   : > { %1480 = vperm.xlu0 %3526, %v3957_v27   ;;  %2601 = vst.msk [vmem:[#allocation4 + $0x20] sm:$0xff] %vm1867_vm2, %v5822_v1  ;;  %v1258_v52 = vmul.f32 %v4305_v40, %v1180_v57  ;;  %v4382_v57 = vld [vmem:[%s5824_s2] ss:$0 sm:$0xff] }
 0x153   : > { %v1085_v14 = vpop.permute.xlu1 %1084  ;;  %1730 = vperm.xlu2 %3528, %v4034_v4   ;;  %2603 = vst.msk [vmem:[#allocation4 + $0x30] sm:$0xff] %vm1867_vm2, %v5822_v1 }
 0x154   : > { %v1135_v58 = vmul.f32 %v4197_v31, %v1085_v14  ;;  %v1095_v46 = vpop.permute.xlu0 %1094  ;;  %2604 = vst.msk [vmem:[#allocation4 + $0x38] sm:$0xff] %vm1867_vm2, %v5822_v1  ;;  %v1129_v14 = vmul.f32 %v4197_v31, %v4246_v6  ;;  %v1432_v6 = vld [vmem:[#allocation2 + $0x120] sm:$0xff] }
 0x155   : > { %v1137_v27 = vmul.f32 %v4197_v31, %v1095_v46  ;;  %v1701_v11 = vpop.permute.xlu2 %1700  ;;  %2606 = vst.msk [vmem:[#allocation4 + $0x48] sm:$0xff] %vm1867_vm2, %v5822_v1 }
 0x156   : > { %v4311_v4 = vadd.f32 %v1135_v58, %v4204_v50  ;;  %v4328_v50 = vld [vmem:[%s5816_s1 + $0x5] ss:$0 sm:$0xff]  ;;  %2607 = vst.msk [vmem:[#allocation4 + $0x50] sm:$0xff] %vm1867_vm2, %v5822_v1  ;;  %v1779_v36 = vmul.f32 %v4366_v8, %v1701_v11 }
 0x157   : > { %v4317_v13 = vadd.f32 %v1137_v27, %v4168_v3  ;;  %v1144_v3 = vadd.f32 %v1128_v17, %v4130_v34  ;;  %2609 = vst.msk [vmem:[#allocation4 + $0x60] sm:$0xff] %vm1867_vm2, %v5822_v1  ;;  %v4349_v34 = vld [vmem:[%s5816_s1 + $0x7] ss:$0 sm:$0xff]  ;;  %v1145_v17 = vadd.f32 %v1129_v14, %v4179_v51 }
 0x158   : > { %2610 = vst.msk [vmem:[#allocation4 + $0x68] sm:$0xff] %vm1867_vm2, %v5822_v1 }
 0x159   : > { %5823 = vst [vmem:[#allocation13_spill] sm:$0xff] %v4317_v13  ;;  %1605 = vperm.xlu1 %3527, %v3984_v42   ;;  %v1274_v37 = vadd.f32 %v1258_v52, %v1144_v3 }
 0x15a   : > { %1229 = vperm.xlu0 %3526, %v1171_v33   ;;  %2612 = vst.msk [vmem:[#allocation4 + $0x78] sm:$0xff] %vm1867_vm2, %v5822_v1 }
 0x15b   : > { %v1100_v42 = vpop.permute.xlu1 %1099  ;;  %1610 = vperm.xlu2 %3528, %v3979_v41   ;;  %2613 = vst.msk [vmem:[#allocation4 + $0x80] sm:$0xff] %vm1867_vm2, %v5822_v1 }
 0x15c   : > { %v1138_v39 = vmul.f32 %v4197_v31, %v1100_v42  ;;  %v1310_v55 = vpop.permute.xlu0 %1309  ;;  %2615 = vst.msk [vmem:[#allocation4 + $0x90] sm:$0xff] %vm1867_vm2, %v5822_v1 }
 0x15d   : > { %v1388_v49 = vmul.f32 %v4328_v50, %v1310_v55  ;;  %v4354_v21 = vpop.permute.xlu2 %1575  ;;  %2616 = vst.msk [vmem:[#allocation4 + $0x98] sm:$0xff] %vm1867_vm2, %v5822_v1 }
 0x15e   : > { %v4357_v41 = vadd.f32 %v1138_v39, %v4216_v59  ;;  %v1649_v59 = vmul.f32 %v4349_v34, %v1571_v53  ;;  %2618 = vst.msk [vmem:[#allocation4 + $0xa8] sm:$0xff] %vm1867_vm2, %v5822_v1 }
 0x15f   : > { %v1404_v61 = vadd.f32 %v1388_v49, %v1274_v37  ;;  %2619 = vst.msk [vmem:[#allocation4 + $0xb0] sm:$0xff] %vm1867_vm2, %v5822_v1  ;;  %v1650_v49 = vmul.f32 %v4349_v34, %v4354_v21 }
 0x160   : > { %2621 = vst.msk [vmem:[#allocation4 + $0xc0] sm:$0xff] %vm1867_vm2, %v5822_v1 }
 0x161   : > { %v1535_v19 = vadd.f32 %v1519_v24, %v1404_v61  ;;  %1354 = vperm.xlu1 %3527, %v1300_v44   ;;  %2622 = vst.msk [vmem:[#allocation4 + $0xc8] sm:$0xff] %vm1867_vm2, %v5822_v1 }
 0x162   : > { %1735 = vperm.xlu0 %3526, %v4021_v62   ;;  %v4394_v62 = vld [vmem:[%s5825_s3] ss:$0 sm:$0xff]  ;;  %2624 = vst.msk [vmem:[#allocation4 + $0xd8] sm:$0xff] %vm1867_vm2, %v5822_v1 }
 0x163   : > { %v1665_v0 = vadd.f32 %v1649_v59, %v1535_v19  ;;  %v1185_v60 = vpop.permute.xlu1 %1184  ;;  %2625 = vst.msk [vmem:[#allocation4 + $0xe0] sm:$0xff] %vm1867_vm2, %v5822_v1  ;;  %v543_v59 = vld [vmem:[%s3860_s29 + $0xc0] sm:$0xff]  ;;  %v544_v19 = vld [vmem:[%s3860_s29 + $0xc8] sm:$0xff] }
 0x164   : > { %v4388_v47 = vpop.permute.xlu0 %1189  ;;  %629 = vst.msk [vmem:[#allocation2 + $0x111] sm:$0xff] %vm551_vm0, %v540_v63 }
 0x165   : > { %v1795_v12 = vadd.f32 %v1779_v36, %v1665_v0  ;;  %v1706_v29 = vpop.permute.xlu2 %1705  ;;  %1874 = vst.msk [vmem:[#allocation3 + $0x28] sm:$0x3] %vm1870_vm3, %v5822_v1 }
 0x166   : > { %1871 = vst.msk [vmem:[#allocation3 + $0x10] sm:$0x3] %vm1870_vm3, %v5822_v1  ;;  %v1780_v24 = vmul.f32 %v4366_v8, %v1706_v29 }
 0x167   : > { %v1815_v18 = vmul.f32 %v4382_v57, %v1795_v12  ;;  %1877 = vst.msk [vmem:[#allocation3 + $0x40] sm:$0x3] %vm1870_vm3, %v5822_v1 }
 0x168   : > { %1880 = vst.msk [vmem:[#allocation3 + $0x58] sm:$0x3] %vm1870_vm3, %v5822_v1 }
 0x169   : > { %v1835_v48 = vadd.f32 %v4394_v62, %v1815_v18  ;;  %1883 = vst.msk [vmem:[#allocation3 + $0x70] sm:$0x3] %vm1870_vm3, %v5822_v1 }
 0x16a   : > { %1485 = vperm.xlu0 %3526, %v3952_v26   ;;  %v1259_v26 = vmul.f32 %v4305_v40, %v1185_v60  ;;  %1886 = vst.msk [vmem:[#allocation3 + $0x88] sm:$0x3] %vm1870_vm3, %v5822_v1 }
 0x16b   : > { %v1851_v23 = vmax.f32 %v1835_v48, 0.0  ;;  %v1315_v53 = vpop.permute.xlu1 %1314  ;;  %v1301_v27 = vld [vmem:[#allocation2 + $0x10a] sm:$0xff]  ;;  %1889 = vst.msk [vmem:[#allocation3 + $0xa0] sm:$0x3] %vm1870_vm3, %v5822_v1  ;;  %v1302_v0 = vld [vmem:[#allocation2 + $0x112] sm:$0xff] }
 0x16c   : > { %v4414_v58 = vpop.permute.xlu0 %1319  ;;  %v1042_v11 = vld [vmem:[#allocation2 + $0x110] sm:$0xff]  ;;  %1359 = vperm.xlu2 %3528, %v1301_v27   ;;  %v1389_v33 = vmul.f32 %v4328_v50, %v1315_v53  ;;  %1892 = vst.msk [vmem:[#allocation3 + $0xb8] sm:$0x3] %vm1870_vm3, %v5822_v1  ;;  %v1275_v52 = vadd.f32 %v1259_v26, %v1145_v17 }
 0x16d   : > { %1900 = vst.msk [vmem:[#allocation3 + $0x19] sm:$0xff] %vm1867_vm2, %v1851_v23  ;;  %v4419_v46 = vpop.permute.xlu2 %1585  ;;  %1104 = vperm.xlu1 %3527, %v1042_v11   ;;  %v1172_v39 = vld [vmem:[#allocation2 + $0x111] sm:$0xff] }
 0x16e   : > { %1895 = vst.msk [vmem:[#allocation3 + $0xd0] sm:$0x3] %vm1870_vm3, %v5822_v1  ;;  %v1405_v42 = vadd.f32 %v1389_v33, %v1275_v52  ;;  %v547_v33 = vld [vmem:[%s3860_s29 + $0xe0] sm:$0xff]  ;;  %v1918_v52 = vld [vmem:[#allocation3 + $0x8] sm:$0xff] }
 0x16f   : > { %1898 = vst.msk [vmem:[#allocation3 + $0xe8] sm:$0x3] %vm1870_vm3, %v5822_v1 }
 0x170   : > { %2599 = vst.msk [vmem:[#allocation4 + $0x10] sm:$0x3] %vm1870_vm3, %v5822_v1 }
 0x171   : > { %2602 = vst.msk [vmem:[#allocation4 + $0x28] sm:$0x3] %vm1870_vm3, %v5822_v1 }
 0x172   : > { %1490 = vperm.xlu0 %3526, %v1432_v6   ;;  %2605 = vst.msk [vmem:[#allocation4 + $0x40] sm:$0x3] %vm1870_vm3, %v5822_v1  ;;  %v4496_v6 = vld [vmem:[%s5826_s4 + $0x1] ss:$0 sm:$0xff] }
 0x173   : > { %v1446_v3 = vpop.permute.xlu1 %1445  ;;  %2608 = vst.msk [vmem:[#allocation4 + $0x58] sm:$0x3] %vm1870_vm3, %v5822_v1 }
 0x174   : > { %v1520_v51 = vmul.f32 %v4338_v22, %v1446_v3  ;;  %v1195_v55 = vpop.permute.xlu0 %1194  ;;  %1234 = vperm.xlu2 %3528, %v1172_v39   ;;  %2611 = vst.msk [vmem:[#allocation4 + $0x70] sm:$0x3] %vm1870_vm3, %v5822_v1  ;;  %v1968_v3 = vld [vmem:[#allocation3 + $0x9] sm:$0xff]  ;;  %v1967_v39 = vld [vmem:[#allocation3 + $0x1] sm:$0xff] }
 0x175   : > { %v4441_v37 = vpop.permute.xlu2 %1329  ;;  %1740 = vperm.xlu1 %3527, %v4036_v5   ;;  %2614 = vst.msk [vmem:[#allocation4 + $0x88] sm:$0x3] %vm1870_vm3, %v5822_v1  ;;  %v1261_v18 = vmul.f32 %v4305_v40, %v1195_v55  ;;  %v1652_v55 = vmul.f32 %v4349_v34, %v4419_v46  ;;  %v2018_v46 = vld [vmem:[#allocation3 + $0xa] sm:$0xff] }
 0x176   : > { %v1536_v44 = vadd.f32 %v1520_v51, %v1405_v42  ;;  %2617 = vst.msk [vmem:[#allocation4 + $0xa0] sm:$0x3] %vm1870_vm3, %v5822_v1 }
 0x177   : > { %2620 = vst.msk [vmem:[#allocation4 + $0xb8] sm:$0x3] %vm1870_vm3, %v5822_v1 }
 0x178   : > { %v1666_v61 = vadd.f32 %v1650_v49, %v1536_v44  ;;  %2623 = vst.msk [vmem:[#allocation4 + $0xd0] sm:$0x3] %vm1870_vm3, %v5822_v1 }
 0x179   : > { %2626 = vst.msk [vmem:[#allocation4 + $0xe8] sm:$0x3] %vm1870_vm3, %v5822_v1  ;;  %v1260_v1 = vmul.f32 %v4305_v40, %v4388_v47 }
 0x17a   : > { %v1796_v21 = vadd.f32 %v1780_v24, %v1666_v61  ;;  %1620 = vperm.xlu0 %3526, %v3990_v45   ;;  %632 = vst.msk [vmem:[#allocation2 + $0x139] sm:$0xff] %vm551_vm0, %v543_v59  ;;  %v1131_v45 = vmul.f32 %v4197_v31, %v4250_v7  ;;  %v1390_v31 = vmul.f32 %v4328_v50, %v4414_v58  ;;  %v4491_v58 = vld [vmem:[%s5826_s4] ss:$0 sm:$0xff] }
 0x17b   : > { %v1451_v5 = vpop.permute.xlu1 %1450  ;;  %633 = vst.msk [vmem:[#allocation2 + $0x141] sm:$0xff] %vm551_vm0, %v544_v19  ;;  %v1276_v47 = vadd.f32 %v1260_v1, %v4206_v28  ;;  %v1935_v44 = vmul.f32 %v4491_v58, %v1918_v52  ;;  %v1985_v24 = vmul.f32 %v4496_v6, %v1968_v3  ;;  %v548_v1 = vld [vmem:[%s3860_s29 + $0xe8] sm:$0xff] }
 0x17c   : > { %v1816_v36 = vmul.f32 %v4382_v57, %v1796_v21  ;;  %v1325_v60 = vpop.permute.xlu0 %1324  ;;  %1364 = vperm.xlu2 %3528, %v1302_v0   ;;  %v1147_v48 = vadd.f32 %v1131_v45, %v4142_v56  ;;  %636 = vst.msk [vmem:[#allocation2 + $0x169] sm:$0xff] %vm551_vm0, %v547_v33  ;;  %v1563_v21 = vld [vmem:[#allocation2 + $0x129] sm:$0xff]  ;;  %v4511_v0 = vld [vmem:[%s5826_s4 + $0x2] ss:$0 sm:$0xff] }
 0x17d   : > { %v4465_v63 = vpop.permute.xlu2 %1334  ;;  %1615 = vperm.xlu1 %3527, %v3986_v43   ;;  %v1391_v23 = vmul.f32 %v4328_v50, %v1325_v60  ;;  %v1433_v43 = vld [vmem:[#allocation2 + $0x128] sm:$0xff]  ;;  %v1406_v17 = vadd.f32 %v1390_v31, %v1276_v47  ;;  %637 = vst.msk [vmem:[#allocation2 + $0x171] sm:$0xff] %vm551_vm0, %v548_v1  ;;  %v2035_v31 = vmul.f32 %v4511_v0, %v2018_v46 }
 0x17e   : > { %v1836_v12 = vadd.f32 %v4394_v62, %v1816_v36  ;;  %v1277_v14 = vadd.f32 %v1261_v18, %v1147_v48  ;;  %v1984_v36 = vmul.f32 %v4496_v6, %v1967_v39  ;;  %v1392_v1 = vmul.f32 %v4328_v50, %v4441_v37 }
 0x180   : > { %v1852_v29 = vmax.f32 %v1836_v12, 0.0  ;;  %v1407_v11 = vadd.f32 %v1391_v23, %v1277_v14 }
 0x181   : > { %v1043_v56 = vld [vmem:[#allocation2 + $0x138] sm:$0xff] }
 0x182   : > { %1901 = vst.msk [vmem:[#allocation3 + $0x21] sm:$0xff] %vm1867_vm2, %v1852_v29  ;;  %1750 = vperm.xlu0 %3526, %v4040_v10   ;;  %v1521_v10 = vmul.f32 %v4338_v22, %v1451_v5  ;;  %v2017_v29 = vld [vmem:[#allocation3 + $0x2] sm:$0xff]  ;;  %v1303_v23 = vld [vmem:[#allocation2 + $0x13a] sm:$0xff] }
 0x183   : > { %v1581_v53 = vpop.permute.xlu1 %1580 }
 0x184   : > { %v1456_v7 = vpop.permute.xlu0 %1455  ;;  %1495 = vperm.xlu2 %3528, %v1433_v43   ;;  %v1651_v28 = vmul.f32 %v4349_v34, %v1581_v53  ;;  %v1537_v51 = vadd.f32 %v1521_v10, %v1406_v17  ;;  %v2001_v53 = vadd.f32 %v1985_v24, %v1935_v44  ;;  %v4544_v24 = vld [vmem:[%s5826_s4 + $0x4] ss:$0 sm:$0xff] }
 0x185   : > { %v1522_v26 = vmul.f32 %v4338_v22, %v1456_v7  ;;  %v4483_v27 = vpop.permute.xlu2 %1720  ;;  %1745 = vperm.xlu1 %3527, %v4053_v15   ;;  %v1917_v15 = vld [vmem:[#allocation3] sm:$0xff]  ;;  %v2423_v7 = vld [vmem:[%s5795_s7] sm:$0xf] }
 0x186   : > { %v1667_v61 = vadd.f32 %v1651_v28, %v1537_v51  ;;  %v1934_v19 = vmul.f32 %v4491_v58, %v1917_v15  ;;  %3445 = vmatpush.msk.msra.mxu0 %vm2472_vm4, %v2423_v7  ;;  %3482 = vmatpush.msk.msra.mxu2 %vm2472_vm4, %v2423_v7  ;;  %v2051_v33 = vadd.f32 %v2035_v31, %v2001_v53  ;;  %v1173_v15 = vld [vmem:[#allocation2 + $0x139] sm:$0xff]  ;;  %v4572_v53 = vld [vmem:[%s5826_s4 + $0x6] ss:$0 sm:$0xff] }
 0x187   : > { %v1538_v42 = vadd.f32 %v1522_v26, %v1407_v11  ;;  %v2034_v26 = vmul.f32 %v4511_v0, %v2017_v29  ;;  %v2067_v11 = vld [vmem:[#allocation3 + $0x18] sm:$0xff] }
 0x188   : > { %v2000_v14 = vadd.f32 %v1984_v36, %v1934_v19  ;;  %v1304_v19 = vld [vmem:[#allocation2 + $0x142] sm:$0xff] }
 0x189   : > { %v1668_v60 = vadd.f32 %v1652_v55, %v1538_v42  ;;  %v4530_v47 = vld [vmem:[#allocation3 + $0x20] sm:$0xff]  ;;  %v1044_v42 = vld [vmem:[#allocation2 + $0x140] sm:$0xff] }
 0x18a   : > { %1109 = vperm.xlu0 %3526, %v1043_v56   ;;  %v2050_v55 = vadd.f32 %v2034_v26, %v2000_v14  ;;  %v2117_v36 = vld [vmem:[#allocation3 + $0x19] sm:$0xff]  ;;  %v1174_v26 = vld [vmem:[#allocation2 + $0x141] sm:$0xff] }
 0x18b   : > { %v1711_v49 = vpop.permute.xlu1 %1710  ;;  %v4558_v46 = vld [vmem:[#allocation3 + $0x1a] sm:$0xff] }
 0x18c   : > { %v1781_v59 = vmul.f32 %v4366_v8, %v1711_v49  ;;  %v1716_v5 = vpop.permute.xlu0 %1715  ;;  %1755 = vperm.xlu2 %3528, %v4055_v16   ;;  %v4528_v16 = vld [vmem:[%s5826_s4 + $0x3] ss:$0 sm:$0xff]  ;;  %v1434_v14 = vld [vmem:[#allocation2 + $0x150] sm:$0xff] }
 0x18d   : > { %v1782_v12 = vmul.f32 %v4366_v8, %v1716_v5  ;;  %v4514_v45 = vpop.permute.xlu2 %1725  ;;  %1625 = vperm.xlu1 %3527, %v1563_v21   ;;  %v2085_v52 = vmul.f32 %v4528_v16, %v4530_v47  ;;  %v2084_v49 = vmul.f32 %v4528_v16, %v2067_v11  ;;  %v4552_v21 = vld [vmem:[#allocation3 + $0x21] sm:$0xff] }
 0x18e   : > { %v1797_v18 = vadd.f32 %v1781_v59, %v1667_v61  ;;  %v4550_v61 = vld [vmem:[%s5826_s4 + $0x5] ss:$0 sm:$0xff]  ;;  %v549_v59 = vld [vmem:[%s3860_s29 + $0xf0] sm:$0xff] }
 0x18f   : > { %v1798_v48 = vadd.f32 %v1782_v12, %v1668_v60  ;;  %v2101_v60 = vadd.f32 %v2085_v52, %v2051_v33  ;;  %v2100_v29 = vadd.f32 %v2084_v49, %v2050_v55  ;;  %638 = vst.msk [vmem:[#allocation2 + $0x181] sm:$0xff] %vm551_vm0, %v549_v59  ;;  %v4595_v55 = vld [vmem:[%s5826_s4 + $0x8] ss:$0 sm:$0xff]  ;;  %v1936_v59 = vmul.f32 %v4491_v58, %v2067_v11  ;;  %v550_v11 = vld [vmem:[%s3860_s29 + $0xf8] sm:$0xff]  ;;  %s513_s29 = scalar_lea.vmem [#allocation5], %s512_s26 }
 0x190   : > { %v1817_v43 = vmul.f32 %v4382_v57, %v1797_v18  ;;  %v2135_v18 = vmul.f32 %v4544_v24, %v4552_v21  ;;  %639 = vst.msk [vmem:[#allocation2 + $0x189] sm:$0xff] %vm551_vm0, %v550_v11  ;;  %s3382_s20 = sshll.u32 %s513_s29, 4  ;;  %s3383_s20 = int_to_ptr.vmem [resolvable:$true] %s3382_s20 }
 0x191   : > { %v1818_v10 = vmul.f32 %v4382_v57, %v1798_v48  ;;  %v2134_v48 = vmul.f32 %v4544_v24, %v2117_v36 }
 0x192   : > { %v1837_v56 = vadd.f32 %v4394_v62, %v1817_v43  ;;  %1369 = vperm.xlu0 %3526, %v1303_v23   ;;  %v2184_v23 = vmul.f32 %v4550_v61, %v4558_v46  ;;  %v2151_v7 = vadd.f32 %v2135_v18, %v2101_v60  ;;  %v1694_v60 = vld [vmem:[#allocation2 + $0x152] sm:$0xff] }
 0x193   : > { %v1838_v17 = vadd.f32 %v4394_v62, %v1818_v10  ;;  %v1200_v28 = vpop.permute.xlu1 %1199 }
 0x194   : > { %v1853_v3 = vmax.f32 %v1837_v56, 0.0  ;;  %v1262_v39 = vmul.f32 %v4305_v40, %v1200_v28  ;;  %v1205_v51 = vpop.permute.xlu0 %1204  ;;  %1114 = vperm.xlu2 %3528, %v1044_v42   ;;  %v4581_v28 = vld [vmem:[%s5826_s4 + $0x7] ss:$0 sm:$0xff] }
 0x195   : > { %v1854_v44 = vmax.f32 %v1838_v17, 0.0  ;;  %1239 = vperm.xlu1 %3527, %v1173_v15   ;;  %v4556_v5 = vpop.permute.xlu2 %1219  ;;  %v1263_v31 = vmul.f32 %v4305_v40, %v1205_v51  ;;  %v2150_v17 = vadd.f32 %v2134_v48, %v2100_v29 }
 0x196   : > { %1902 = vst.msk [vmem:[#allocation3 + $0x31] sm:$0xff] %vm1867_vm2, %v1853_v3  ;;  %v1278_v12 = vadd.f32 %v1262_v39, %v4279_v25  ;;  %v4574_v25 = vld [vmem:[#allocation3 + $0x22] sm:$0xff] }
 0x197   : > { %1903 = vst.msk [vmem:[#allocation3 + $0x39] sm:$0xff] %vm1867_vm2, %v1854_v44  ;;  %v2185_v42 = vmul.f32 %v4550_v61, %v4574_v25  ;;  %v2200_v39 = vadd.f32 %v2184_v23, %v2150_v17 }
 0x198   : > { %v1408_v37 = vadd.f32 %v1392_v1, %v1278_v12  ;;  %v1783_v1 = vmul.f32 %v4366_v8, %v4483_v27  ;;  %v1986_v27 = vmul.f32 %v4496_v6, %v2117_v36 }
 0x199   : > { %v2201_v29 = vadd.f32 %v2185_v42, %v2151_v7 }
 0x19a   : > { %1374 = vperm.xlu0 %3526, %v1304_v19   ;;  %v1279_v19 = vadd.f32 %v1263_v31, %v4218_v9  ;;  %v1393_v9 = vmul.f32 %v4328_v50, %v4465_v63  ;;  %v4627_v63 = vld [vmem:[%s5827_s5] ss:$0 sm:$0xff] }
 0x19b   : > { %v1461_v43 = vpop.permute.xlu1 %1460 }
 0x19c   : > { %v1523_v10 = vmul.f32 %v4338_v22, %v1461_v43  ;;  %v1591_v56 = vpop.permute.xlu0 %1590  ;;  %1500 = vperm.xlu2 %3528, %v1434_v14  }
 0x19d   : > { %v1653_v33 = vmul.f32 %v4349_v34, %v1591_v56  ;;  %v4584_v52 = vld [vmem:[#allocation3 + $0x30] sm:$0xff]  ;;  %1244 = vperm.xlu1 %3527, %v1174_v26   ;;  %v4614_v31 = vpop.permute.xlu2 %1349 }
 0x19e   : > { %v4586_v3 = vld [vmem:[#allocation3 + $0x31] sm:$0xff]  ;;  %v1539_v15 = vadd.f32 %v1523_v10, %v1408_v37  ;;  %v2235_v51 = vmul.f32 %v4572_v53, %v4584_v52  ;;  %v4599_v44 = vld [vmem:[#allocation3 + $0x39] sm:$0xff] }
 0x19f   : > { %v4597_v49 = vld [vmem:[#allocation3 + $0x38] sm:$0xff]  ;;  %v2285_v43 = vmul.f32 %v4581_v28, %v4586_v3  ;;  %v2286_v7 = vmul.f32 %v4581_v28, %v4599_v44 }
 0x1a0   : > { %v4603_v12 = vld [vmem:[#allocation3 + $0x32] sm:$0xff]  ;;  %v2236_v18 = vmul.f32 %v4572_v53, %v4597_v49  ;;  %v1669_v48 = vadd.f32 %v1653_v33, %v1539_v15  ;;  %v2251_v23 = vadd.f32 %v2235_v51, %v2200_v39  ;;  %v4618_v26 = vld [vmem:[#allocation3 + $0x3a] sm:$0xff]  ;;  %v1409_v33 = vadd.f32 %v1393_v9, %v1279_v19  ;;  %v1435_v39 = vld [vmem:[#allocation2 + $0x158] sm:$0xff] }
 0x1a1   : > { %v2335_v56 = vmul.f32 %v4595_v55, %v4603_v12  ;;  %v1564_v51 = vld [vmem:[#allocation2 + $0x151] sm:$0xff]  ;;  %v2002_v19 = vadd.f32 %v1986_v27, %v1936_v59  ;;  %v1987_v59 = vmul.f32 %v4496_v6, %v4552_v21 }
 0x1a2   : > { %v2252_v14 = vadd.f32 %v2236_v18, %v2201_v29  ;;  %v1799_v37 = vadd.f32 %v1783_v1, %v1669_v48  ;;  %1760 = vperm.xlu0 %3526, %v1694_v60   ;;  %v2301_v10 = vadd.f32 %v2285_v43, %v2251_v23  ;;  %v4634_v18 = vld [vmem:[%s5794_s6] ss:$0 sm:$0xff]  ;;  %v2336_v1 = vmul.f32 %v4595_v55, %v4618_v26 }
 0x1a3   : > { %v1466_v17 = vpop.permute.xlu1 %1465  ;;  %v2036_v23 = vmul.f32 %v4511_v0, %v4558_v46 }
 0x1a4   : > { %v2302_v42 = vadd.f32 %v2286_v7, %v2252_v14  ;;  %v1819_v15 = vmul.f32 %v4382_v57, %v1799_v37  ;;  %v1524_v36 = vmul.f32 %v4338_v22, %v1466_v17  ;;  %v1596_v29 = vpop.permute.xlu0 %1595  ;;  %v2351_v60 = vadd.f32 %v2335_v56, %v2301_v10  ;;  %1505 = vperm.xlu2 %3528, %v1435_v39   ;;  %v1045_v37 = vld [vmem:[#allocation2 + $0x168] sm:$0xff] }
 0x1a5   : > { %v1654_v48 = vmul.f32 %v4349_v34, %v1596_v29  ;;  %v1784_v7 = vmul.f32 %v4366_v8, %v4514_v45  ;;  %1630 = vperm.xlu1 %3527, %v1564_v51   ;;  %v1937_v10 = vmul.f32 %v4491_v58, %v4530_v47  ;;  %v2086_v17 = vmul.f32 %v4528_v16, %v4584_v52  ;;  %v4654_v39 = vpop.permute.xlu2 %1224  ;;  %v1695_v51 = vld [vmem:[#allocation2 + $0x15a] sm:$0xff] }
 0x1a6   : > { %v1839_v43 = vadd.f32 %v4394_v62, %v1819_v15  ;;  %v1540_v11 = vadd.f32 %v1524_v36, %v1409_v33  ;;  %v2371_v9 = vmul.f32 %v4627_v63, %v2351_v60  ;;  %v2352_v14 = vadd.f32 %v2336_v1, %v2302_v42  ;;  %5828 = vst [vmem:[#allocation14_spill] sm:$0xff] %v4654_v39  ;;  %v1565_v36 = vld [vmem:[#allocation2 + $0x159] sm:$0xff]  ;;  %v1566_v39 = vld [vmem:[#allocation2 + $0x181] sm:$0xff] }
 0x1a7   : > { %v2052_v15 = vadd.f32 %v2036_v23, %v2002_v19  ;;  %v2003_v1 = vadd.f32 %v1987_v59, %v1937_v10  ;;  %v2136_v23 = vmul.f32 %v4544_v24, %v4586_v3 }
 0x1a8   : > { %v1855_v27 = vmax.f32 %v1839_v43, 0.0  ;;  %v1670_v46 = vadd.f32 %v1654_v48, %v1540_v11  ;;  %v2391_v56 = vadd.f32 %v4634_v18, %v2371_v9  ;;  %v2372_v42 = vmul.f32 %v4627_v63, %v2352_v14  ;;  %v1305_v9 = vld [vmem:[#allocation2 + $0x16a] sm:$0xff] }
 0x1a9   : > { %v2102_v60 = vadd.f32 %v2086_v17, %v2052_v15  ;;  %v2037_v48 = vmul.f32 %v4511_v0, %v4574_v25  ;;  %v2087_v11 = vmul.f32 %v4528_v16, %v4597_v49  ;;  %v1175_v15 = vld [vmem:[#allocation2 + $0x169] sm:$0xff] }
 0x1aa   : > { %1904 = vst.msk [vmem:[#allocation3 + $0x49] sm:$0xff] %vm1867_vm2, %v1855_v27  ;;  %v1800_v33 = vadd.f32 %v1784_v7, %v1670_v46  ;;  %1119 = vperm.xlu0 %3526, %v1045_v37   ;;  %v2407_v45 = vmax.f32 %v2391_v56, 0.0  ;;  %v2392_v19 = vadd.f32 %v4634_v18, %v2372_v42  ;;  %v2186_v27 = vmul.f32 %v4550_v61, %v4603_v12  ;;  %v1046_v42 = vld [vmem:[#allocation2 + $0x170] sm:$0xff] }
 0x1ab   : > { %v1210_v47 = vpop.permute.xlu1 %1209  ;;  %v2152_v7 = vadd.f32 %v2136_v23, %v2102_v60  ;;  %v2053_v37 = vadd.f32 %v2037_v48, %v2003_v1 }
 0x1ac   : > { %v1820_v21 = vmul.f32 %v4382_v57, %v1800_v33  ;;  %3446 = vmatmul.msk.f32.vlgmr.msra.gmra.mxu0 %vm1867_vm2, %v2407_v45  ;;  %v4658_v29 = vpop.permute.xlu0 %1214  ;;  %1765 = vperm.xlu2 %3528, %v1695_v51   ;;  %v2408_v25 = vmax.f32 %v2392_v19, 0.0  ;;  %v1306_v19 = vld [vmem:[#allocation2 + $0x172] sm:$0xff] }
 0x1ad   : > { %1635 = vperm.xlu1 %3527, %v1565_v36   ;;  %v2103_v56 = vadd.f32 %v2087_v11, %v2053_v37  ;;  %v2202_v51 = vadd.f32 %v2186_v27, %v2152_v7  ;;  %v2137_v36 = vmul.f32 %v4544_v24, %v4599_v44  ;;  %v1731_v60 = vpop.permute.xlu2 %1730  ;;  %v2187_v11 = vmul.f32 %v4550_v61, %v4618_v26 }
 0x1ae   : > { %v1840_v43 = vadd.f32 %v4394_v62, %v1820_v21 }
 0x1b0   : > { %v1856_v14 = vmax.f32 %v1840_v43, 0.0  ;;  %v2153_v43 = vadd.f32 %v2137_v36, %v2103_v56  ;;  %v1264_v56 = vmul.f32 %v4305_v40, %v1210_v47 }
 0x1b1   : > { %v4668_v10 = vld [vmem:[#allocation3 + $0x48] sm:$0xff] }
 0x1b2   : > { %v4670_v59 = vld [vmem:[#allocation3 + $0x49] sm:$0xff]  ;;  %1905 = vst.msk [vmem:[#allocation3 + $0x51] sm:$0xff] %vm1867_vm2, %v1856_v14  ;;  %1379 = vperm.xlu0 %3526, %v1305_v9   ;;  %v2237_v46 = vmul.f32 %v4572_v53, %v4668_v10  ;;  %v1940_v33 = vmul.f32 %v4491_v58, %v4668_v10  ;;  %v2203_v27 = vadd.f32 %v2187_v11, %v2153_v43 }
 0x1b3   : > { %v1340_v17 = vpop.permute.xlu1 %1339  ;;  %v1990_v45 = vmul.f32 %v4496_v6, %v4670_v59  ;;  %v2287_v23 = vmul.f32 %v4581_v28, %v4670_v59 }
 0x1b4   : > { %3447 = vmatmul.msk.f32.gmra.mxu0 %vm1867_vm2, %v2408_v25  ;;  %v4682_v21 = vpop.permute.xlu0 %1344  ;;  %v2253_v48 = vadd.f32 %v2237_v46, %v2202_v51  ;;  %1124 = vperm.xlu2 %3528, %v1046_v42   ;;  %v1436_v42 = vld [vmem:[#allocation2 + $0x180] sm:$0xff] }
 0x1b5   : > { %v2006_v1 = vadd.f32 %v1990_v45, %v1940_v33  ;;  %1249 = vperm.xlu1 %3527, %v1175_v15   ;;  %v1176_v15 = vld [vmem:[#allocation2 + $0x171] sm:$0xff] }
 0x1b6   : > { %v2303_v37 = vadd.f32 %v2287_v23, %v2253_v48 }
 0x1b9   : > { %v4690_v9 = vld [vmem:[#allocation3 + $0x4a] sm:$0xff]  ;;  %v4701_v45 = vld [vmem:[#allocation3 + $0x52] sm:$0xff] }
 0x1ba   : > { %v4692_v14 = vld [vmem:[#allocation3 + $0x50] sm:$0xff]  ;;  %1384 = vperm.xlu0 %3526, %v1306_v19   ;;  %v2337_v25 = vmul.f32 %v4595_v55, %v4690_v9  ;;  %v1394_v19 = vmul.f32 %v4328_v50, %v1340_v17  ;;  %v2040_v43 = vmul.f32 %v4511_v0, %v4690_v9  ;;  %v2338_v20 = vmul.f32 %v4595_v55, %v4701_v45  ;;  %v4716_v17 = vpop.permute.xlu2 %1610 }
 0x1bb   : > { %v4694_v7 = vld [vmem:[#allocation3 + $0x51] sm:$0xff]  ;;  %v2238_v46 = vmul.f32 %v4572_v53, %v4692_v14  ;;  %v1471_v33 = vpop.permute.xlu1 %1470  ;;  %v1941_v23 = vmul.f32 %v4491_v58, %v4692_v14  ;;  %v2041_v35 = vmul.f32 %v4511_v0, %v4701_v45 }
 0x1bc   : > { %v1476_v51 = vpop.permute.xlu0 %1475  ;;  %v2353_v36 = vadd.f32 %v2337_v25, %v2303_v37  ;;  %v2288_v48 = vmul.f32 %v4581_v28, %v4694_v7  ;;  %v1991_v37 = vmul.f32 %v4496_v6, %v4694_v7  ;;  %v1280_v25 = vadd.f32 %v1264_v56, %v4284_v30  ;;  %1510 = vperm.xlu2 %3528, %v1436_v42  }
 0x1bd   : > { %v2254_v54 = vadd.f32 %v2238_v46, %v2203_v27  ;;  %1254 = vperm.xlu1 %3527, %v1176_v15   ;;  %v1525_v27 = vmul.f32 %v4338_v22, %v1471_v33  ;;  %v1696_v46 = vld [vmem:[#allocation2 + $0x182] sm:$0xff]  ;;  %v4719_v2 = vadd.f32 %v2040_v43, %v2006_v1  ;;  %v1785_v43 = vmul.f32 %v4366_v8, %v1731_v60 }
 0x1be   : > { %v2373_v47 = vmul.f32 %v4627_v63, %v2353_v36  ;;  %v1410_v32 = vadd.f32 %v1394_v19, %v1280_v25  ;;  %v1437_v33 = vld [vmem:[#allocation2 + $0x188] sm:$0xff] }
 0x1bf   : > { %v2304_v11 = vadd.f32 %v2288_v48, %v2254_v54  ;;  %v2007_v48 = vadd.f32 %v1991_v37, %v1941_v23  ;;  %v1265_v37 = vmul.f32 %v4305_v40, %v4658_v29  ;;  %v1697_v25 = vld [vmem:[#allocation2 + $0x18a] sm:$0xff]  ;;  %v1938_v29 = vmul.f32 %v4491_v58, %v4584_v52 }
 0x1c0   : > { %v2393_v36 = vadd.f32 %v4634_v18, %v2373_v47  ;;  %v1541_v15 = vadd.f32 %v1525_v27, %v1410_v32  ;;  %v1567_v27 = vld [vmem:[#allocation2 + $0x189] sm:$0xff]  ;;  %v1939_v52 = vmul.f32 %v4491_v58, %v4597_v49  ;;  %v2089_v49 = vmul.f32 %v4528_v16, %v4692_v14 }
 0x1c1   : > { %v2354_v54 = vadd.f32 %v2338_v20, %v2304_v11  ;;  %v4725_v56 = vadd.f32 %v2041_v35, %v2007_v48  ;;  %v1526_v48 = vmul.f32 %v4338_v22, %v1476_v51  ;;  %v2038_v51 = vmul.f32 %v4511_v0, %v4603_v12 }
 0x1c2   : > { %1770 = vperm.xlu0 %3526, %v1696_v46   ;;  %v2409_v13 = vmax.f32 %v2393_v36, 0.0 }
 0x1c3   : > { %v2374_v30 = vmul.f32 %v4627_v63, %v2354_v54  ;;  %v1601_v42 = vpop.permute.xlu1 %1600  ;;  %v1281_v54 = vadd.f32 %v1265_v37, %v4311_v4 }
 0x1c4   : > { %v1655_v1 = vmul.f32 %v4349_v34, %v1601_v42  ;;  %3448 = vmatmul.msk.f32.gmra.mxu0 %vm1867_vm2, %v2409_v13  ;;  %v4729_v20 = vpop.permute.xlu0 %1480  ;;  %1515 = vperm.xlu2 %3528, %v1437_v33  }
 0x1c5   : > { %v2394_v19 = vadd.f32 %v4634_v18, %v2374_v30  ;;  %1640 = vperm.xlu1 %3527, %v1566_v39   ;;  %v1395_v39 = vmul.f32 %v4328_v50, %v4682_v21  ;;  %v1988_v30 = vmul.f32 %v4496_v6, %v4586_v3  ;;  %v1989_v3 = vmul.f32 %v4496_v6, %v4599_v44 }
 0x1c6   : > { %v1671_v23 = vadd.f32 %v1655_v1, %v1541_v15  ;;  %v4733_v35 = vpop.permute.xlu2 %1359 }
 0x1c7   : > { %v2410_v11 = vmax.f32 %v2394_v19, 0.0  ;;  %v1411_v42 = vadd.f32 %v1395_v39, %v1281_v54  ;;  %v2004_v4 = vadd.f32 %v1988_v30, %v1938_v29  ;;  %v2188_v54 = vmul.f32 %v4550_v61, %v4690_v9 }
 0x1c8   : > { %v1801_v47 = vadd.f32 %v1785_v43, %v1671_v23 }
 0x1c9   : > { %v1542_v33 = vadd.f32 %v1526_v48, %v1411_v42  ;;  %v2054_v37 = vadd.f32 %v2038_v51, %v2004_v4  ;;  %v1396_v42 = vmul.f32 %v4328_v50, %v4614_v31  ;;  %v2189_v31 = vmul.f32 %v4550_v61, %v4701_v45 }
 0x1ca   : > { %v1821_v32 = vmul.f32 %v4382_v57, %v1801_v47  ;;  %v1657_v45 = vmul.f32 %v4349_v34, %v4716_v17 }
 0x1cb   : > { %v1606_v46 = vpop.permute.xlu1 %1605 }
 0x1cc   : > { %v1841_v13 = vadd.f32 %v4394_v62, %v1821_v32  ;;  %3449 = vmatmul.msk.f32.gmra.mxu0 %vm1867_vm2, %v2410_v11  ;;  %v4740_v60 = vpop.permute.xlu0 %1229  ;;  %1775 = vperm.xlu2 %3528, %v1697_v25   ;;  %v1656_v15 = vmul.f32 %v4349_v34, %v1606_v46  ;;  %v2088_v32 = vmul.f32 %v4528_v16, %v4668_v10 }
 0x1cd   : > { %1645 = vperm.xlu1 %3527, %v1567_v27   ;;  %v2039_v27 = vmul.f32 %v4511_v0, %v4618_v26  ;;  %v1266_v26 = vmul.f32 %v4305_v40, %v4556_v5  ;;  %v1527_v5 = vmul.f32 %v4338_v22, %v4729_v20 }
 0x1ce   : > { %v1857_v36 = vmax.f32 %v1841_v13, 0.0  ;;  %v4752_v21 = vpop.permute.xlu2 %1234  ;;  %v1672_v43 = vadd.f32 %v1656_v15, %v1542_v33  ;;  %v2005_v13 = vadd.f32 %v1989_v3, %v1939_v52  ;;  %v2104_v25 = vadd.f32 %v2088_v32, %v2054_v37 }
 0x1cf   : > { %v1282_v9 = vadd.f32 %v1266_v26, %v4232_v38 }
 0x1d0   : > { %1906 = vst.msk [vmem:[#allocation3 + $0x61] sm:$0xff] %vm1867_vm2, %v1857_v36  ;;  %v2138_v36 = vmul.f32 %v4544_v24, %v4670_v59  ;;  %v2055_v48 = vadd.f32 %v2039_v27, %v2005_v13  ;;  %v2139_v59 = vmul.f32 %v4544_v24, %v4694_v7 }
 0x1d2   : > { %v2154_v14 = vadd.f32 %v2138_v36, %v2104_v25  ;;  %v2105_v30 = vadd.f32 %v2089_v49, %v2055_v48  ;;  %v1268_v25 = vmul.f32 %v4305_v40, %v4740_v60 }
 0x1d3   : > { %v4761_v19 = vpop.permute.xlu1 %1354 }
 0x1d4   : > { %v1736_v1 = vpop.permute.xlu0 %1735  ;;  %v2204_v33 = vadd.f32 %v2188_v54, %v2154_v14  ;;  %v2155_v51 = vadd.f32 %v2139_v59, %v2105_v30 }
 0x1d5   : > { %v1786_v23 = vmul.f32 %v4366_v8, %v1736_v1 }
 0x1d6   : > { %v4771_v44 = vpop.permute.xlu2 %1364  ;;  %v2205_v37 = vadd.f32 %v2189_v31, %v2155_v51 }
 0x1d7   : > { %v1802_v47 = vadd.f32 %v1786_v23, %v1672_v43  ;;  %v4775_v46 = vld [vmem:[#allocation3 + $0x60] sm:$0xff]  ;;  %v1412_v43 = vadd.f32 %v1396_v42, %v1282_v9  ;;  %v1284_v42 = vadd.f32 %v1268_v25, %v4357_v41  ;;  %v1398_v9 = vmul.f32 %v4328_v50, %v4733_v35  ;;  %v5830_v25 = vld [vmem:[#allocation13_spill] sm:$0xff] }
 0x1d8   : > { %v2239_v29 = vmul.f32 %v4572_v53, %v4775_v46  ;;  %v4793_v1 = vld [vmem:[#allocation3 + $0x61] sm:$0xff]  ;;  %v1397_v35 = vmul.f32 %v4328_v50, %v4761_v19 }
 0x1d9   : > { %v1822_v11 = vmul.f32 %v4382_v57, %v1802_v47  ;;  %v2289_v52 = vmul.f32 %v4581_v28, %v4793_v1  ;;  %v1543_v3 = vadd.f32 %v1527_v5, %v1412_v43  ;;  %v5829_v43 = vld [vmem:[#allocation14_spill] sm:$0xff] }
 0x1da   : > { %v2255_v4 = vadd.f32 %v2239_v29, %v2204_v33 }
 0x1db   : > { %v1842_v12 = vadd.f32 %v4394_v62, %v1822_v11  ;;  %v1673_v54 = vadd.f32 %v1657_v45, %v1543_v3  ;;  %v1414_v3 = vadd.f32 %v1398_v9, %v1284_v42  ;;  %v4869_v9 = vld [vmem:[%s5816_s1 + $0x5] ss:$0 sm:$0xff] }
 0x1dc   : > { %v4773_v39 = vpop.permute.xlu0 %1485  ;;  %v2305_v32 = vadd.f32 %v2289_v52, %v2255_v4  ;;  %v1267_v52 = vmul.f32 %v4305_v40, %v5829_v43 }
 0x1dd   : > { %v1858_v10 = vmax.f32 %v1842_v12, 0.0 }
 0x1de   : > { %v4799_v47 = vpop.permute.xlu2 %1495 }
 0x1df   : > { %1907 = vst.msk [vmem:[#allocation3 + $0x69] sm:$0xff] %vm1867_vm2, %v1858_v10  ;;  %v1105_v15 = vpop.permute.xlu1 %1104 }
 0x1e4   : > { %v1491_v23 = vpop.permute.xlu0 %1490 }
 0x1e5   : > { %v1529_v5 = vmul.f32 %v4338_v22, %v1491_v23  ;;  %v4842_v23 = vld [vmem:[%s5816_s1 + $0x3] ss:$0 sm:$0xff] }
 0x1e6   : > { %v4801_v7 = vld [vmem:[#allocation3 + $0x62] sm:$0xff]  ;;  %v4813_v12 = vld [vmem:[#allocation3 + $0x6a] sm:$0xff]  ;;  %v4832_v31 = vpop.permute.xlu2 %1755  ;;  %v1139_v40 = vmul.f32 %v4842_v23, %v1105_v15 }
 0x1e7   : > { %v4803_v38 = vld [vmem:[#allocation3 + $0x68] sm:$0xff]  ;;  %v2339_v11 = vmul.f32 %v4595_v55, %v4801_v7  ;;  %v1741_v27 = vpop.permute.xlu1 %1740  ;;  %v2340_v17 = vmul.f32 %v4595_v55, %v4813_v12 }
 0x1e8   : > { %v4805_v20 = vld [vmem:[#allocation3 + $0x69] sm:$0xff]  ;;  %v2240_v13 = vmul.f32 %v4572_v53, %v4803_v38  ;;  %v1787_v48 = vmul.f32 %v4366_v8, %v1741_v27  ;;  %v1283_v27 = vadd.f32 %v1267_v52, %v5830_v25 }
 0x1e9   : > { %v2355_v49 = vadd.f32 %v2339_v11, %v2305_v32  ;;  %v2290_v36 = vmul.f32 %v4581_v28, %v4805_v20 }
 0x1ea   : > { %v2256_v10 = vadd.f32 %v2240_v13, %v2205_v37  ;;  %v1803_v29 = vadd.f32 %v1787_v48, %v1673_v54  ;;  %v1545_v13 = vadd.f32 %v1529_v5, %v1414_v3  ;;  %v5831_v54 = vld [vmem:[#allocation10_spill] sm:$0xff] }
 0x1eb   : > { %v2375_v26 = vmul.f32 %v4627_v63, %v2355_v49  ;;  %v1528_v49 = vmul.f32 %v4338_v22, %v4773_v39  ;;  %v1155_v48 = vadd.f32 %v1139_v40, %v5831_v54  ;;  %v4882_v3 = vld [vmem:[%s5816_s1 + $0x6] ss:$0 sm:$0xff] }
 0x1ec   : > { %v2306_v14 = vadd.f32 %v2290_v36, %v2256_v10  ;;  %v1621_v30 = vpop.permute.xlu0 %1620  ;;  %v1823_v59 = vmul.f32 %v4382_v57, %v1803_v29  ;;  %v1413_v36 = vadd.f32 %v1397_v35, %v1283_v27 }
 0x1ed   : > { %v2395_v60 = vadd.f32 %v4634_v18, %v2375_v26  ;;  %v1659_v11 = vmul.f32 %v4349_v34, %v1621_v30 }
 0x1ee   : > { %v2356_v33 = vadd.f32 %v2340_v17, %v2306_v14  ;;  %v1843_v41 = vadd.f32 %v4394_v62, %v1823_v59  ;;  %v4856_v17 = vld [vmem:[%s5816_s1 + $0x4] ss:$0 sm:$0xff]  ;;  %v1544_v39 = vadd.f32 %v1528_v49, %v1413_v36  ;;  %v1993_v49 = vmul.f32 %v4496_v6, %v4805_v20 }
 0x1ef   : > { %v2411_v4 = vmax.f32 %v2395_v60, 0.0  ;;  %v1616_v32 = vpop.permute.xlu1 %1615  ;;  %v1675_v50 = vadd.f32 %v1659_v11, %v1545_v13  ;;  %v1269_v22 = vmul.f32 %v4856_v17, %v4752_v21  ;;  %v4862_v60 = vpop.permute.xlu2 %1114  ;;  %v1399_v21 = vmul.f32 %v4869_v9, %v4771_v44 }
 0x1f0   : > { %v2376_v51 = vmul.f32 %v4627_v63, %v2356_v33  ;;  %v1859_v37 = vmax.f32 %v1843_v41, 0.0  ;;  %v1658_v15 = vmul.f32 %v4349_v34, %v1616_v32  ;;  %v1530_v44 = vmul.f32 %v4882_v3, %v4799_v47 }
 0x1f1   : > { %3450 = vmatmul.msk.f32.gmra.mxu0 %vm1867_vm2, %v2411_v4  ;;  %v1285_v42 = vadd.f32 %v1269_v22, %v1155_v48  ;;  %v1992_v13 = vmul.f32 %v4496_v6, %v4793_v1  ;;  %v2190_v47 = vmul.f32 %v4550_v61, %v4801_v7  ;;  %v2141_v6 = vmul.f32 %v4544_v24, %v4805_v20 }
 0x1f2   : > { %v2396_v45 = vadd.f32 %v4634_v18, %v2376_v51  ;;  %1908 = vst.msk [vmem:[#allocation3 + $0x79] sm:$0xff] %vm1867_vm2, %v1859_v37  ;;  %v1674_v34 = vadd.f32 %v1658_v15, %v1544_v39  ;;  %v2090_v51 = vmul.f32 %v4528_v16, %v4775_v46  ;;  %v1942_v37 = vmul.f32 %v4491_v58, %v4775_v46  ;;  %v4932_v39 = vld [vmem:[%s5824_s2] ss:$0 sm:$0xff]  ;;  %s3372_s2 = scalar_lea.sflag [#allocation6], %s512_s26 }
 0x1f3   : > { %v1415_v41 = vadd.f32 %v1399_v21, %v1285_v42  ;;  %v2042_v46 = vmul.f32 %v4511_v0, %v4801_v7  ;;  %v2191_v42 = vmul.f32 %v4550_v61, %v4813_v12 }
 0x1f4   : > { %v1751_v10 = vpop.permute.xlu0 %1750  ;;  %v2412_v14 = vmax.f32 %v2396_v45, 0.0  ;;  %v2106_v11 = vadd.f32 %v2090_v51, %v4719_v2 }
 0x1f5   : > { %v1789_v19 = vmul.f32 %v4366_v8, %v1751_v10  ;;  %v1546_v25 = vadd.f32 %v1530_v44, %v1415_v41  ;;  %v4914_v10 = vld [vmem:[%s5816_s1 + $0x8] ss:$0 sm:$0xff] }
 0x1f7   : > { %v1805_v26 = vadd.f32 %v1789_v19, %v1675_v50  ;;  %v1746_v29 = vpop.permute.xlu1 %1745  ;;  %v1790_v50 = vmul.f32 %v4914_v10, %v4832_v31  ;;  %v4918_v19 = vpop.permute.xlu2 %1500 }
 0x1f8   : > { %v1788_v33 = vmul.f32 %v4366_v8, %v1746_v29  ;;  %v2091_v8 = vmul.f32 %v4528_v16, %v4803_v38 }
 0x1f9   : > { %v1825_v30 = vmul.f32 %v4382_v57, %v1805_v26  ;;  %3451 = vmatmul.msk.f32.gmra.mxu0 %vm1867_vm2, %v2412_v14  ;;  %v4890_v40 = vld [vmem:[#allocation3 + $0x78] sm:$0xff] }
 0x1fa   : > { %v1804_v5 = vadd.f32 %v1788_v33, %v1674_v34  ;;  %v2107_v27 = vadd.f32 %v2091_v8, %v4725_v56  ;;  %v2092_v54 = vmul.f32 %v4528_v16, %v4890_v40  ;;  %v4927_v31 = vld [vmem:[#allocation3 + $0x79] sm:$0xff]  ;;  %v2043_v33 = vmul.f32 %v4511_v0, %v4813_v12 }
 0x1fb   : > { %v1845_v59 = vadd.f32 %v4394_v62, %v1825_v30  ;;  %v2142_v44 = vmul.f32 %v4544_v24, %v4927_v31 }
 0x1fc   : > { %v1110_v4 = vpop.permute.xlu0 %1109  ;;  %v1824_v52 = vmul.f32 %v4382_v57, %v1804_v5  ;;  %v2140_v57 = vmul.f32 %v4544_v24, %v4793_v1  ;;  %v1943_v1 = vmul.f32 %v4491_v58, %v4803_v38  ;;  %v2241_v58 = vmul.f32 %v4572_v53, %v4890_v40 }
 0x1fd   : > { %v1861_v43 = vmax.f32 %v1845_v59, 0.0  ;;  %v2008_v38 = vadd.f32 %v1992_v13, %v1942_v37  ;;  %v2157_v26 = vadd.f32 %v2141_v6, %v2107_v27  ;;  %v4942_v59 = vld [vmem:[%s5825_s3] ss:$0 sm:$0xff]  ;;  %v2291_v5 = vmul.f32 %v4581_v28, %v4927_v31 }
 0x1fe   : > { %v1844_v32 = vadd.f32 %v4394_v62, %v1824_v52  ;;  %v4899_v62 = vld [vmem:[%s5816_s1 + $0x7] ss:$0 sm:$0xff]  ;;  %v2156_v36 = vadd.f32 %v2140_v57, %v2106_v11  ;;  %v2009_v22 = vadd.f32 %v1993_v49, %v1943_v1  ;;  %s3384_s1 = sshll.u32 %s3380_s19, 4  ;;  %s3385_s1 = int_to_ptr.hbm [resolvable:$true] %s3384_s1 }
 0x1ff   : > { %1910 = vst.msk [vmem:[#allocation3 + $0x91] sm:$0xff] %vm1867_vm2, %v1861_v43  ;;  %v1626_v35 = vpop.permute.xlu1 %1625  ;;  %v2058_v14 = vadd.f32 %v2042_v46, %v2008_v38  ;;  %v1140_v43 = vmul.f32 %v4842_v23, %v1110_v4  ;;  %v2207_v41 = vadd.f32 %v2191_v42, %v2157_v26  ;;  %v4969_v27 = vpop.permute.xlu2 %1505  ;;  %s3607_s3 = sshra.s32 %s3385_s1, 4  ;;  %s3608_s3 = int_to_ptr.hbm [resolvable:$true] %s3607_s3 }
 0x200   : > { %v1860_v45 = vmax.f32 %v1844_v32, 0.0  ;;  %v1660_v2 = vmul.f32 %v4899_v62, %v1626_v35  ;;  %v2206_v15 = vadd.f32 %v2190_v47, %v2156_v36  ;;  %v2059_v32 = vadd.f32 %v2043_v33, %v2009_v22  ;;  %p3614_p0 = scmp.lt.s32.totalorder %s3608_s3, %s5804_s16 }
 0x201   : > { %v2108_v34 = vadd.f32 %v2092_v54, %v2058_v14 }
 0x202   : > { %1909 = vst.msk [vmem:[#allocation3 + $0x81] sm:$0xff] %vm1867_vm2, %v1860_v45  ;;  %v1676_v56 = vadd.f32 %v1660_v2, %v1546_v25  ;;  %v2257_v30 = vadd.f32 %v2241_v58, %v2206_v15 }
 0x203   : > { %v2158_v25 = vadd.f32 %v2142_v44, %v2108_v34  ;;  %v1141_v34 = vmul.f32 %v4842_v23, %v4862_v60 }
 0x204   : > { %v1370_v7 = vpop.permute.xlu0 %1369  ;;  %v1806_v48 = vadd.f32 %v1790_v50, %v1676_v56  ;;  %v2307_v57 = vadd.f32 %v2291_v5, %v2257_v30  ;;  %v5832_v56 = vld [vmem:[#allocation8_spill] sm:$0xff] }
 0x205   : > { %v1156_v36 = vadd.f32 %v1140_v43, %v5832_v56  ;;  %v1400_v26 = vmul.f32 %v4869_v9, %v1370_v7 }
 0x206   : > { %v1826_v29 = vmul.f32 %v4932_v39, %v1806_v48  ;;  %v4947_v51 = vld [vmem:[#allocation3 + $0x90] sm:$0xff] }
 0x207   : > { %v1240_v20 = vpop.permute.xlu1 %1239  ;;  %v2243_v47 = vmul.f32 %v4572_v53, %v4947_v51  ;;  %v4981_v22 = vld [vmem:[#allocation3 + $0x91] sm:$0xff] }
 0x208   : > { %v1846_v21 = vadd.f32 %v4942_v59, %v1826_v29  ;;  %v1270_v13 = vmul.f32 %v4856_v17, %v1240_v20  ;;  %v2293_v7 = vmul.f32 %v4581_v28, %v4981_v22 }
 0x209   : > { %v4950_v52 = vld [vmem:[#allocation3 + $0x7a] sm:$0xff]  ;;  %v4963_v45 = vld [vmem:[#allocation3 + $0x82] sm:$0xff] }
 0x20a   : > { %v4952_v8 = vld [vmem:[#allocation3 + $0x80] sm:$0xff]  ;;  %v1862_v11 = vmax.f32 %v1846_v21, 0.0  ;;  %v2341_v37 = vmul.f32 %v4595_v55, %v4950_v52  ;;  %v2192_v2 = vmul.f32 %v4550_v61, %v4950_v52  ;;  %v2342_v54 = vmul.f32 %v4595_v55, %v4963_v45 }
 0x20b   : > { %v4954_v12 = vld [vmem:[#allocation3 + $0x81] sm:$0xff]  ;;  %v2242_v4 = vmul.f32 %v4572_v53, %v4952_v8  ;;  %v2093_v50 = vmul.f32 %v4528_v16, %v4952_v8  ;;  %v1286_v15 = vadd.f32 %v1270_v13, %v1156_v36 }
 0x20c   : > { %v1375_v35 = vpop.permute.xlu0 %1374  ;;  %1911 = vst.msk [vmem:[#allocation3 + $0x99] sm:$0xff] %vm1867_vm2, %v1862_v11  ;;  %v2357_v46 = vadd.f32 %v2341_v37, %v2307_v57  ;;  %v2292_v49 = vmul.f32 %v4581_v28, %v4954_v12  ;;  %v2208_v58 = vadd.f32 %v2192_v2, %v2158_v25  ;;  %v2143_v29 = vmul.f32 %v4544_v24, %v4954_v12  ;;  %v5833_v2 = vld [vmem:[#allocation11_spill] sm:$0xff] }
 0x20d   : > { %v2258_v1 = vadd.f32 %v2242_v4, %v2207_v41  ;;  %v2109_v48 = vadd.f32 %v2093_v50, %v2059_v32  ;;  %v2193_v41 = vmul.f32 %v4550_v61, %v4963_v45  ;;  %v1416_v44 = vadd.f32 %v1400_v26, %v1286_v15 }
 0x20e   : > { %v2377_v6 = vmul.f32 %v4627_v63, %v2357_v46  ;;  %v2259_v42 = vadd.f32 %v2243_v47, %v2208_v58  ;;  %v1157_v47 = vadd.f32 %v1141_v34, %v5833_v2  ;;  %v1531_v46 = vmul.f32 %v4882_v3, %v4918_v19 }
 0x20f   : > { %v2308_v38 = vadd.f32 %v2292_v49, %v2258_v1  ;;  %v1245_v14 = vpop.permute.xlu1 %1244  ;;  %v2159_v33 = vadd.f32 %v2143_v29, %v2109_v48  ;;  %v1766_v49 = vpop.permute.xlu2 %1765 }
 0x210   : > { %v2397_v30 = vadd.f32 %v4634_v18, %v2377_v6  ;;  %v1271_v32 = vmul.f32 %v4856_v17, %v1245_v14  ;;  %v2309_v60 = vadd.f32 %v2293_v7, %v2259_v42  ;;  %v1547_v48 = vadd.f32 %v1531_v46, %v1416_v44  ;;  %v5025_v7 = vld [vmem:[%s5826_s4] ss:$0 sm:$0xff]  ;;  %v5032_v44 = vld [vmem:[%s5826_s4 + $0x1] ss:$0 sm:$0xff] }
 0x211   : > { %v2358_v20 = vadd.f32 %v2342_v54, %v2308_v38  ;;  %v2209_v13 = vadd.f32 %v2193_v41, %v2159_v33  ;;  %v1401_v38 = vmul.f32 %v4869_v9, %v1375_v35  ;;  %v1944_v41 = vmul.f32 %v5025_v7, %v4890_v40 }
 0x212   : > { %v2413_v21 = vmax.f32 %v2397_v30, 0.0  ;;  %v1287_v6 = vadd.f32 %v1271_v32, %v1157_v47  ;;  %v1994_v32 = vmul.f32 %v5032_v44, %v4927_v31  ;;  %v1792_v31 = vmul.f32 %v4914_v10, %v1766_v49  ;;  %v5056_v49 = vld [vmem:[%s5796_s8] ss:$0 sm:$0xff] }
 0x213   : > { %v2378_v43 = vmul.f32 %v4627_v63, %v2358_v20  ;;  %v4994_v11 = vld [vmem:[#allocation3 + $0x92] sm:$0xff]  ;;  %v5008_v1 = vld [vmem:[#allocation3 + $0x9a] sm:$0xff] }
 0x214   : > { %v1761_v5 = vpop.permute.xlu0 %1760  ;;  %v4996_v57 = vld [vmem:[#allocation3 + $0x98] sm:$0xff]  ;;  %3452 = vmatmul.msk.f32.gmra.mxu0 %vm1867_vm2, %v2413_v21  ;;  %v2343_v4 = vmul.f32 %v4595_v55, %v4994_v11  ;;  %v2344_v29 = vmul.f32 %v4595_v55, %v5008_v1  ;;  %v1417_v21 = vadd.f32 %v1401_v38, %v1287_v6  ;;  %v1945_v6 = vmul.f32 %v5025_v7, %v4952_v8 }
 0x215   : > { %v4998_v37 = vld [vmem:[#allocation3 + $0x99] sm:$0xff]  ;;  %v2244_v25 = vmul.f32 %v4572_v53, %v4996_v57  ;;  %v2398_v50 = vadd.f32 %v4634_v18, %v2378_v43  ;;  %v1791_v15 = vmul.f32 %v4914_v10, %v1761_v5 }
 0x216   : > { %v2359_v56 = vadd.f32 %v2343_v4, %v2309_v60  ;;  %v2294_v58 = vmul.f32 %v4581_v28, %v4998_v37  ;;  %v1532_v60 = vmul.f32 %v4882_v3, %v4969_v27 }
 0x217   : > { %v2260_v36 = vadd.f32 %v2244_v25, %v2209_v13  ;;  %v1631_v54 = vpop.permute.xlu1 %1630  ;;  %v2414_v20 = vmax.f32 %v2398_v50, 0.0  ;;  %v2044_v25 = vmul.f32 %v4511_v0, %v4950_v52  ;;  %v1125_v40 = vpop.permute.xlu2 %1124  ;;  %v1995_v0 = vmul.f32 %v5032_v44, %v4954_v12  ;;  %v5063_v12 = vld [vmem:[%s5797_s9] ss:$0 sm:$0xff] }
 0x218   : > { %v1661_v26 = vmul.f32 %v4899_v62, %v1631_v54  ;;  %v2379_v19 = vmul.f32 %v4627_v63, %v2359_v56  ;;  %v1548_v47 = vadd.f32 %v1532_v60, %v1417_v21  ;;  %v2010_v56 = vadd.f32 %v1994_v32, %v1944_v41 }
 0x219   : > { %v2310_v14 = vadd.f32 %v2294_v58, %v2260_v36  ;;  %v2011_v8 = vadd.f32 %v1995_v0, %v1945_v6  ;;  %v2144_v41 = vmul.f32 %v4544_v24, %v4981_v22 }
 0x21a   : > { %v1677_v30 = vadd.f32 %v1661_v26, %v1547_v48  ;;  %v2399_v42 = vadd.f32 %v4634_v18, %v2379_v19  ;;  %v2060_v54 = vadd.f32 %v2044_v25, %v2010_v56  ;;  %v2094_v48 = vmul.f32 %v4528_v16, %v4947_v51 }
 0x21b   : > { %v2360_v33 = vadd.f32 %v2344_v29, %v2310_v14  ;;  %v5069_v29 = vld [vmem:[%s5826_s4 + $0x2] ss:$0 sm:$0xff] }
 0x21c   : > { %v1120_v34 = vpop.permute.xlu0 %1119  ;;  %v1807_v35 = vadd.f32 %v1791_v15, %v1677_v30  ;;  %3453 = vmatmul.msk.f32.gmra.mxu0 %vm1867_vm2, %v2414_v20  ;;  %v2415_v43 = vmax.f32 %v2399_v42, 0.0  ;;  %v2110_v16 = vadd.f32 %v2094_v48, %v2060_v54  ;;  %v2045_v30 = vmul.f32 %v5069_v29, %v4963_v45  ;;  %v5076_v20 = vld [vmem:[%s5826_s4 + $0x3] ss:$0 sm:$0xff] }
 0x21d   : > { %v2380_v5 = vmul.f32 %v4627_v63, %v2360_v33  ;;  %v2095_v42 = vmul.f32 %v5076_v20, %v4996_v57  ;;  %v1142_v33 = vmul.f32 %v4842_v23, %v1120_v34  ;;  %v2194_v45 = vmul.f32 %v4550_v61, %v4994_v11  ;;  %v5097_v61 = vld [vmem:[%s5826_s4 + $0x4] ss:$0 sm:$0xff] }
 0x21e   : > { %v1827_v4 = vmul.f32 %v4932_v39, %v1807_v35  ;;  %3454 = vmatmul.msk.f32.vlgmr.msra.gmra.mxu2 %vm1867_vm2, %v2415_v43  ;;  %v2061_v32 = vadd.f32 %v2045_v30, %v2011_v8  ;;  %v2160_v34 = vadd.f32 %v2144_v41, %v2110_v16 }
 0x21f   : > { %v1636_v13 = vpop.permute.xlu1 %1635  ;;  %v2400_v50 = vadd.f32 %v4634_v18, %v2380_v5  ;;  %v1511_v35 = vpop.permute.xlu2 %1510 }
 0x220   : > { %v1847_v2 = vadd.f32 %v4942_v59, %v1827_v4  ;;  %v1662_v46 = vmul.f32 %v4899_v62, %v1636_v13 }
 0x221   : > { %v2416_v38 = vmax.f32 %v2400_v50, 0.0  ;;  %v2210_v50 = vadd.f32 %v2194_v45, %v2160_v34  ;;  %v1533_v45 = vmul.f32 %v4882_v3, %v1511_v35 }
 0x222   : > { %v1863_v27 = vmax.f32 %v1847_v2, 0.0  ;;  %v1678_v36 = vadd.f32 %v1662_v46, %v1548_v47  ;;  %v2111_v2 = vadd.f32 %v2095_v42, %v2061_v32  ;;  %v5834_v47 = vld [vmem:[#allocation12_spill] sm:$0xff] }
 0x223   : > { %v1158_v46 = vadd.f32 %v1142_v33, %v5834_v47  ;;  %v2645_v47 = vld [vmem:[#allocation4] sm:$0xff] }
 0x224   : > { %v1380_v58 = vpop.permute.xlu0 %1379  ;;  %1912 = vst.msk [vmem:[#allocation3 + $0xa9] sm:$0xff] %vm1867_vm2, %v1863_v27  ;;  %v1808_v52 = vadd.f32 %v1792_v31, %v1678_v36  ;;  %v2145_v31 = vmul.f32 %v5097_v61, %v4998_v37 }
 0x225   : > { %v1402_v27 = vmul.f32 %v4869_v9, %v1380_v58 }
 0x226   : > { %v1828_v15 = vmul.f32 %v4932_v39, %v1808_v52  ;;  %3455 = vmatmul.msk.f32.gmra.mxu2 %vm1867_vm2, %v2416_v38  ;;  %v2161_v52 = vadd.f32 %v2145_v31, %v2111_v2  ;;  %v1143_v38 = vmul.f32 %v4842_v23, %v1125_v40  ;;  %v5150_v2 = vld [vmem:[%s5826_s4 + $0x7] ss:$0 sm:$0xff] }
 0x227   : > { %v1250_v26 = vpop.permute.xlu1 %1249 }
 0x228   : > { %v1848_v19 = vadd.f32 %v4942_v59, %v1828_v15  ;;  %v1272_v60 = vmul.f32 %v4856_v17, %v1250_v26  ;;  %v5112_v15 = vld [vmem:[%s5826_s4 + $0x5] ss:$0 sm:$0xff] }
 0x229   : > { %v2493_v14 = vpop.f32.mrf.mxu0  ;;  %v2195_v58 = vmul.f32 %v5112_v15, %v5008_v1 }
 0x22a   : > { %v2545_v21 = vmul.f32 %v5056_v49, %v2493_v14  ;;  %v1864_v43 = vmax.f32 %v1848_v19, 0.0  ;;  %v1288_v56 = vadd.f32 %v1272_v60, %v1158_v46  ;;  %v2695_v46 = vld [vmem:[#allocation4 + $0x1] sm:$0xff] }
 0x22b   : > { %v5088_v13 = vld [vmem:[#allocation3 + $0xa8] sm:$0xff]  ;;  %v2211_v33 = vadd.f32 %v2195_v58, %v2161_v52  ;;  %v5162_v52 = vld [vmem:[%s5826_s4 + $0x8] ss:$0 sm:$0xff] }
 0x22c   : > { %v1385_v5 = vpop.permute.xlu0 %1384  ;;  %v2565_v4 = vadd.f32 %v5063_v12, %v2545_v21  ;;  %1913 = vst.msk [vmem:[#allocation3 + $0xb1] sm:$0xff] %vm1867_vm2, %v1864_v43  ;;  %v2245_v25 = vmul.f32 %v4572_v53, %v5088_v13  ;;  %v5103_v53 = vld [vmem:[#allocation3 + $0xa9] sm:$0xff]  ;;  %v1418_v8 = vadd.f32 %v1402_v27, %v1288_v56  ;;  %v5129_v21 = vld [vmem:[%s5826_s4 + $0x6] ss:$0 sm:$0xff]  ;;  %s3609_s4 = scalar_lea.hbm %s3608_s3, 1 }
 0x22d   : > { %v2295_v48 = vmul.f32 %v4581_v28, %v5103_v53  ;;  %v1516_v28 = vpop.permute.xlu2 %1515  ;;  %v5835_v43 = vld [vmem:[#allocation9_spill] sm:$0xff]  ;;  %p3610_p11 = scmp.ne.s32.totalorder %s3608_s3, %s3609_s4  ;;  %p3615_p1 = scmp.lt.s32.totalorder %s3613_s18, %s3609_s4 }
 0x22e   : > { %v2581_v24 = vmax.f32 %v2565_v4, 0.0  ;;  %v2261_v0 = vadd.f32 %v2245_v25, %v2210_v50  ;;  %v1159_v41 = vadd.f32 %v1143_v38, %v5835_v43  ;;  %v5145_v4 = vld [vmem:[%s5798_s10 + $0x1] ss:$0 sm:$0xff]  ;;  %v1403_v50 = vmul.f32 %v4869_v9, %v1385_v5 }
 0x22f   : > { %v1255_v36 = vpop.permute.xlu1 %1254  ;;  %v1549_v56 = vadd.f32 %v1533_v45, %v1418_v8  ;;  %v2712_v5 = vmul.f32 %v5145_v4, %v2695_v46  ;;  %v1947_v43 = vmul.f32 %v5025_v7, %v4996_v57  ;;  %v2696_v45 = vld [vmem:[#allocation4 + $0x9] sm:$0xff]  ;;  %p3611_p12 = pnand %p3610_p11, %p3783_p5  ;;  %p3616_p2 = por %p3615_p1, %p3614_p0 }
 0x230   : > { %2628 = vst.msk [vmem:[#allocation4 + $0x19] sm:$0xff] %vm1867_vm2, %v2581_v24  ;;  %v1273_v26 = vmul.f32 %v4856_v17, %v1255_v36  ;;  %v2311_v30 = vadd.f32 %v2295_v48, %v2261_v0 }
 0x231   : > { %v2496_v6 = vpop.f32.mrf.mxu0  ;;  %p3612_p13 = pneg %p3611_p12 }
 0x232   : > { %v2546_v54 = vmul.f32 %v5056_v49, %v2496_v6  ;;  %v1289_v24 = vadd.f32 %v1273_v26, %v1159_v41  ;;  %v2745_v26 = vld [vmem:[#allocation4 + $0x2] sm:$0xff] }
 0x233   : > { %v5118_v14 = vld [vmem:[#allocation3 + $0xaa] sm:$0xff]  ;;  %v5135_v60 = vld [vmem:[#allocation3 + $0xb2] sm:$0xff]  ;;  %p3617_p3 = pnand %p3616_p2, %p3612_p13 }
 0x234   : > { %v2566_v19 = vadd.f32 %v5063_v12, %v2546_v54  ;;  %v5120_v23 = vld [vmem:[#allocation3 + $0xb0] sm:$0xff]  ;;  %v1771_v16 = vpop.permute.xlu0 %1770  ;;  %v2345_v42 = vmul.f32 %v4595_v55, %v5118_v14  ;;  %v2346_v38 = vmul.f32 %v5162_v52, %v5135_v60  ;;  %v2646_v41 = vld [vmem:[#allocation4 + $0x8] sm:$0xff] }
 0x235   : > { %v5122_v40 = vld [vmem:[#allocation3 + $0xb1] sm:$0xff]  ;;  %v2246_v17 = vmul.f32 %v5129_v21, %v5120_v23  ;;  %v5140_v55 = vld [vmem:[%s5798_s10] ss:$0 sm:$0xff]  ;;  %v1793_v27 = vmul.f32 %v4914_v10, %v1771_v16  ;;  %v1946_v16 = vmul.f32 %v5025_v7, %v4947_v51 }
 0x236   : > { %v2582_v32 = vmax.f32 %v2566_v19, 0.0  ;;  %v2361_v34 = vadd.f32 %v2345_v42, %v2311_v30  ;;  %v2296_v35 = vmul.f32 %v5150_v2, %v5122_v40  ;;  %v2662_v9 = vmul.f32 %v5140_v55, %v2645_v47  ;;  %v5171_v54 = vld [vmem:[%s5798_s10 + $0x2] ss:$0 sm:$0xff] }
 0x237   : > { %v2262_v25 = vadd.f32 %v2246_v17, %v2211_v33  ;;  %v1641_v31 = vpop.permute.xlu1 %1640  ;;  %v1419_v19 = vadd.f32 %v1403_v50, %v1289_v24  ;;  %v1996_v30 = vmul.f32 %v5032_v44, %v4981_v22  ;;  %v2762_v51 = vmul.f32 %v5171_v54, %v2745_v26 }
 0x238   : > { %2629 = vst.msk [vmem:[#allocation4 + $0x21] sm:$0xff] %vm1867_vm2, %v2582_v32  ;;  %v1663_v36 = vmul.f32 %v4899_v62, %v1641_v31  ;;  %v2381_v6 = vmul.f32 %v4627_v63, %v2361_v34  ;;  %v1997_v32 = vmul.f32 %v5032_v44, %v4998_v37  ;;  %v2728_v34 = vadd.f32 %v2712_v5, %v2662_v9  ;;  %v5199_v31 = vld [vmem:[%s5794_s6] ss:$0 sm:$0xff]  ;;  %v5212_v9 = vld [vmem:[#allocation4 + $0x18] sm:$0xff] }
 0x239   : > { %v2312_v0 = vadd.f32 %v2296_v35, %v2262_v25  ;;  %v1776_v25 = vpop.permute.xlu2 %1775  ;;  %v2012_v46 = vadd.f32 %v1996_v30, %v1946_v16  ;;  %v2713_v37 = vmul.f32 %v5145_v4, %v2696_v45  ;;  %v2096_v26 = vmul.f32 %v5076_v20, %v5088_v13 }
 0x23a   : > { %v1679_v48 = vadd.f32 %v1663_v36, %v1549_v56  ;;  %v2401_v58 = vadd.f32 %v4634_v18, %v2381_v6  ;;  %v1534_v18 = vmul.f32 %v4882_v3, %v1516_v28  ;;  %v2663_v3 = vmul.f32 %v5140_v55, %v2646_v41  ;;  %v2746_v36 = vld [vmem:[#allocation4 + $0xa] sm:$0xff] }
 0x23b   : > { %v2362_v8 = vadd.f32 %v2346_v38, %v2312_v0  ;;  %v2013_v6 = vadd.f32 %v1997_v32, %v1947_v43  ;;  %v2047_v0 = vmul.f32 %v5069_v29, %v5008_v1  ;;  %v2778_v38 = vadd.f32 %v2762_v51, %v2728_v34  ;;  %v5227_v43 = vld [vmem:[%s5798_s10 + $0x4] ss:$0 sm:$0xff]  ;;  %v5239_v32 = vld [vmem:[%s5798_s10 + $0x5] ss:$0 sm:$0xff] }
 0x23c   : > { %v1809_v42 = vadd.f32 %v1793_v27, %v1679_v48  ;;  %v2417_v33 = vmax.f32 %v2401_v58, 0.0  ;;  %v1550_v35 = vadd.f32 %v1534_v18, %v1419_v19  ;;  %v5205_v27 = vld [vmem:[%s5798_s10 + $0x3] ss:$0 sm:$0xff]  ;;  %v1794_v5 = vmul.f32 %v4914_v10, %v1776_v25  ;;  %v5234_v18 = vld [vmem:[#allocation4 + $0x19] sm:$0xff] }
 0x23d   : > { %v2382_v17 = vmul.f32 %v4627_v63, %v2362_v8  ;;  %v3151_v63 = vld [vmem:[%s5801_s13] sm:$0xf]  ;;  %v2097_v19 = vmul.f32 %v5076_v20, %v5120_v23  ;;  %v2763_v16 = vmul.f32 %v5171_v54, %v2746_v36  ;;  %v2812_v10 = vmul.f32 %v5205_v27, %v5212_v9  ;;  %v5267_v36 = vld [vmem:[%s5798_s10 + $0x6] ss:$0 sm:$0xff] }
 0x23e   : > { %v1829_v22 = vmul.f32 %v4932_v39, %v1809_v42  ;;  %3456 = vmatmul.msk.f32.gmra.mxu2 %vm1867_vm2, %v2417_v33  ;;  %3462 = vmatpush.msk.msra.mxu1 %vm2472_vm4, %v3151_v63  ;;  %v2146_v45 = vmul.f32 %v5097_v61, %v5103_v53  ;;  %v1948_v34 = vmul.f32 %v5025_v7, %v5088_v13 }
 0x23f   : > { %v1646_v57 = vpop.permute.xlu1 %1645  ;;  %v2402_v56 = vadd.f32 %v5199_v31, %v2382_v17  ;;  %3483 = vmatpush.msk.msra.mxu3 %vm2472_vm4, %v3151_v63  ;;  %v2063_v17 = vadd.f32 %v2047_v0, %v2013_v6  ;;  %v5243_v51 = vld [vmem:[#allocation4 + $0x20] sm:$0xff]  ;;  %v2862_v13 = vmul.f32 %v5227_v43, %v5234_v18  ;;  %v2147_v0 = vmul.f32 %v5097_v61, %v5122_v40 }
 0x240   : > { %v1849_v28 = vadd.f32 %v4942_v59, %v1829_v22  ;;  %v1664_v24 = vmul.f32 %v4899_v62, %v1646_v57  ;;  %v2046_v62 = vmul.f32 %v5069_v29, %v4994_v11  ;;  %v2729_v11 = vadd.f32 %v2713_v37, %v2663_v3  ;;  %v5247_v63 = vld [vmem:[#allocation4 + $0x1a] sm:$0xff] }
 0x241   : > { %v2499_v47 = vpop.f32.mrf.mxu0  ;;  %v2418_v42 = vmax.f32 %v2402_v56, 0.0  ;;  %v2196_v22 = vmul.f32 %v5112_v15, %v5118_v14  ;;  %v1998_v57 = vmul.f32 %v5032_v44, %v5103_v53  ;;  %v2113_v3 = vadd.f32 %v2097_v19, %v2063_v17  ;;  %v2232_v17 = vld [vmem:[#allocation3 + $0xd8] sm:$0xff] }
 0x242   : > { %v2547_v50 = vmul.f32 %v5056_v49, %v2499_v47  ;;  %v1865_v48 = vmax.f32 %v1849_v28, 0.0  ;;  %v1680_v58 = vadd.f32 %v1664_v24, %v1550_v35  ;;  %v2062_v33 = vadd.f32 %v2046_v62, %v2012_v46 }
 0x243   : > { %v2779_v35 = vadd.f32 %v2763_v16, %v2729_v11  ;;  %v2828_v37 = vadd.f32 %v2812_v10, %v2778_v38  ;;  %v2048_v28 = vmul.f32 %v5069_v29, %v5118_v14  ;;  %v2813_v24 = vmul.f32 %v5205_v27, %v5243_v51 }
 0x244   : > { %v2567_v8 = vadd.f32 %v5063_v12, %v2547_v50  ;;  %1914 = vst.msk [vmem:[#allocation3 + $0xc1] sm:$0xff] %vm1867_vm2, %v1865_v48  ;;  %v1810_v1 = vadd.f32 %v1794_v5, %v1680_v58  ;;  %v2112_v25 = vadd.f32 %v2096_v26, %v2062_v33  ;;  %v1949_v50 = vmul.f32 %v5025_v7, %v5120_v23  ;;  %v5276_v58 = vld [vmem:[#allocation4 + $0x21] sm:$0xff] }
 0x245   : > { %v1999_v14 = vmul.f32 %v5032_v44, %v5122_v40  ;;  %v2014_v7 = vadd.f32 %v1998_v57, %v1948_v34  ;;  %v2878_v5 = vadd.f32 %v2862_v13, %v2828_v37  ;;  %v2163_v26 = vadd.f32 %v2147_v0, %v2113_v3  ;;  %v5288_v33 = vld [vmem:[%s5798_s10 + $0x7] ss:$0 sm:$0xff] }
 0x246   : > { %v2583_v30 = vmax.f32 %v2567_v8, 0.0  ;;  %v1830_v41 = vmul.f32 %v4932_v39, %v1810_v1  ;;  %3457 = vmatmul.msk.f32.gmra.mxu2 %vm1867_vm2, %v2418_v42  ;;  %v2162_v62 = vadd.f32 %v2146_v45, %v2112_v25  ;;  %v2829_v11 = vadd.f32 %v2813_v24, %v2779_v35  ;;  %v5298_v57 = vld [vmem:[#allocation4 + $0x22] sm:$0xff] }
 0x247   : > { %v2015_v42 = vadd.f32 %v1999_v14, %v1949_v50  ;;  %v2049_v35 = vmul.f32 %v5069_v29, %v5135_v60  ;;  %v2249_v50 = vmul.f32 %v5129_v21, %v2232_v17 }
 0x248   : > { %2630 = vst.msk [vmem:[#allocation4 + $0x31] sm:$0xff] %vm1867_vm2, %v2583_v30  ;;  %v1850_v47 = vadd.f32 %v4942_v59, %v1830_v41  ;;  %v2912_v59 = vmul.f32 %v5239_v32, %v5247_v63  ;;  %v2212_v8 = vadd.f32 %v2196_v22, %v2162_v62  ;;  %v2064_v30 = vadd.f32 %v2048_v28, %v2014_v7  ;;  %v2282_v22 = vld [vmem:[#allocation3 + $0xd9] sm:$0xff]  ;;  %v5308_v28 = vld [vmem:[%s5798_s10 + $0x8] ss:$0 sm:$0xff] }
 0x249   : > { %v2502_v39 = vpop.f32.mrf.mxu0  ;;  %v2863_v41 = vmul.f32 %v5227_v43, %v5276_v58  ;;  %v2299_v62 = vmul.f32 %v5150_v2, %v2282_v22  ;;  %v3586_v22 = vld [vmem:[%s5827_s5] ss:$0 sm:$0xff] }
 0x24a   : > { %v2548_v46 = vmul.f32 %v5056_v49, %v2502_v39  ;;  %v1866_v53 = vmax.f32 %v1850_v47, 0.0  ;;  %v2928_v16 = vadd.f32 %v2912_v59, %v2878_v5  ;;  %v2197_v39 = vmul.f32 %v5112_v15, %v5135_v60 }
 0x24b   : > { %v2230_v6 = vld [vmem:[#allocation3 + $0xc0] sm:$0xff]  ;;  %v2879_v3 = vadd.f32 %v2863_v41, %v2829_v11 }
 0x24c   : > { %v2568_v56 = vadd.f32 %v5063_v12, %v2548_v46  ;;  %1915 = vst.msk [vmem:[#allocation3 + $0xc9] sm:$0xff] %vm1867_vm2, %v1866_v53  ;;  %v2247_v38 = vmul.f32 %v5129_v21, %v2230_v6  ;;  %v2098_v48 = vmul.f32 %v5076_v20, %v2230_v6  ;;  %v2280_v40 = vld [vmem:[#allocation3 + $0xc1] sm:$0xff]  ;;  %v2213_v13 = vadd.f32 %v2197_v39, %v2163_v26 }
 0x24d   : > { %v2297_v47 = vmul.f32 %v5150_v2, %v2280_v40  ;;  %v2148_v24 = vmul.f32 %v5097_v61, %v2280_v40  ;;  %v2065_v53 = vadd.f32 %v2049_v35, %v2015_v42  ;;  %v2913_v6 = vmul.f32 %v5239_v32, %v5298_v57  ;;  %v2332_v41 = vld [vmem:[#allocation3 + $0xda] sm:$0xff] }
 0x24e   : > { %v2584_v23 = vmax.f32 %v2568_v56, 0.0  ;;  %v2263_v10 = vadd.f32 %v2247_v38, %v2212_v8  ;;  %v2114_v25 = vadd.f32 %v2098_v48, %v2064_v30 }
 0x24f   : > { %v5278_v19 = vld [vmem:[#allocation4 + $0x30] sm:$0xff]  ;;  %v2929_v11 = vadd.f32 %v2913_v6, %v2879_v3  ;;  %v5345_v3 = vld [vmem:[%s5800_s12] ss:$0 sm:$0xff] }
 0x250   : > { %v5280_v44 = vld [vmem:[#allocation4 + $0x31] sm:$0xff]  ;;  %2631 = vst.msk [vmem:[#allocation4 + $0x39] sm:$0xff] %vm1867_vm2, %v2584_v23  ;;  %v2963_v1 = vmul.f32 %v5267_v36, %v5278_v19  ;;  %v2666_v45 = vmul.f32 %v5140_v55, %v5278_v19  ;;  %v2313_v56 = vadd.f32 %v2297_v47, %v2263_v10  ;;  %v2164_v38 = vadd.f32 %v2148_v24, %v2114_v25  ;;  %v5331_v10 = vld [vmem:[%s5799_s11] ss:$0 sm:$0xff] }
 0x251   : > { %v2716_v34 = vmul.f32 %v5145_v4, %v5280_v44  ;;  %v3013_v14 = vmul.f32 %v5288_v33, %v5280_v44 }
 0x252   : > { %v2979_v46 = vadd.f32 %v2963_v1, %v2928_v16 }
 0x253   : > { %v5303_v37 = vadd.f32 %v2716_v34, %v2666_v45  ;;  %v2330_v59 = vld [vmem:[#allocation3 + $0xc2] sm:$0xff]  ;;  %v2331_v23 = vld [vmem:[#allocation3 + $0xca] sm:$0xff] }
 0x254   : > { %v2231_v29 = vld [vmem:[#allocation3 + $0xc8] sm:$0xff]  ;;  %v2347_v0 = vmul.f32 %v5162_v52, %v2330_v59  ;;  %v2198_v5 = vmul.f32 %v5112_v15, %v2330_v59  ;;  %v3029_v8 = vadd.f32 %v3013_v14, %v2979_v46  ;;  %v2348_v34 = vmul.f32 %v5162_v52, %v2331_v23 }
 0x255   : > { %v2281_v60 = vld [vmem:[#allocation3 + $0xc9] sm:$0xff]  ;;  %v2248_v7 = vmul.f32 %v5129_v21, %v2231_v29  ;;  %v2099_v16 = vmul.f32 %v5076_v20, %v2231_v29 }
 0x256   : > { %v2298_v48 = vmul.f32 %v5150_v2, %v2281_v60  ;;  %v2363_v1 = vadd.f32 %v2347_v0, %v2313_v56  ;;  %v2214_v17 = vadd.f32 %v2198_v5, %v2164_v38  ;;  %v2149_v25 = vmul.f32 %v5097_v61, %v2281_v60  ;;  %v2233_v56 = vld [vmem:[#allocation3 + $0xe0] sm:$0xff] }
 0x257   : > { %v5321_v26 = vld [vmem:[#allocation4 + $0x32] sm:$0xff]  ;;  %v2264_v30 = vadd.f32 %v2248_v7, %v2213_v13  ;;  %v2115_v20 = vadd.f32 %v2099_v16, %v2065_v53  ;;  %v5347_v24 = vld [vmem:[#allocation4 + $0x3a] sm:$0xff]  ;;  %v2349_v53 = vmul.f32 %v5162_v52, %v2332_v41  ;;  %v2199_v0 = vmul.f32 %v5112_v15, %v2331_v23 }
 0x258   : > { %v5323_v40 = vld [vmem:[#allocation4 + $0x38] sm:$0xff]  ;;  %v3063_v42 = vmul.f32 %v5308_v28, %v5321_v26  ;;  %v2383_v35 = vmul.f32 %v3586_v22, %v2363_v1  ;;  %v2265_v13 = vadd.f32 %v2249_v50, %v2214_v17  ;;  %v3064_v50 = vmul.f32 %v5308_v28, %v5347_v24 }
 0x259   : > { %v5333_v45 = vld [vmem:[#allocation4 + $0x39] sm:$0xff]  ;;  %v2964_v39 = vmul.f32 %v5267_v36, %v5323_v40  ;;  %v2314_v47 = vadd.f32 %v2298_v48, %v2264_v30  ;;  %v2165_v29 = vadd.f32 %v2149_v25, %v2115_v20  ;;  %v2250_v5 = vmul.f32 %v5129_v21, %v2233_v56  ;;  %v2283_v1 = vld [vmem:[#allocation3 + $0xe1] sm:$0xff] }
 0x25a   : > { %v3079_v46 = vadd.f32 %v3063_v42, %v3029_v8  ;;  %v3014_v61 = vmul.f32 %v5288_v33, %v5333_v45  ;;  %v2403_v60 = vadd.f32 %v5199_v31, %v2383_v35  ;;  %v2315_v7 = vadd.f32 %v2299_v62, %v2265_v13 }
 0x25b   : > { %v2980_v59 = vadd.f32 %v2964_v39, %v2929_v11  ;;  %v2364_v14 = vadd.f32 %v2348_v34, %v2314_v47  ;;  %v2215_v16 = vadd.f32 %v2199_v0, %v2165_v29  ;;  %v2766_v15 = vmul.f32 %v5171_v54, %v5321_v26  ;;  %v2333_v39 = vld [vmem:[#allocation3 + $0xe2] sm:$0xff] }
 0x25c   : > { %v3099_v6 = vmul.f32 %v5331_v10, %v3079_v46  ;;  %v2419_v48 = vmax.f32 %v2403_v60, 0.0  ;;  %v2365_v62 = vadd.f32 %v2349_v53, %v2315_v7  ;;  %v2300_v17 = vmul.f32 %v5150_v2, %v2283_v1 }
 0x25d   : > { %v3030_v38 = vadd.f32 %v3014_v61, %v2980_v59  ;;  %v2384_v8 = vmul.f32 %v3586_v22, %v2364_v14  ;;  %v2667_v21 = vmul.f32 %v5140_v55, %v5323_v40  ;;  %v2266_v34 = vadd.f32 %v2250_v5, %v2215_v16 }
 0x25e   : > { %v3119_v11 = vadd.f32 %v5345_v3, %v3099_v6  ;;  %3458 = vmatmul.msk.f32.gmra.mxu2 %vm1867_vm2, %v2419_v48  ;;  %v5369_v20 = vadd.f32 %v2766_v15, %v5303_v37  ;;  %v2717_v25 = vmul.f32 %v5145_v4, %v5333_v45  ;;  %v2767_v2 = vmul.f32 %v5171_v54, %v5347_v24 }
 0x25f   : > { %v3080_v30 = vadd.f32 %v3064_v50, %v3030_v38  ;;  %v2404_v41 = vadd.f32 %v5199_v31, %v2384_v8  ;;  %v2350_v46 = vmul.f32 %v5162_v52, %v2333_v39  ;;  %v2385_v56 = vmul.f32 %v3586_v22, %v2365_v62 }
 0x260   : > { %v3135_v42 = vmax.f32 %v3119_v11, 0.0  ;;  %v2733_v47 = vadd.f32 %v2717_v25, %v2667_v21  ;;  %v2316_v53 = vadd.f32 %v2300_v17, %v2266_v34  ;;  %v2664_v7 = vmul.f32 %v5140_v55, %v5212_v9 }
 0x261   : > { %v3100_v23 = vmul.f32 %v5331_v10, %v3080_v30  ;;  %v2420_v13 = vmax.f32 %v2404_v41, 0.0  ;;  %v2405_v61 = vadd.f32 %v5199_v31, %v2385_v56  ;;  %v2714_v38 = vmul.f32 %v5145_v4, %v5234_v18 }
 0x262   : > { %3463 = vmatmul.msk.f32.vlgmr.msra.gmra.mxu1 %vm1867_vm2, %v3135_v42  ;;  %v5377_v59 = vadd.f32 %v2767_v2, %v2733_v47  ;;  %v2366_v29 = vadd.f32 %v2350_v46, %v2316_v53  ;;  %v2764_v48 = vmul.f32 %v5171_v54, %v5247_v63  ;;  %v2715_v8 = vmul.f32 %v5145_v4, %v5276_v58 }
 0x263   : > { %v3120_v35 = vadd.f32 %v5345_v3, %v3100_v23  ;;  %v2421_v60 = vmax.f32 %v2405_v61, 0.0  ;;  %v2730_v11 = vadd.f32 %v2714_v38, %v2664_v7  ;;  %v2814_v9 = vmul.f32 %v5205_v27, %v5278_v19 }
 0x264   : > { %v2386_v6 = vmul.f32 %v3586_v22, %v2366_v29  ;;  %v2665_v22 = vmul.f32 %v5140_v55, %v5243_v51  ;;  %v2765_v58 = vmul.f32 %v5171_v54, %v5298_v57  ;;  %v2815_v42 = vmul.f32 %v5205_v27, %v5323_v40 }
 0x265   : > { %v3136_v37 = vmax.f32 %v3120_v35, 0.0  ;;  %v2780_v1 = vadd.f32 %v2764_v48, %v2730_v11  ;;  %v2864_v19 = vmul.f32 %v5227_v43, %v5280_v44  ;;  %v2914_v62 = vmul.f32 %v5239_v32, %v5321_v26 }
 0x266   : > { %3459 = vmatmul.msk.f32.gmra.mxu2 %vm1867_vm2, %v2420_v13  ;;  %v2406_v50 = vadd.f32 %v5199_v31, %v2386_v6  ;;  %v2731_v30 = vadd.f32 %v2715_v8, %v2665_v22  ;;  %v2865_v57 = vmul.f32 %v5227_v43, %v5333_v45  ;;  %v2915_v26 = vmul.f32 %v5239_v32, %v5347_v24 }
 0x267   : > { %v2830_v51 = vadd.f32 %v2814_v9, %v2780_v1 }
 0x268   : > { %v2422_v16 = vmax.f32 %v2406_v50, 0.0  ;;  %v2781_v23 = vadd.f32 %v2765_v58, %v2731_v30 }
 0x269   : > { %v2880_v21 = vadd.f32 %v2864_v19, %v2830_v51 }
 0x26a   : > { %3464 = vmatmul.msk.f32.gmra.mxu1 %vm1867_vm2, %v3136_v37  ;;  %v2831_v34 = vadd.f32 %v2815_v42, %v2781_v23 }
 0x26b   : > { %v2930_v39 = vadd.f32 %v2914_v62, %v2880_v21 }
 0x26c   : > { %v2881_v35 = vadd.f32 %v2865_v57, %v2831_v34 }
 0x26e   : > { %v2505_v14 = vpop.f32.mrf.mxu0  ;;  %3460 = vmatmul.msk.f32.gmra.mxu2 %vm1867_vm2, %v2421_v60  ;;  %v2931_v53 = vadd.f32 %v2915_v26, %v2881_v35 }
 0x26f   : > { %v2549_v0 = vmul.f32 %v5056_v49, %v2505_v14 }
 0x271   : > { %v2569_v52 = vadd.f32 %v5063_v12, %v2549_v0 }
 0x273   : > { %v2585_v5 = vmax.f32 %v2569_v52, 0.0 }
 0x275   : > { %2632 = vst.msk [vmem:[#allocation4 + $0x49] sm:$0xff] %vm1867_vm2, %v2585_v5 }
 0x276   : > { %v2508_v18 = vpop.f32.mrf.mxu0  ;;  %3461 = vmatmul.msk.f32.gmra.mxu2 %vm1867_vm2, %v2422_v16 }
 0x277   : > { %v2550_v31 = vmul.f32 %v5056_v49, %v2508_v18 }
 0x279   : > { %v2570_v63 = vadd.f32 %v5063_v12, %v2550_v31 }
 0x27b   : > { %v2586_v15 = vmax.f32 %v2570_v63, 0.0 }
 0x27c   : > { %v2948_v17 = vld [vmem:[#allocation4 + $0x48] sm:$0xff] }
 0x27d   : > { %2633 = vst.msk [vmem:[#allocation4 + $0x51] sm:$0xff] %vm1867_vm2, %v2586_v15  ;;  %v2965_v41 = vmul.f32 %v5267_v36, %v2948_v17  ;;  %v2998_v40 = vld [vmem:[#allocation4 + $0x49] sm:$0xff]  ;;  %v2816_v9 = vmul.f32 %v5205_v27, %v2948_v17 }
 0x27e   : > { %v3015_v44 = vmul.f32 %v5288_v33, %v2998_v40  ;;  %v2866_v51 = vmul.f32 %v5227_v43, %v2998_v40  ;;  %v2718_v57 = vmul.f32 %v5145_v4, %v2998_v40 }
 0x27f   : > { %v2981_v25 = vadd.f32 %v2965_v41, %v2930_v39  ;;  %v2832_v1 = vadd.f32 %v2816_v9, %v5369_v20  ;;  %v2668_v39 = vmul.f32 %v5140_v55, %v2948_v17 }
 0x281   : > { %v3031_v13 = vadd.f32 %v3015_v44, %v2981_v25  ;;  %v2882_v15 = vadd.f32 %v2866_v51, %v2832_v1 }
 0x284   : > { %v3048_v47 = vld [vmem:[#allocation4 + $0x4a] sm:$0xff]  ;;  %v5419_v61 = vld [vmem:[#allocation4 + $0x52] sm:$0xff] }
 0x285   : > { %v2949_v2 = vld [vmem:[#allocation4 + $0x50] sm:$0xff]  ;;  %v3065_v56 = vmul.f32 %v5308_v28, %v3048_v47  ;;  %v3066_v24 = vmul.f32 %v5308_v28, %v5419_v61  ;;  %v2916_v58 = vmul.f32 %v5239_v32, %v3048_v47  ;;  %v2768_v26 = vmul.f32 %v5171_v54, %v3048_v47 }
 0x286   : > { %v2999_v46 = vld [vmem:[#allocation4 + $0x51] sm:$0xff]  ;;  %v2966_v37 = vmul.f32 %v5267_v36, %v2949_v2  ;;  %v2817_v30 = vmul.f32 %v5205_v27, %v2949_v2 }
 0x287   : > { %v3081_v45 = vadd.f32 %v3065_v56, %v3031_v13  ;;  %v3016_v60 = vmul.f32 %v5288_v33, %v2999_v46  ;;  %v2932_v21 = vadd.f32 %v2916_v58, %v2882_v15  ;;  %v2867_v41 = vmul.f32 %v5227_v43, %v2999_v46 }
 0x288   : > { %v2982_v29 = vadd.f32 %v2966_v37, %v2931_v53  ;;  %v2833_v62 = vadd.f32 %v2817_v30, %v5377_v59  ;;  %v2669_v59 = vmul.f32 %v5140_v55, %v2949_v2  ;;  %v2719_v13 = vmul.f32 %v5145_v4, %v2999_v46 }
 0x289   : > { %v3101_v14 = vmul.f32 %v5331_v10, %v3081_v45  ;;  %v2917_v37 = vmul.f32 %v5239_v32, %v5419_v61 }
 0x28a   : > { %v3032_v6 = vadd.f32 %v3016_v60, %v2982_v29  ;;  %v2883_v44 = vadd.f32 %v2867_v41, %v2833_v62  ;;  %v2734_v29 = vadd.f32 %v2718_v57, %v2668_v39 }
 0x28b   : > { %v3121_v0 = vadd.f32 %v5345_v3, %v3101_v14 }
 0x28c   : > { %v3082_v52 = vadd.f32 %v3066_v24, %v3032_v6  ;;  %v2933_v60 = vadd.f32 %v2917_v37, %v2883_v44 }
 0x28d   : > { %v3137_v7 = vmax.f32 %v3121_v0, 0.0  ;;  %v2784_v0 = vadd.f32 %v2768_v26, %v2734_v29 }
 0x28e   : > { %v3102_v38 = vmul.f32 %v5331_v10, %v3082_v52  ;;  %v2735_v52 = vadd.f32 %v2719_v13, %v2669_v59 }
 0x28f   : > { %3465 = vmatmul.msk.f32.gmra.mxu1 %vm1867_vm2, %v3137_v7 }
 0x290   : > { %v3122_v50 = vadd.f32 %v5345_v3, %v3102_v38 }
 0x291   : > { %v2511_v5 = vpop.f32.mrf.mxu0 }
 0x292   : > { %v2551_v48 = vmul.f32 %v5056_v49, %v2511_v5  ;;  %v3138_v22 = vmax.f32 %v3122_v50, 0.0 }
 0x294   : > { %v2571_v8 = vadd.f32 %v5063_v12, %v2551_v48 }
 0x296   : > { %v2587_v11 = vmax.f32 %v2571_v8, 0.0 }
 0x297   : > { %3466 = vmatmul.msk.f32.gmra.mxu1 %vm1867_vm2, %v3138_v22  ;;  %v2769_v22 = vmul.f32 %v5171_v54, %v5419_v61 }
 0x298   : > { %2634 = vst.msk [vmem:[#allocation4 + $0x61] sm:$0xff] %vm1867_vm2, %v2587_v11 }
 0x299   : > { %v2514_v16 = vpop.f32.mrf.mxu0  ;;  %v2785_v1 = vadd.f32 %v2769_v22, %v2735_v52 }
 0x29a   : > { %v2552_v18 = vmul.f32 %v5056_v49, %v2514_v16 }
 0x29c   : > { %v2572_v31 = vadd.f32 %v5063_v12, %v2552_v18 }
 0x29e   : > { %v2588_v63 = vmax.f32 %v2572_v31, 0.0 }
 0x29f   : > { %v5440_v42 = vld [vmem:[#allocation4 + $0x60] sm:$0xff] }
 0x2a0   : > { %2635 = vst.msk [vmem:[#allocation4 + $0x69] sm:$0xff] %vm1867_vm2, %v2588_v63  ;;  %v2967_v19 = vmul.f32 %v5267_v36, %v5440_v42  ;;  %v5448_v34 = vld [vmem:[#allocation4 + $0x61] sm:$0xff]  ;;  %v2818_v47 = vmul.f32 %v5205_v27, %v5440_v42 }
 0x2a1   : > { %v2517_v23 = vpop.f32.mrf.mxu2  ;;  %v3017_v53 = vmul.f32 %v5288_v33, %v5448_v34  ;;  %v2868_v31 = vmul.f32 %v5227_v43, %v5448_v34 }
 0x2a2   : > { %v2553_v20 = vmul.f32 %v5056_v49, %v2517_v23  ;;  %v2983_v35 = vadd.f32 %v2967_v19, %v2932_v21  ;;  %v2834_v48 = vadd.f32 %v2818_v47, %v2784_v0 }
 0x2a4   : > { %v2573_v25 = vadd.f32 %v5063_v12, %v2553_v20  ;;  %v3033_v2 = vadd.f32 %v3017_v53, %v2983_v35  ;;  %v2884_v23 = vadd.f32 %v2868_v31, %v2834_v48 }
 0x2a6   : > { %v2589_v56 = vmax.f32 %v2573_v25, 0.0 }
 0x2a7   : > { %v5460_v17 = vld [vmem:[#allocation4 + $0x62] sm:$0xff]  ;;  %v5473_v24 = vld [vmem:[#allocation4 + $0x6a] sm:$0xff] }
 0x2a8   : > { %v5462_v40 = vld [vmem:[#allocation4 + $0x68] sm:$0xff]  ;;  %2636 = vst.msk [vmem:[#allocation4 + $0x79] sm:$0xff] %vm1867_vm2, %v2589_v56  ;;  %v3067_v46 = vmul.f32 %v5308_v28, %v5460_v17  ;;  %v3068_v18 = vmul.f32 %v5308_v28, %v5473_v24  ;;  %v2918_v61 = vmul.f32 %v5239_v32, %v5460_v17  ;;  %v2919_v44 = vmul.f32 %v5239_v32, %v5473_v24 }
 0x2a9   : > { %v5464_v45 = vld [vmem:[#allocation4 + $0x69] sm:$0xff]  ;;  %v2968_v14 = vmul.f32 %v5267_v36, %v5462_v40  ;;  %v2520_v6 = vpop.f32.mrf.mxu2  ;;  %v2819_v8 = vmul.f32 %v5205_v27, %v5462_v40 }
 0x2aa   : > { %v2554_v7 = vmul.f32 %v5056_v49, %v2520_v6  ;;  %v3083_v38 = vadd.f32 %v3067_v46, %v3033_v2  ;;  %v3018_v5 = vmul.f32 %v5288_v33, %v5464_v45  ;;  %v2869_v21 = vmul.f32 %v5227_v43, %v5464_v45 }
 0x2ab   : > { %v2984_v50 = vadd.f32 %v2968_v14, %v2933_v60  ;;  %v2835_v15 = vadd.f32 %v2819_v8, %v2785_v1  ;;  %v2934_v41 = vadd.f32 %v2918_v61, %v2884_v23  ;;  %v2770_v1 = vmul.f32 %v5171_v54, %v5460_v17 }
 0x2ac   : > { %v2574_v11 = vadd.f32 %v5063_v12, %v2554_v7  ;;  %v3103_v9 = vmul.f32 %v5331_v10, %v3083_v38 }
 0x2ad   : > { %v3034_v16 = vadd.f32 %v3018_v5, %v2984_v50  ;;  %v2885_v57 = vadd.f32 %v2869_v21, %v2835_v15 }
 0x2ae   : > { %v2590_v30 = vmax.f32 %v2574_v11, 0.0  ;;  %v3123_v63 = vadd.f32 %v5345_v3, %v3103_v9 }
 0x2af   : > { %v3084_v51 = vadd.f32 %v3068_v18, %v3034_v16  ;;  %v5491_v58 = vld [vmem:[#allocation4 + $0x78] sm:$0xff]  ;;  %v2935_v13 = vadd.f32 %v2919_v44, %v2885_v57  ;;  %v2670_v16 = vmul.f32 %v5140_v55, %v5440_v42  ;;  %v2720_v18 = vmul.f32 %v5145_v4, %v5448_v34 }
 0x2b0   : > { %2637 = vst.msk [vmem:[#allocation4 + $0x81] sm:$0xff] %vm1867_vm2, %v2590_v30  ;;  %v3139_v19 = vmax.f32 %v3123_v63, 0.0  ;;  %v2969_v20 = vmul.f32 %v5267_v36, %v5491_v58  ;;  %v5500_v39 = vld [vmem:[#allocation4 + $0x79] sm:$0xff]  ;;  %v2671_v30 = vmul.f32 %v5140_v55, %v5462_v40  ;;  %v2721_v63 = vmul.f32 %v5145_v4, %v5464_v45 }
 0x2b1   : > { %v3104_v62 = vmul.f32 %v5331_v10, %v3084_v51  ;;  %v3019_v26 = vmul.f32 %v5288_v33, %v5500_v39  ;;  %v2736_v61 = vadd.f32 %v2720_v18, %v2670_v16  ;;  %v2820_v42 = vmul.f32 %v5205_v27, %v5491_v58 }
 0x2b2   : > { %3467 = vmatmul.msk.f32.gmra.mxu1 %vm1867_vm2, %v3139_v19  ;;  %v2985_v35 = vadd.f32 %v2969_v20, %v2934_v41  ;;  %v2737_v17 = vadd.f32 %v2721_v63, %v2671_v30  ;;  %v2771_v45 = vmul.f32 %v5171_v54, %v5473_v24  ;;  %v2870_v21 = vmul.f32 %v5227_v43, %v5500_v39 }
 0x2b3   : > { %v3124_v25 = vadd.f32 %v5345_v3, %v3104_v62  ;;  %v2786_v19 = vadd.f32 %v2770_v1, %v2736_v61 }
 0x2b4   : > { %v3035_v29 = vadd.f32 %v3019_v26, %v2985_v35  ;;  %v2787_v57 = vadd.f32 %v2771_v45, %v2737_v17 }
 0x2b5   : > { %v3140_v37 = vmax.f32 %v3124_v25, 0.0  ;;  %v2836_v40 = vadd.f32 %v2820_v42, %v2786_v19 }
 0x2b7   : > { %v5507_v59 = vld [vmem:[#allocation4 + $0x7a] sm:$0xff]  ;;  %v5517_v46 = vld [vmem:[#allocation4 + $0x82] sm:$0xff]  ;;  %v2886_v35 = vadd.f32 %v2870_v21, %v2836_v40 }
 0x2b8   : > { %v5509_v56 = vld [vmem:[#allocation4 + $0x80] sm:$0xff]  ;;  %v3069_v47 = vmul.f32 %v5308_v28, %v5507_v59  ;;  %v3070_v7 = vmul.f32 %v5308_v28, %v5517_v46  ;;  %v2920_v41 = vmul.f32 %v5239_v32, %v5507_v59  ;;  %v2772_v17 = vmul.f32 %v5171_v54, %v5507_v59 }
 0x2b9   : > { %v5511_v53 = vld [vmem:[#allocation4 + $0x81] sm:$0xff]  ;;  %v2970_v2 = vmul.f32 %v5267_v36, %v5509_v56  ;;  %v2821_v23 = vmul.f32 %v5205_v27, %v5509_v56 }
 0x2ba   : > { %3468 = vmatmul.msk.f32.gmra.mxu1 %vm1867_vm2, %v3140_v37  ;;  %v3085_v60 = vadd.f32 %v3069_v47, %v3035_v29  ;;  %v3020_v6 = vmul.f32 %v5288_v33, %v5511_v53  ;;  %v2936_v26 = vadd.f32 %v2920_v41, %v2886_v35  ;;  %v2773_v41 = vmul.f32 %v5171_v54, %v5517_v46 }
 0x2bb   : > { %v2986_v14 = vadd.f32 %v2970_v2, %v2935_v13  ;;  %v2837_v24 = vadd.f32 %v2821_v23, %v2787_v57  ;;  %v2871_v13 = vmul.f32 %v5227_v43, %v5511_v53 }
 0x2bc   : > { %v3105_v0 = vmul.f32 %v5331_v10, %v3085_v60  ;;  %v2921_v60 = vmul.f32 %v5239_v32, %v5517_v46 }
 0x2bd   : > { %v3036_v52 = vadd.f32 %v3020_v6, %v2986_v14  ;;  %v2887_v47 = vadd.f32 %v2871_v13, %v2837_v24 }
 0x2be   : > { %v3125_v38 = vadd.f32 %v5345_v3, %v3105_v0 }
 0x2bf   : > { %v3086_v50 = vadd.f32 %v3070_v7, %v3036_v52 }
 0x2c0   : > { %v3141_v5 = vmax.f32 %v3125_v38, 0.0  ;;  %v2937_v38 = vadd.f32 %v2921_v60, %v2887_v47 }
 0x2c1   : > { %v3106_v48 = vmul.f32 %v5331_v10, %v3086_v50  ;;  %v2523_v22 = vpop.f32.mrf.mxu2 }
 0x2c2   : > { %v2555_v8 = vmul.f32 %v5056_v49, %v2523_v22  ;;  %3469 = vmatmul.msk.f32.gmra.mxu1 %vm1867_vm2, %v3141_v5 }
 0x2c3   : > { %v3126_v9 = vadd.f32 %v5345_v3, %v3106_v48 }
 0x2c4   : > { %v2575_v11 = vadd.f32 %v5063_v12, %v2555_v8 }
 0x2c5   : > { %v3142_v51 = vmax.f32 %v3126_v9, 0.0 }
 0x2c6   : > { %v2591_v31 = vmax.f32 %v2575_v11, 0.0 }
 0x2c8   : > { %2638 = vst.msk [vmem:[#allocation4 + $0x91] sm:$0xff] %vm1867_vm2, %v2591_v31 }
 0x2c9   : > { %v2526_v15 = vpop.f32.mrf.mxu2 }
 0x2ca   : > { %v2556_v34 = vmul.f32 %v5056_v49, %v2526_v15  ;;  %3470 = vmatmul.msk.f32.gmra.mxu1 %vm1867_vm2, %v3142_v51  ;;  %v2672_v15 = vmul.f32 %v5140_v55, %v5491_v58 }
 0x2cc   : > { %v2576_v62 = vadd.f32 %v5063_v12, %v2556_v34  ;;  %v2722_v34 = vmul.f32 %v5145_v4, %v5500_v39  ;;  %v3587_v39 = vld [vmem:[%s5796_s8] ss:$0 sm:$0xff] }
 0x2ce   : > { %v2592_v20 = vmax.f32 %v2576_v62, 0.0  ;;  %v2673_v62 = vmul.f32 %v5140_v55, %v5509_v56  ;;  %v2738_v40 = vadd.f32 %v2722_v34, %v2672_v15 }
 0x2cf   : > { %v5555_v25 = vld [vmem:[#allocation4 + $0x90] sm:$0xff] }
 0x2d0   : > { %2639 = vst.msk [vmem:[#allocation4 + $0x99] sm:$0xff] %vm1867_vm2, %v2592_v20  ;;  %v2971_v44 = vmul.f32 %v5267_v36, %v5555_v25  ;;  %v5562_v37 = vld [vmem:[#allocation4 + $0x91] sm:$0xff]  ;;  %v2822_v58 = vmul.f32 %v5205_v27, %v5555_v25  ;;  %v2788_v59 = vadd.f32 %v2772_v17, %v2738_v40 }
 0x2d1   : > { %v3021_v2 = vmul.f32 %v5288_v33, %v5562_v37 }
 0x2d2   : > { %v2987_v29 = vadd.f32 %v2971_v44, %v2936_v26  ;;  %v2838_v21 = vadd.f32 %v2822_v58, %v2788_v59  ;;  %v2872_v44 = vmul.f32 %v5227_v43, %v5562_v37  ;;  %v3590_v59 = vld [vmem:[%s5798_s10 + $0x1] ss:$0 sm:$0xff] }
 0x2d4   : > { %v3037_v52 = vadd.f32 %v3021_v2, %v2987_v29  ;;  %v2888_v29 = vadd.f32 %v2872_v44, %v2838_v21 }
 0x2d7   : > { %v5568_v14 = vld [vmem:[#allocation4 + $0x92] sm:$0xff]  ;;  %v5578_v5 = vld [vmem:[#allocation4 + $0x9a] sm:$0xff] }
 0x2d8   : > { %v5570_v6 = vld [vmem:[#allocation4 + $0x98] sm:$0xff]  ;;  %v3071_v7 = vmul.f32 %v5308_v28, %v5568_v14  ;;  %v3072_v16 = vmul.f32 %v5308_v28, %v5578_v5  ;;  %v2922_v24 = vmul.f32 %v5239_v32, %v5568_v14 }
 0x2d9   : > { %v5572_v0 = vld [vmem:[#allocation4 + $0x99] sm:$0xff]  ;;  %v2972_v50 = vmul.f32 %v5267_v36, %v5570_v6  ;;  %v2823_v57 = vmul.f32 %v5205_v27, %v5570_v6 }
 0x2da   : > { %v3087_v48 = vadd.f32 %v3071_v7, %v3037_v52  ;;  %v3022_v8 = vmul.f32 %v5288_v33, %v5572_v0  ;;  %v2938_v52 = vadd.f32 %v2922_v24, %v2888_v29  ;;  %v2873_v7 = vmul.f32 %v5227_v43, %v5572_v0 }
 0x2db   : > { %v2988_v22 = vadd.f32 %v2972_v50, %v2937_v38  ;;  %v2674_v50 = vmul.f32 %v5140_v55, %v5555_v25  ;;  %v2923_v25 = vmul.f32 %v5239_v32, %v5578_v5 }
 0x2dc   : > { %v3107_v11 = vmul.f32 %v5331_v10, %v3087_v48  ;;  %v2724_v48 = vmul.f32 %v5145_v4, %v5562_v37 }
 0x2dd   : > { %v3038_v9 = vadd.f32 %v3022_v8, %v2988_v22 }
 0x2de   : > { %v3127_v18 = vadd.f32 %v5345_v3, %v3107_v11 }
 0x2df   : > { %v3088_v31 = vadd.f32 %v3072_v16, %v3038_v9  ;;  %v2774_v9 = vmul.f32 %v5171_v54, %v5568_v14  ;;  %v2675_v16 = vmul.f32 %v5140_v55, %v5570_v6 }
 0x2e0   : > { %v3143_v1 = vmax.f32 %v3127_v18, 0.0  ;;  %v2725_v18 = vmul.f32 %v5145_v4, %v5572_v0 }
 0x2e1   : > { %v3108_v30 = vmul.f32 %v5331_v10, %v3088_v31  ;;  %v2529_v63 = vpop.f32.mrf.mxu2 }
 0x2e2   : > { %v2557_v51 = vmul.f32 %v5056_v49, %v2529_v63  ;;  %3471 = vmatmul.msk.f32.vlgmr.msra.gmra.mxu3 %vm1867_vm2, %v3143_v1  ;;  %v2723_v49 = vmul.f32 %v5145_v4, %v5511_v53  ;;  %v3588_v53 = vld [vmem:[%s5797_s9] ss:$0 sm:$0xff]  ;;  %v2741_v34 = vadd.f32 %v2725_v18, %v2675_v16  ;;  %v2960_v18 = vld [vmem:[#allocation4 + $0xd8] sm:$0xff] }
 0x2e3   : > { %v3128_v42 = vadd.f32 %v5345_v3, %v3108_v30 }
 0x2e4   : > { %v2577_v61 = vadd.f32 %v5063_v12, %v2557_v51  ;;  %v2739_v56 = vadd.f32 %v2723_v49, %v2673_v62  ;;  %v2740_v51 = vadd.f32 %v2724_v48, %v2674_v50 }
 0x2e5   : > { %v3144_v12 = vmax.f32 %v3128_v42, 0.0 }
 0x2e6   : > { %v2593_v19 = vmax.f32 %v2577_v61, 0.0  ;;  %v2789_v26 = vadd.f32 %v2773_v41, %v2739_v56  ;;  %v2790_v15 = vadd.f32 %v2774_v9, %v2740_v51 }
 0x2e8   : > { %2640 = vst.msk [vmem:[#allocation4 + $0xa9] sm:$0xff] %vm1867_vm2, %v2593_v19  ;;  %v2839_v2 = vadd.f32 %v2823_v57, %v2789_v26  ;;  %v2775_v19 = vmul.f32 %v5171_v54, %v5578_v5 }
 0x2e9   : > { %v2532_v45 = vpop.f32.mrf.mxu2 }
 0x2ea   : > { %v2558_v23 = vmul.f32 %v3587_v39, %v2532_v45  ;;  %3472 = vmatmul.msk.f32.gmra.mxu3 %vm1867_vm2, %v3144_v12  ;;  %v2889_v11 = vadd.f32 %v2873_v7, %v2839_v2  ;;  %v3589_v45 = vld [vmem:[%s5798_s10] ss:$0 sm:$0xff] }
 0x2ec   : > { %v2578_v20 = vadd.f32 %v3588_v53, %v2558_v23  ;;  %v2939_v6 = vadd.f32 %v2923_v25, %v2889_v11 }
 0x2ee   : > { %v2594_v35 = vmax.f32 %v2578_v20, 0.0 }
 0x2ef   : > { %v2956_v13 = vld [vmem:[#allocation4 + $0xa8] sm:$0xff] }
 0x2f0   : > { %2641 = vst.msk [vmem:[#allocation4 + $0xb1] sm:$0xff] %vm1867_vm2, %v2594_v35  ;;  %v2973_v47 = vmul.f32 %v5267_v36, %v2956_v13  ;;  %v3006_v38 = vld [vmem:[#allocation4 + $0xa9] sm:$0xff]  ;;  %v2824_v61 = vmul.f32 %v5205_v27, %v2956_v13  ;;  %v2676_v23 = vmul.f32 %v3589_v45, %v2956_v13  ;;  %v2791_v35 = vadd.f32 %v2775_v19, %v2741_v34 }
 0x2f1   : > { %v2535_v60 = vpop.f32.mrf.mxu2  ;;  %v3023_v1 = vmul.f32 %v5288_v33, %v3006_v38  ;;  %v2726_v56 = vmul.f32 %v3590_v59, %v3006_v38  ;;  %v2874_v41 = vmul.f32 %v5227_v43, %v3006_v38 }
 0x2f2   : > { %v2559_v46 = vmul.f32 %v3587_v39, %v2535_v60  ;;  %v2989_v8 = vadd.f32 %v2973_v47, %v2938_v52  ;;  %v2840_v40 = vadd.f32 %v2824_v61, %v2790_v15 }
 0x2f4   : > { %v2579_v22 = vadd.f32 %v3588_v53, %v2559_v46  ;;  %v3039_v14 = vadd.f32 %v3023_v1, %v2989_v8  ;;  %v2890_v29 = vadd.f32 %v2874_v41, %v2840_v40  ;;  %v3592_v40 = vld [vmem:[%s5798_s10 + $0x3] ss:$0 sm:$0xff] }
 0x2f6   : > { %v2595_v31 = vmax.f32 %v2579_v22, 0.0 }
 0x2f7   : > { %v3056_v30 = vld [vmem:[#allocation4 + $0xaa] sm:$0xff]  ;;  %v3057_v42 = vld [vmem:[#allocation4 + $0xb2] sm:$0xff] }
 0x2f8   : > { %v2957_v37 = vld [vmem:[#allocation4 + $0xb0] sm:$0xff]  ;;  %2642 = vst.msk [vmem:[#allocation4 + $0xc1] sm:$0xff] %vm1867_vm2, %v2595_v31  ;;  %v3073_v55 = vmul.f32 %v5308_v28, %v3056_v30  ;;  %v3074_v21 = vmul.f32 %v5308_v28, %v3057_v42  ;;  %v2924_v57 = vmul.f32 %v5239_v32, %v3056_v30  ;;  %v2776_v13 = vmul.f32 %v5171_v54, %v3056_v30 }
 0x2f9   : > { %v3007_v63 = vld [vmem:[#allocation4 + $0xb1] sm:$0xff]  ;;  %v2974_v4 = vmul.f32 %v5267_v36, %v2957_v37  ;;  %v2538_v0 = vpop.f32.mrf.mxu2  ;;  %v2825_v58 = vmul.f32 %v5205_v27, %v2957_v37  ;;  %v2677_v48 = vmul.f32 %v3589_v45, %v2957_v37  ;;  %v2925_v25 = vmul.f32 %v5239_v32, %v3057_v42 }
 0x2fa   : > { %v2560_v17 = vmul.f32 %v3587_v39, %v2538_v0  ;;  %v3089_v62 = vadd.f32 %v3073_v55, %v3039_v14  ;;  %v3024_v12 = vmul.f32 %v5288_v33, %v3007_v63  ;;  %v2875_v7 = vmul.f32 %v5227_v43, %v3007_v63 }
 0x2fb   : > { %v2990_v49 = vadd.f32 %v2974_v4, %v2939_v6  ;;  %v2841_v2 = vadd.f32 %v2825_v58, %v2791_v35  ;;  %v2940_v38 = vadd.f32 %v2924_v57, %v2890_v29  ;;  %v2727_v22 = vmul.f32 %v3590_v59, %v3007_v63  ;;  %v3591_v4 = vld [vmem:[%s5798_s10 + $0x2] ss:$0 sm:$0xff]  ;;  %v3060_v35 = vld [vmem:[#allocation4 + $0xda] sm:$0xff] }
 0x2fc   : > { %v2580_v20 = vadd.f32 %v3588_v53, %v2560_v17  ;;  %v3109_v5 = vmul.f32 %v5331_v10, %v3089_v62  ;;  %v2742_v53 = vadd.f32 %v2726_v56, %v2676_v23  ;;  %v2777_v0 = vmul.f32 %v3591_v4, %v3057_v42  ;;  %v3010_v62 = vld [vmem:[#allocation4 + $0xd9] sm:$0xff] }
 0x2fd   : > { %v3040_v39 = vadd.f32 %v3024_v12, %v2990_v49  ;;  %v2891_v16 = vadd.f32 %v2875_v7, %v2841_v2  ;;  %v2743_v30 = vadd.f32 %v2727_v22, %v2677_v48  ;;  %v3027_v56 = vmul.f32 %v5288_v33, %v3010_v62  ;;  %v3061_v22 = vld [vmem:[#allocation4 + $0xe2] sm:$0xff] }
 0x2fe   : > { %v2596_v44 = vmax.f32 %v2580_v20, 0.0  ;;  %v3129_v24 = vadd.f32 %v5345_v3, %v3109_v5  ;;  %v2792_v8 = vadd.f32 %v2776_v13, %v2742_v53 }
 0x2ff   : > { %v3090_v26 = vadd.f32 %v3074_v21, %v3040_v39  ;;  %v2958_v47 = vld [vmem:[#allocation4 + $0xc0] sm:$0xff]  ;;  %v2941_v14 = vadd.f32 %v2925_v25, %v2891_v16  ;;  %v2793_v12 = vadd.f32 %v2777_v0, %v2743_v30 }
 0x300   : > { %2643 = vst.msk [vmem:[#allocation4 + $0xc9] sm:$0xff] %vm1867_vm2, %v2596_v44  ;;  %v3145_v60 = vmax.f32 %v3129_v24, 0.0  ;;  %v2975_v52 = vmul.f32 %v5267_v36, %v2958_v47  ;;  %v2826_v50 = vmul.f32 %v5205_v27, %v2958_v47  ;;  %v3008_v54 = vld [vmem:[#allocation4 + $0xc1] sm:$0xff]  ;;  %v2977_v27 = vmul.f32 %v5267_v36, %v2960_v18 }
 0x301   : > { %v3110_v46 = vmul.f32 %v5331_v10, %v3090_v26  ;;  %v3025_v1 = vmul.f32 %v5288_v33, %v3008_v54  ;;  %v2876_v51 = vmul.f32 %v5227_v43, %v3008_v54  ;;  %v2961_v44 = vld [vmem:[#allocation4 + $0xe0] sm:$0xff]  ;;  %v3077_v47 = vmul.f32 %v5308_v28, %v3060_v35 }
 0x302   : > { %3473 = vmatmul.msk.f32.gmra.mxu3 %vm1867_vm2, %v3145_v60  ;;  %v2991_v9 = vadd.f32 %v2975_v52, %v2940_v38  ;;  %v2842_v31 = vadd.f32 %v2826_v50, %v2792_v8  ;;  %v2978_v2 = vmul.f32 %v5267_v36, %v2961_v44  ;;  %v3011_v52 = vld [vmem:[#allocation4 + $0xe1] sm:$0xff] }
 0x303   : > { %v3130_v11 = vadd.f32 %v5345_v3, %v3110_v46  ;;  %v3028_v48 = vmul.f32 %v5288_v33, %v3011_v52 }
 0x304   : > { %v3041_v63 = vadd.f32 %v3025_v1, %v2991_v9  ;;  %v2892_v19 = vadd.f32 %v2876_v51, %v2842_v31  ;;  %v3220_v1 = vpop.f32.mrf.mxu1 }
 0x305   : > { %v3146_v37 = vmax.f32 %v3130_v11, 0.0 }
 0x307   : > { %v3058_v61 = vld [vmem:[#allocation4 + $0xc2] sm:$0xff]  ;;  %v3059_v49 = vld [vmem:[#allocation4 + $0xca] sm:$0xff] }
 0x308   : > { %v2959_v55 = vld [vmem:[#allocation4 + $0xc8] sm:$0xff]  ;;  %v3075_v15 = vmul.f32 %v5308_v28, %v3058_v61  ;;  %v2926_v17 = vmul.f32 %v5239_v32, %v3058_v61  ;;  %v3076_v41 = vmul.f32 %v5308_v28, %v3059_v49  ;;  %v2927_v29 = vmul.f32 %v5239_v32, %v3059_v49 }
 0x309   : > { %v3009_v6 = vld [vmem:[#allocation4 + $0xc9] sm:$0xff]  ;;  %v2976_v34 = vmul.f32 %v5267_v36, %v2959_v55  ;;  %v2827_v58 = vmul.f32 %v3592_v40, %v2959_v55  ;;  %v3078_v36 = vmul.f32 %v5308_v28, %v3061_v22 }
 0x30a   : > { %3474 = vmatmul.msk.f32.gmra.mxu3 %vm1867_vm2, %v3146_v37  ;;  %v3091_v45 = vadd.f32 %v3075_v15, %v3041_v63  ;;  %v3026_v42 = vmul.f32 %v5288_v33, %v3009_v6  ;;  %v2942_v59 = vadd.f32 %v2926_v17, %v2892_v19  ;;  %v2877_v5 = vmul.f32 %v5227_v43, %v3009_v6  ;;  %v5708_v6 = vld [vmem:[%s5803_s15] ss:$0 sm:$0xff] }
 0x30b   : > { %v2992_v23 = vadd.f32 %v2976_v34, %v2941_v14  ;;  %v2843_v20 = vadd.f32 %v2827_v58, %v2793_v12 }
 0x30c   : > { %v3111_v39 = vmul.f32 %v5331_v10, %v3091_v45  ;;  %v2993_v57 = vadd.f32 %v2977_v27, %v2942_v59  ;;  %v3223_v25 = vpop.f32.mrf.mxu1 }
 0x30d   : > { %v3042_v21 = vadd.f32 %v3026_v42, %v2992_v23  ;;  %v2893_v24 = vadd.f32 %v2877_v5, %v2843_v20 }
 0x30e   : > { %v3131_v26 = vadd.f32 %v5345_v3, %v3111_v39  ;;  %v3043_v60 = vadd.f32 %v3027_v56, %v2993_v57 }
 0x30f   : > { %v3092_v13 = vadd.f32 %v3076_v41, %v3042_v21  ;;  %v2943_v46 = vadd.f32 %v2927_v29, %v2893_v24 }
 0x310   : > { %v3147_v53 = vmax.f32 %v3131_v26, 0.0  ;;  %v3093_v38 = vadd.f32 %v3077_v47, %v3043_v60 }
 0x311   : > { %v3112_v43 = vmul.f32 %v5331_v10, %v3092_v13  ;;  %v2994_v50 = vadd.f32 %v2978_v2, %v2943_v46 }
 0x312   : > { %3475 = vmatmul.msk.f32.gmra.mxu3 %vm1867_vm2, %v3147_v53  ;;  %v3113_v54 = vmul.f32 %v5331_v10, %v3093_v38 }
 0x313   : > { %v3132_v7 = vadd.f32 %v5345_v3, %v3112_v43  ;;  %v3044_v8 = vadd.f32 %v3028_v48, %v2994_v50 }
 0x314   : > { %v3133_v11 = vadd.f32 %v5345_v3, %v3113_v54  ;;  %v3226_v30 = vpop.f32.mrf.mxu1 }
 0x315   : > { %v3148_v32 = vmax.f32 %v3132_v7, 0.0  ;;  %v3094_v9 = vadd.f32 %v3078_v36, %v3044_v8 }
 0x316   : > { %v3149_v16 = vmax.f32 %v3133_v11, 0.0 }
 0x317   : > { %v3114_v18 = vmul.f32 %v5331_v10, %v3094_v9  ;;  %v5701_v10 = vld [vmem:[%s5802_s14] ss:$0 sm:$0xff] }
 0x318   : > { %v3272_v55 = vmul.f32 %v5701_v10, %v3220_v1  ;;  %v3274_v4 = vmul.f32 %v5701_v10, %v3226_v30 }
 0x319   : > { %v3134_v31 = vadd.f32 %v5345_v3, %v3114_v18  ;;  %v3273_v3 = vmul.f32 %v5701_v10, %v3223_v25 }
 0x31a   : > { %3476 = vmatmul.msk.f32.gmra.mxu3 %vm1867_vm2, %v3148_v32  ;;  %v3292_v19 = vadd.f32 %v5708_v6, %v3272_v55  ;;  %v3294_v17 = vadd.f32 %v5708_v6, %v3274_v4  ;;  %v3659_v4 = vmov 128.0  }
 0x31b   : > { %v3150_v33 = vmax.f32 %v3134_v31, 0.0  ;;  %v3293_v15 = vadd.f32 %v5708_v6, %v3273_v3  ;;  %3566 = vrcp.f32 %v3659_v4 }
 0x31c   : > { %v3229_v51 = vpop.f32.mrf.mxu1  ;;  %v3308_v58 = vmax.f32 %v3292_v19, 0.0  ;;  %v3310_v23 = vmax.f32 %v3294_v17, 0.0 }
 0x31d   : > { %v3275_v34 = vmul.f32 %v5701_v10, %v3229_v51  ;;  %v3309_v49 = vmax.f32 %v3293_v15, 0.0 }
 0x31e   : > { %v3324_v41 = vsel %vm1867_vm2, %v3308_v58, 0.0  ;;  %v3327_v57 = vsel %vm1867_vm2, %v3310_v23, 0.0 }
 0x31f   : > { %v3295_v12 = vadd.f32 %v5708_v6, %v3275_v34  ;;  %v3325_v20 = vsel %vm1867_vm2, %v3309_v49, 0.0 }
 0x320   : > { %v3326_v26 = vadd.f32 %v3325_v20, %v3324_v41 }
 0x321   : > { %v3311_v5 = vmax.f32 %v3295_v12, 0.0  ;;  %v3567_v58 = vpop.eup %3566 }
 0x322   : > { %3477 = vmatmul.msk.f32.gmra.mxu3 %vm1867_vm2, %v3149_v16  ;;  %v3328_v53 = vadd.f32 %v3327_v57, %v3326_v26  ;;  %vm3366_vm5 = vweird.f32 %v3567_v58 }
 0x323   : > { %v3329_v13 = vsel %vm1867_vm2, %v3311_v5, 0.0 }
 0x324   : > { %v3330_v7 = vadd.f32 %v3329_v13, %v3328_v53 }
 0x32a   : > { %3478 = vmatmul.msk.f32.gmra.mxu3 %vm1867_vm2, %v3150_v33 }
 0x32f   : > { %v3232_v27 = vpop.f32.mrf.mxu1 }
 0x330   : > { %v3276_v62 = vmul.f32 %v5701_v10, %v3232_v27 }
 0x332   : > { %v3296_v42 = vadd.f32 %v5708_v6, %v3276_v62 }
 0x334   : > { %v3312_v35 = vmax.f32 %v3296_v42, 0.0 }
 0x336   : > { %v3331_v43 = vsel %vm1867_vm2, %v3312_v35, 0.0 }
 0x337   : > { %v3235_v63 = vpop.f32.mrf.mxu1  ;;  %v3332_v54 = vadd.f32 %v3331_v43, %v3330_v7 }
 0x338   : > { %v3277_v40 = vmul.f32 %v5701_v10, %v3235_v63 }
 0x33a   : > { %v3297_v39 = vadd.f32 %v5708_v6, %v3277_v40 }
 0x33c   : > { %v3313_v29 = vmax.f32 %v3297_v39, 0.0  ;;  %v3362_v39 = vmul.f32 128.0, %v3567_v58 }
 0x33e   : > { %v3333_v50 = vsel %vm1867_vm2, %v3313_v29, 0.0 }
 0x33f   : > { %v3238_v14 = vpop.f32.mrf.mxu1  ;;  %v3334_v16 = vadd.f32 %v3333_v50, %v3332_v54 }
 0x340   : > { %v3278_v59 = vmul.f32 %v5701_v10, %v3238_v14 }
 0x342   : > { %v3298_v44 = vadd.f32 %v5708_v6, %v3278_v59 }
 0x344   : > { %v3314_v60 = vmax.f32 %v3298_v44, 0.0  ;;  %v3363_v44 = vsub.f32 1.0, %v3362_v39 }
 0x346   : > { %v3335_v8 = vsel %vm1867_vm2, %v3314_v60, 0.0  ;;  %v3364_v13 = vmul.f32 %v3567_v58, %v3363_v44 }
 0x347   : > { %v3241_v45 = vpop.f32.mrf.mxu1  ;;  %v3336_v25 = vadd.f32 %v3335_v8, %v3334_v16 }
 0x348   : > { %v3279_v21 = vmul.f32 %v5701_v10, %v3241_v45 }
 0x34a   : > { %v3299_v47 = vadd.f32 %v5708_v6, %v3279_v21 }
 0x34c   : > { %v3315_v48 = vmax.f32 %v3299_v47, 0.0 }
 0x34e   : > { %v3337_v18 = vsel %vm1867_vm2, %v3315_v48, 0.0 }
 0x34f   : > { %v3338_v27 = vadd.f32 %v3337_v18, %v3336_v25 }
 0x365   : > { %v3244_v28 = vpop.f32.mrf.mxu3 }
 0x366   : > { %v3280_v24 = vmul.f32 %v5701_v10, %v3244_v28 }
 0x368   : > { %v3300_v46 = vadd.f32 %v5708_v6, %v3280_v24 }
 0x36a   : > { %v3316_v36 = vmax.f32 %v3300_v46, 0.0 }
 0x36c   : > { %v3339_v30 = vsel %vm1867_vm2, %v3316_v36, 0.0 }
 0x36d   : > { %v3247_v37 = vpop.f32.mrf.mxu3  ;;  %v3340_v55 = vadd.f32 %v3339_v30, %v3338_v27 }
 0x36e   : > { %v3281_v2 = vmul.f32 %v5701_v10, %v3247_v37 }
 0x370   : > { %v3301_v22 = vadd.f32 %v5708_v6, %v3281_v2 }
 0x372   : > { %v3317_v31 = vmax.f32 %v3301_v22, 0.0 }
 0x374   : > { %v3341_v63 = vsel %vm1867_vm2, %v3317_v31, 0.0 }
 0x375   : > { %v3342_v19 = vadd.f32 %v3341_v63, %v3340_v55 }
 0x385   : > { %v3250_v61 = vpop.f32.mrf.mxu3 }
 0x386   : > { %v3282_v52 = vmul.f32 %v5701_v10, %v3250_v61 }
 0x388   : > { %v3302_v11 = vadd.f32 %v5708_v6, %v3282_v52 }
 0x38a   : > { %v3318_v51 = vmax.f32 %v3302_v11, 0.0 }
 0x38d   : > { %v3253_v0 = vpop.f32.mrf.mxu3 }
 0x38e   : > { %v3283_v32 = vmul.f32 %v5701_v10, %v3253_v0  ;;  %v3343_v0 = vsel %vm1867_vm2, %v3318_v51, 0.0 }
 0x38f   : > { %v3344_v49 = vadd.f32 %v3343_v0, %v3342_v19 }
 0x390   : > { %v3303_v33 = vadd.f32 %v5708_v6, %v3283_v32 }
 0x392   : > { %v3319_v61 = vmax.f32 %v3303_v33, 0.0 }
 0x394   : > { %v3345_v17 = vsel %vm1867_vm2, %v3319_v61, 0.0 }
 0x395   : > { %v3256_v56 = vpop.f32.mrf.mxu3  ;;  %v3346_v45 = vadd.f32 %v3345_v17, %v3344_v49 }
 0x396   : > { %v3284_v9 = vmul.f32 %v5701_v10, %v3256_v56 }
 0x398   : > { %v3304_v28 = vadd.f32 %v5708_v6, %v3284_v9 }
 0x39a   : > { %v3320_v15 = vmax.f32 %v3304_v28, 0.0 }
 0x39c   : > { %v3347_v12 = vsel %vm1867_vm2, %v3320_v15, 0.0 }
 0x39d   : > { %v3259_v38 = vpop.f32.mrf.mxu3  ;;  %v3348_v56 = vadd.f32 %v3347_v12, %v3346_v45 }
 0x39e   : > { %v3285_v1 = vmul.f32 %v5701_v10, %v3259_v38 }
 0x3a0   : > { %v3305_v14 = vadd.f32 %v5708_v6, %v3285_v1 }
 0x3a2   : > { %v3321_v62 = vmax.f32 %v3305_v14, 0.0 }
 0x3a4   : > { %v3349_v42 = vsel %vm1867_vm2, %v3321_v62, 0.0 }
 0x3a5   : > { %v3262_v37 = vpop.f32.mrf.mxu3  ;;  %v3350_v21 = vadd.f32 %v3349_v42, %v3348_v56 }
 0x3a6   : > { %v3286_v3 = vmul.f32 %v5701_v10, %v3262_v37 }
 0x3a8   : > { %v3306_v34 = vadd.f32 %v5708_v6, %v3286_v3 }
 0x3aa   : > { %v3322_v40 = vmax.f32 %v3306_v34, 0.0 }
 0x3ac   : > { %v3351_v20 = vsel %vm1867_vm2, %v3322_v40, 0.0 }
 0x3ad   : > { %v3265_v23 = vpop.f32.mrf.mxu3  ;;  %v3352_v57 = vadd.f32 %v3351_v20, %v3350_v21 }
 0x3ae   : > { %v3287_v59 = vmul.f32 %v5701_v10, %v3265_v23  ;;  %v3365_v10 = vadd.f32 %v3567_v58, %v3364_v13 }
 0x3b0   : > { %v3307_v5 = vadd.f32 %v5708_v6, %v3287_v59  ;;  %v3367_v53 = vsel %vm3366_vm5, %v3567_v58, %v3365_v10 }
 0x3b2   : > { %v3323_v41 = vmax.f32 %v3307_v5, 0.0 }
 0x3b4   : > { %v3353_v35 = vsel %vm1867_vm2, %v3323_v41, 0.0 }
 0x3b5   : > { %v3354_v24 = vadd.f32 %v3353_v35, %v3352_v57 }
 0x3b7   : > { %v3355_v26 = vrot.slane %v3354_v24, 4 }
 0x3b9   : > { %v3356_v29 = vadd.f32 %v3355_v26, %v3354_v24 }
 0x3bb   : > { %v3357_v47 = vrot.slane %v3356_v29, 2 }
 0x3bd   : > { %v3358_v2 = vadd.f32 %v3357_v47, %v3356_v29 }
 0x3bf   : > { %v3359_v6 = vrot.slane %v3358_v2, 1 }
 0x3c1   : > { %v3360_v43 = vadd.f32 %v3359_v6, %v3358_v2 }
 0x3c3   : > { %v3368_v60 = vmul.f32 %v3367_v53, %v3360_v43 }
 0x3c5   : > { %3370 = vst.msk [vmem:[%s513_s29] sm:$0x1] %vm3369_vm6, %v3368_v60 }
 0x3c6   : > { %3620 = shalt.err (!%p3617_p3)
}
 0x3c7   : > { %3484 = dma.vmem_to_hbm [thread:$0]  (%p3783_p5), %s3383_s20, 16, %s3385_s1, %s3372_s2  }
 0x3c8 PF: > { %p3490_p4 = scmp.ge.s32.totalorder %s3655_s24, 2  ;;  %s3396_s26 = sand.u32 1, %s3643_s21  }
 0x3c9   : > { %s3397_s29 = scalar_lea.sflag [#allocation6], %s3396_s26 }
 0x3ca   : > { %p3487_p7 = pnand %p3490_p4, %p3787_p6 }
 0x3cc   : > { %p3488_p8 = pneg %p3487_p7 }
 0x3ce   : > { %3638 = dma.done.wait (%p3488_p8), %s3397_s29, 16  }
 0x3cf   : > { %3640 = vsyncadd (%p3488_p8), %s3397_s29, 4294967280  ;;  %p26_p9 = scmp.ge.s32.totalorder %s3770_s27, 4   ;;  %s5836_s21 = smov %s3647_s22 }
 0x3d0   : > { %s5837_s22 = smov %s3651_s23  ;;  %s5838_s23 = smov %s3781_s30 }
 0x3d1   : > { %s5839_s24 = smov %s3770_s27  ;;  %28 = sbr.rel (!%p26_p9) target bundleno = 10 (0xa), region = 125 }
 0x3d6   :  { %3402 = vsyncpa [#allocation6], 1 }
 0x3d7   :  { %3404 = vsyncpa [#allocation6 + $0x1], 1 }

</bundles_post_ra>
